<compile_context>
chip_gen: v7x
topology: tpu7x:2x2x1
jax: 0.10.0
libtpu: 0.0.40
codegen_flags: <defaults>
</compile_context>

<pallas_src>
import jax
import jax.numpy as jnp
from jax import lax
from jax.experimental import pallas as pl
from jax.experimental.pallas import tpu as pltpu

EPS = 1e-5
PAD_L = 16   # tap reads start at this column: a bf16 packed-tile (16-row) boundary


# ---------------------------------------------------------------------------
# Fused residualBlock kernel (conv+BN+ReLU+conv+BN), one image per grid step
# ---------------------------------------------------------------------------
def _make_residual_block_kernel(H, W, CP):
    HW = H * W
    bf16 = jnp.bfloat16

    def kernel(x_ref, w1_ref, h1_ref, w2_ref, h2_ref, o_ref, pad_ref):

        def conv(a_hwc, w):
            """3x3 'SAME' conv as ONE im2col matmul.
            a_hwc: (H, W, CP) bf16 activation; w: (9*CP, CP) bf16.
            Returns (H*W, CP) f32 (MXU, f32 accumulation)."""
            # three pre-shifted interior copies -> every tap read below starts
            # at the aligned column PAD_L (bf16 packed-tile boundary).
            for dx in range(3):
                s = PAD_L + 1 - dx
                pad_ref[dx, 1:H + 1, s:s + W, :] = a_hwc
            cols = [pad_ref[dx, dy:dy + H, PAD_L:PAD_L + W, :].reshape(HW, CP)
                    for dy in range(3) for dx in range(3)]
            patch = jnp.concatenate(cols, axis=1)             # (HW, 9*CP) bf16
            return jnp.dot(patch, w, preferred_element_type=jnp.float32)

        # --- zero ONLY the border cells the taps read; the interior is always
        #     overwritten by conv().  Done every grid step (axis is "parallel").
        zrow = jnp.zeros((1, W, CP), bf16)
        zcol = jnp.zeros((H, 1, CP), bf16)
        for dx in range(3):
            pad_ref[dx, 0:1, PAD_L:PAD_L + W, :] = zrow           # top ghost row
            pad_ref[dx, H + 1:H + 2, PAD_L:PAD_L + W, :] = zrow   # bottom ghost row
        pad_ref[0, 1:H + 1, PAD_L:PAD_L + 1, :] = zcol            # left ghost col (dx=0)
        pad_ref[2, 1:H + 1, PAD_L + W - 1:PAD_L + W, :] = zcol    # right ghost col (dx=2)

        # --- conv1 (BN1 scale pre-folded into w1) + shift + ReLU --------------
        y1 = jnp.maximum(conv(x_ref[0], w1_ref[...]) + h1_ref[...], 0.0)

        # --- conv2 (BN2 scale pre-folded into w2) + shift ---------------------
        a1 = y1.astype(bf16).reshape(H, W, CP)                    # cast once
        o_ref[0] = conv(a1, w2_ref[...]) + h2_ref[...]

    return kernel


# ---------------------------------------------------------------------------
# Wrapper: BN folding, channel padding, one pallas_call
# ---------------------------------------------------------------------------
def _fold_bn(bias, gamma, beta, mean, var):
    # inference-mode BN:  BN(conv(x) + bias) == conv(x) * scale + shift
    scale = gamma / jnp.sqrt(var + EPS)
    shift = (bias - mean) * scale + beta
    return scale, shift


def residual_block_forward(params, x_nchw):
    """Fused residualBlock forward: conv3x3 -> BN -> ReLU -> conv3x3 -> BN."""
    x = jnp.transpose(x_nchw, (0, 2, 3, 1)).astype(jnp.float32)   # NCHW -> NHWC
    N, H, W, inN = x.shape
    outN = params["w1"].shape[-1]
    CP = max(64, ((max(inN, outN) + 63) // 64) * 64)              # padded channel width
    HW = H * W
    WP = (PAD_L + W + 1) + (-(PAD_L + W + 1) % 8)                 # minimal halo width

    # ---- fold BN scale into the conv weights in f32, THEN cast to bf16 -------
    s1, h1 = _fold_bn(params["b1"], *params["bn1"])
    s2, h2 = _fold_bn(params["b2"], *params["bn2"])

    def pack_w(w, scale, cin, cout):
        wf = w * scale                                            # per-out-channel (f32)
        wf = jnp.pad(wf, ((0, 0), (0, 0), (0, CP - cin), (0, CP - cout)))
        return wf.reshape(9 * CP, CP).astype(jnp.bfloat16)        # (ky,kx,cin) flatten

    w1p = pack_w(params["w1"], s1, inN, outN)
    w2p = pack_w(params["w2"], s2, outN, outN)
    h1p = jnp.pad(h1, (0, CP - outN)).reshape(1, CP).astype(jnp.float32)
    h2p = jnp.pad(h2, (0, CP - outN)).reshape(1, CP).astype(jnp.float32)

    # input: bf16 (it is a bf16 matmul operand anyway), channels zero-padded
    xp = jnp.pad(x, ((0, 0), (0, 0), (0, 0), (0, CP - inN))).astype(jnp.bfloat16)

    kernel = _make_residual_block_kernel(H, W, CP)

    out = pl.pallas_call(
        kernel,
        out_shape=jax.ShapeDtypeStruct((N, HW, CP), jnp.float32),
        grid=(N,),
        in_specs=[
            pl.BlockSpec((1, H, W, CP), lambda n: (n, 0, 0, 0)),   # activation
            pl.BlockSpec((9 * CP, CP), lambda n: (0, 0)),          # w1 (BN1 folded)
            pl.BlockSpec((1, CP), lambda n: (0, 0)),               # shift1
            pl.BlockSpec((9 * CP, CP), lambda n: (0, 0)),          # w2 (BN2 folded)
            pl.BlockSpec((1, CP), lambda n: (0, 0)),               # shift2
        ],
        out_specs=pl.BlockSpec((1, HW, CP), lambda n: (n, 0, 0)),
        scratch_shapes=[pltpu.VMEM((3, H + 2, WP, CP), jnp.bfloat16)],  # 3-plane halo
        compiler_params=pltpu.CompilerParams(
            dimension_semantics=("parallel",),
            vmem_limit_bytes=32 * 1024 * 1024),
    )(xp, w1p, h1p, w2p, h2p)

    out = out.reshape(N, H, W, CP)[..., :outN]                    # drop channel pad
    return jnp.transpose(out, (0, 3, 1, 2))                       # NHWC -> NCHW


# ---------------------------------------------------------------------------
# Deterministic synthetic parameters (matches the PyTorch module's shapes)
# ---------------------------------------------------------------------------
def _bn_params(key, c):
    k1, k2, k3, k4 = jax.random.split(key, 4)
    gamma = 1.0 + 0.1 * jax.random.normal(k1, (c,), jnp.float32)
    beta = 0.1 * jax.random.normal(k2, (c,), jnp.float32)
    mean = 0.1 * jax.random.normal(k3, (c,), jnp.float32)
    var = 1.0 + 0.1 * jnp.abs(jax.random.normal(k4, (c,), jnp.float32))
    return (gamma, beta, mean, var)


def init_residual_block_params(key, inN, outN):
    k = jax.random.split(key, 6)
    std1 = 1.0 / jnp.sqrt(9.0 * inN)
    std2 = 1.0 / jnp.sqrt(9.0 * outN)
    return dict(
        w1=jax.random.normal(k[0], (3, 3, inN, outN), jnp.float32) * std1,  # HWIO
        b1=jax.random.normal(k[1], (outN,), jnp.float32) * std1,
        bn1=_bn_params(k[2], outN),
        w2=jax.random.normal(k[3], (3, 3, outN, outN), jnp.float32) * std2,
        b2=jax.random.normal(k[4], (outN,), jnp.float32) * std2,
        bn2=_bn_params(k[5], outN),
    )


# ---------------------------------------------------------------------------
# Pure-JAX reference (PyTorch-ordered math, bf16 conv operands, f32 accumulation)
# ---------------------------------------------------------------------------
def _conv3x3_ref(x, w, b):
    y = lax.conv_general_dilated(
        x.astype(jnp.bfloat16), w.astype(jnp.bfloat16), (1, 1), "SAME",
        dimension_numbers=("NHWC", "HWIO", "NHWC"),
        preferred_element_type=jnp.float32)
    return y + b


def residual_block_ref(params, x_nchw):
    x = jnp.transpose(x_nchw, (0, 2, 3, 1)).astype(jnp.float32)

    def bn(y, bn_params):
        gamma, beta, mean, var = bn_params
        return (y - mean) / jnp.sqrt(var + EPS) * gamma + beta

    y = jnp.maximum(bn(_conv3x3_ref(x, params["w1"], params["b1"]), params["bn1"]), 0.0)
    y = bn(_conv3x3_ref(y, params["w2"], params["b2"]), params["bn2"])
    return jnp.transpose(y, (0, 3, 1, 2))


if __name__ == "__main__":
    key = jax.random.PRNGKey(0)
    k_params, k_x = jax.random.split(key)

    inN = outN = 64                       # residualBlock(64, 64) as used in RANList
    N, H, W = 2, 16, 16

    params = init_residual_block_params(k_params, inN, outN)
    x = jax.random.normal(k_x, (N, inN, H, W), jnp.float32)       # NCHW like PyTorch

    out = jax.jit(residual_block_forward)(params, x)
    out = jax.block_until_ready(out)
    assert out.shape == (N, outN, H, W)

    ref = residual_block_ref(params, x)
    scale = max(1.0, float(jnp.max(jnp.abs(ref))))
    max_err = float(jnp.max(jnp.abs(out - ref)))
    # bf16 matmul operands (with the BN scale folded into the bf16 weights in the
    # kernel, applied post-conv in f32 in the reference) -> allow ~2% of the
    # output dynamic range.
    assert max_err < 2e-2 * scale, f"mismatch vs reference: {max_err} (scale {scale})"
    print("KERNEL_OK")
</pallas_src>

<mosaic_0001>
module attributes {stable_mosaic.version = 11 : i64} {
  func.func @kernel(%arg0: i32, %arg1: memref<1x16x16x64xbf16, #tpu.memory_space<vmem>>, %arg2: memref<576x64xbf16, #tpu.memory_space<vmem>>, %arg3: memref<1x64xf32, #tpu.memory_space<vmem>>, %arg4: memref<576x64xbf16, #tpu.memory_space<vmem>>, %arg5: memref<1x64xf32, #tpu.memory_space<vmem>>, %arg6: memref<1x256x64xf32, #tpu.memory_space<vmem>>, %arg7: memref<3x18x40x64xbf16, #tpu.memory_space<vmem>>) attributes {dimension_semantics = [#tpu.dimension_semantics<parallel>], iteration_bounds = array<i64: 2>, scalar_prefetch = 0 : i64, scratch_operands = 1 : i64, tpu.core_type = #tpu.core_type<tc>, window_params = [{transform_indices = @transform_0, window_bounds = array<i64: 1, 16, 16, 64>}, {pipeline_mode = #tpu.pipeline_mode<synchronous>, transform_indices = @transform_1, window_bounds = array<i64: 576, 64>}, {pipeline_mode = #tpu.pipeline_mode<synchronous>, transform_indices = @transform_2, window_bounds = array<i64: 1, 64>}, {pipeline_mode = #tpu.pipeline_mode<synchronous>, transform_indices = @transform_3, window_bounds = array<i64: 576, 64>}, {pipeline_mode = #tpu.pipeline_mode<synchronous>, transform_indices = @transform_4, window_bounds = array<i64: 1, 64>}, {transform_indices = @transform_5, window_bounds = array<i64: 1, 256, 64>}]} {
    %cst = arith.constant 0.000000e+00 : bf16
    %0 = vector.broadcast %cst : bf16 to vector<1x16x64xbf16>
    %cst_0 = arith.constant 0.000000e+00 : bf16
    %1 = vector.broadcast %cst_0 : bf16 to vector<16x1x64xbf16>
    %c0 = arith.constant 0 : index
    %c0_1 = arith.constant 0 : index
    %c16 = arith.constant 16 : index
    %c0_2 = arith.constant 0 : index
    %2 = vector.load %arg7[%c0, %c0_1, %c16, %c0_2] : memref<3x18x40x64xbf16, #tpu.memory_space<vmem>>, vector<1x1x16x64xbf16>
    %3 = vector.shape_cast %2 : vector<1x1x16x64xbf16> to vector<1x16x64xbf16>
    %4 = vector.shape_cast %0 : vector<1x16x64xbf16> to vector<1x1x16x64xbf16>
    tpu.vector_store %arg7[%c0, %c0_1, %c16, %c0_2], %4 {strides = array<i32>} : memref<3x18x40x64xbf16, #tpu.memory_space<vmem>>, vector<1x1x16x64xbf16>,
    %c0_3 = arith.constant 0 : index
    %c17 = arith.constant 17 : index
    %c16_4 = arith.constant 16 : index
    %c0_5 = arith.constant 0 : index
    %5 = vector.load %arg7[%c0_3, %c17, %c16_4, %c0_5] : memref<3x18x40x64xbf16, #tpu.memory_space<vmem>>, vector<1x1x16x64xbf16>
    %6 = vector.shape_cast %5 : vector<1x1x16x64xbf16> to vector<1x16x64xbf16>
    %7 = vector.shape_cast %0 : vector<1x16x64xbf16> to vector<1x1x16x64xbf16>
    tpu.vector_store %arg7[%c0_3, %c17, %c16_4, %c0_5], %7 {strides = array<i32>} : memref<3x18x40x64xbf16, #tpu.memory_space<vmem>>, vector<1x1x16x64xbf16>,
    %c1 = arith.constant 1 : index
    %c0_6 = arith.constant 0 : index
    %c16_7 = arith.constant 16 : index
    %c0_8 = arith.constant 0 : index
    %8 = vector.load %arg7[%c1, %c0_6, %c16_7, %c0_8] : memref<3x18x40x64xbf16, #tpu.memory_space<vmem>>, vector<1x1x16x64xbf16>
    %9 = vector.shape_cast %8 : vector<1x1x16x64xbf16> to vector<1x16x64xbf16>
    %10 = vector.shape_cast %0 : vector<1x16x64xbf16> to vector<1x1x16x64xbf16>
    tpu.vector_store %arg7[%c1, %c0_6, %c16_7, %c0_8], %10 {strides = array<i32>} : memref<3x18x40x64xbf16, #tpu.memory_space<vmem>>, vector<1x1x16x64xbf16>,
    %c1_9 = arith.constant 1 : index
    %c17_10 = arith.constant 17 : index
    %c16_11 = arith.constant 16 : index
    %c0_12 = arith.constant 0 : index
    %11 = vector.load %arg7[%c1_9, %c17_10, %c16_11, %c0_12] : memref<3x18x40x64xbf16, #tpu.memory_space<vmem>>, vector<1x1x16x64xbf16>
    %12 = vector.shape_cast %11 : vector<1x1x16x64xbf16> to vector<1x16x64xbf16>
    %13 = vector.shape_cast %0 : vector<1x16x64xbf16> to vector<1x1x16x64xbf16>
    tpu.vector_store %arg7[%c1_9, %c17_10, %c16_11, %c0_12], %13 {strides = array<i32>} : memref<3x18x40x64xbf16, #tpu.memory_space<vmem>>, vector<1x1x16x64xbf16>,
    %c2 = arith.constant 2 : index
    %c0_13 = arith.constant 0 : index
    %c16_14 = arith.constant 16 : index
    %c0_15 = arith.constant 0 : index
    %14 = vector.load %arg7[%c2, %c0_13, %c16_14, %c0_15] : memref<3x18x40x64xbf16, #tpu.memory_space<vmem>>, vector<1x1x16x64xbf16>
    %15 = vector.shape_cast %14 : vector<1x1x16x64xbf16> to vector<1x16x64xbf16>
    %16 = vector.shape_cast %0 : vector<1x16x64xbf16> to vector<1x1x16x64xbf16>
    tpu.vector_store %arg7[%c2, %c0_13, %c16_14, %c0_15], %16 {strides = array<i32>} : memref<3x18x40x64xbf16, #tpu.memory_space<vmem>>, vector<1x1x16x64xbf16>,
    %c2_16 = arith.constant 2 : index
    %c17_17 = arith.constant 17 : index
    %c16_18 = arith.constant 16 : index
    %c0_19 = arith.constant 0 : index
    %17 = vector.load %arg7[%c2_16, %c17_17, %c16_18, %c0_19] : memref<3x18x40x64xbf16, #tpu.memory_space<vmem>>, vector<1x1x16x64xbf16>
    %18 = vector.shape_cast %17 : vector<1x1x16x64xbf16> to vector<1x16x64xbf16>
    %19 = vector.shape_cast %0 : vector<1x16x64xbf16> to vector<1x1x16x64xbf16>
    tpu.vector_store %arg7[%c2_16, %c17_17, %c16_18, %c0_19], %19 {strides = array<i32>} : memref<3x18x40x64xbf16, #tpu.memory_space<vmem>>, vector<1x1x16x64xbf16>,
    %c0_20 = arith.constant 0 : index
    %c1_21 = arith.constant 1 : index
    %c16_22 = arith.constant 16 : index
    %c0_23 = arith.constant 0 : index
    %20 = vector.load %arg7[%c0_20, %c1_21, %c16_22, %c0_23] : memref<3x18x40x64xbf16, #tpu.memory_space<vmem>>, vector<1x16x1x64xbf16>
    %21 = vector.shape_cast %20 : vector<1x16x1x64xbf16> to vector<16x1x64xbf16>
    %22 = vector.shape_cast %1 : vector<16x1x64xbf16> to vector<1x16x1x64xbf16>
    tpu.vector_store %arg7[%c0_20, %c1_21, %c16_22, %c0_23], %22 {strides = array<i32>} : memref<3x18x40x64xbf16, #tpu.memory_space<vmem>>, vector<1x16x1x64xbf16>,
    %c2_24 = arith.constant 2 : index
    %c1_25 = arith.constant 1 : index
    %c31 = arith.constant 31 : index
    %c0_26 = arith.constant 0 : index
    %23 = vector.load %arg7[%c2_24, %c1_25, %c31, %c0_26] : memref<3x18x40x64xbf16, #tpu.memory_space<vmem>>, vector<1x16x1x64xbf16>
    %24 = vector.shape_cast %23 : vector<1x16x1x64xbf16> to vector<16x1x64xbf16>
    %25 = vector.shape_cast %1 : vector<16x1x64xbf16> to vector<1x16x1x64xbf16>
    tpu.vector_store %arg7[%c2_24, %c1_25, %c31, %c0_26], %25 {strides = array<i32>} : memref<3x18x40x64xbf16, #tpu.memory_space<vmem>>, vector<1x16x1x64xbf16>,
    %c0_27 = arith.constant 0 : index
    %c0_28 = arith.constant 0 : index
    %c0_29 = arith.constant 0 : index
    %c0_30 = arith.constant 0 : index
    %26 = vector.load %arg1[%c0_27, %c0_28, %c0_29, %c0_30] : memref<1x16x16x64xbf16, #tpu.memory_space<vmem>>, vector<1x16x16x64xbf16>
    %27 = vector.shape_cast %26 : vector<1x16x16x64xbf16> to vector<16x16x64xbf16>
    %c0_31 = arith.constant 0 : index
    %c0_32 = arith.constant 0 : index
    %28 = vector.load %arg2[%c0_31, %c0_32] : memref<576x64xbf16, #tpu.memory_space<vmem>>, vector<576x64xbf16>
    %c0_33 = arith.constant 0 : index
    %c1_34 = arith.constant 1 : index
    %c17_35 = arith.constant 17 : index
    %c0_36 = arith.constant 0 : index
    %29 = vector.load %arg7[%c0_33, %c1_34, %c17_35, %c0_36] : memref<3x18x40x64xbf16, #tpu.memory_space<vmem>>, vector<1x16x16x64xbf16>
    %30 = vector.shape_cast %29 : vector<1x16x16x64xbf16> to vector<16x16x64xbf16>
    %31 = vector.shape_cast %27 : vector<16x16x64xbf16> to vector<1x16x16x64xbf16>
    tpu.vector_store %arg7[%c0_33, %c1_34, %c17_35, %c0_36], %31 {strides = array<i32>} : memref<3x18x40x64xbf16, #tpu.memory_space<vmem>>, vector<1x16x16x64xbf16>,
    %c1_37 = arith.constant 1 : index
    %c1_38 = arith.constant 1 : index
    %c16_39 = arith.constant 16 : index
    %c0_40 = arith.constant 0 : index
    %32 = vector.load %arg7[%c1_37, %c1_38, %c16_39, %c0_40] : memref<3x18x40x64xbf16, #tpu.memory_space<vmem>>, vector<1x16x16x64xbf16>
    %33 = vector.shape_cast %32 : vector<1x16x16x64xbf16> to vector<16x16x64xbf16>
    %34 = vector.shape_cast %27 : vector<16x16x64xbf16> to vector<1x16x16x64xbf16>
    tpu.vector_store %arg7[%c1_37, %c1_38, %c16_39, %c0_40], %34 {strides = array<i32>} : memref<3x18x40x64xbf16, #tpu.memory_space<vmem>>, vector<1x16x16x64xbf16>,
    %c2_41 = arith.constant 2 : index
    %c1_42 = arith.constant 1 : index
    %c15 = arith.constant 15 : index
    %c0_43 = arith.constant 0 : index
    %35 = vector.load %arg7[%c2_41, %c1_42, %c15, %c0_43] : memref<3x18x40x64xbf16, #tpu.memory_space<vmem>>, vector<1x16x16x64xbf16>
    %36 = vector.shape_cast %35 : vector<1x16x16x64xbf16> to vector<16x16x64xbf16>
    %37 = vector.shape_cast %27 : vector<16x16x64xbf16> to vector<1x16x16x64xbf16>
    tpu.vector_store %arg7[%c2_41, %c1_42, %c15, %c0_43], %37 {strides = array<i32>} : memref<3x18x40x64xbf16, #tpu.memory_space<vmem>>, vector<1x16x16x64xbf16>,
    %c0_44 = arith.constant 0 : index
    %c0_45 = arith.constant 0 : index
    %c16_46 = arith.constant 16 : index
    %c0_47 = arith.constant 0 : index
    %38 = vector.load %arg7[%c0_44, %c0_45, %c16_46, %c0_47] : memref<3x18x40x64xbf16, #tpu.memory_space<vmem>>, vector<1x16x16x64xbf16>
    %39 = vector.shape_cast %38 : vector<1x16x16x64xbf16> to vector<16x16x64xbf16>
    %40 = vector.shape_cast %39 : vector<16x16x64xbf16> to vector<256x64xbf16>
    %c1_48 = arith.constant 1 : index
    %c0_49 = arith.constant 0 : index
    %c16_50 = arith.constant 16 : index
    %c0_51 = arith.constant 0 : index
    %41 = vector.load %arg7[%c1_48, %c0_49, %c16_50, %c0_51] : memref<3x18x40x64xbf16, #tpu.memory_space<vmem>>, vector<1x16x16x64xbf16>
    %42 = vector.shape_cast %41 : vector<1x16x16x64xbf16> to vector<16x16x64xbf16>
    %43 = vector.shape_cast %42 : vector<16x16x64xbf16> to vector<256x64xbf16>
    %c2_52 = arith.constant 2 : index
    %c0_53 = arith.constant 0 : index
    %c16_54 = arith.constant 16 : index
    %c0_55 = arith.constant 0 : index
    %44 = vector.load %arg7[%c2_52, %c0_53, %c16_54, %c0_55] : memref<3x18x40x64xbf16, #tpu.memory_space<vmem>>, vector<1x16x16x64xbf16>
    %45 = vector.shape_cast %44 : vector<1x16x16x64xbf16> to vector<16x16x64xbf16>
    %46 = vector.shape_cast %45 : vector<16x16x64xbf16> to vector<256x64xbf16>
    %c0_56 = arith.constant 0 : index
    %c1_57 = arith.constant 1 : index
    %c16_58 = arith.constant 16 : index
    %c0_59 = arith.constant 0 : index
    %47 = vector.load %arg7[%c0_56, %c1_57, %c16_58, %c0_59] : memref<3x18x40x64xbf16, #tpu.memory_space<vmem>>, vector<1x16x16x64xbf16>
    %48 = vector.shape_cast %47 : vector<1x16x16x64xbf16> to vector<16x16x64xbf16>
    %49 = vector.shape_cast %48 : vector<16x16x64xbf16> to vector<256x64xbf16>
    %c1_60 = arith.constant 1 : index
    %c1_61 = arith.constant 1 : index
    %c16_62 = arith.constant 16 : index
    %c0_63 = arith.constant 0 : index
    %50 = vector.load %arg7[%c1_60, %c1_61, %c16_62, %c0_63] : memref<3x18x40x64xbf16, #tpu.memory_space<vmem>>, vector<1x16x16x64xbf16>
    %51 = vector.shape_cast %50 : vector<1x16x16x64xbf16> to vector<16x16x64xbf16>
    %52 = vector.shape_cast %51 : vector<16x16x64xbf16> to vector<256x64xbf16>
    %c2_64 = arith.constant 2 : index
    %c1_65 = arith.constant 1 : index
    %c16_66 = arith.constant 16 : index
    %c0_67 = arith.constant 0 : index
    %53 = vector.load %arg7[%c2_64, %c1_65, %c16_66, %c0_67] : memref<3x18x40x64xbf16, #tpu.memory_space<vmem>>, vector<1x16x16x64xbf16>
    %54 = vector.shape_cast %53 : vector<1x16x16x64xbf16> to vector<16x16x64xbf16>
    %55 = vector.shape_cast %54 : vector<16x16x64xbf16> to vector<256x64xbf16>
    %c0_68 = arith.constant 0 : index
    %c2_69 = arith.constant 2 : index
    %c16_70 = arith.constant 16 : index
    %c0_71 = arith.constant 0 : index
    %56 = vector.load %arg7[%c0_68, %c2_69, %c16_70, %c0_71] : memref<3x18x40x64xbf16, #tpu.memory_space<vmem>>, vector<1x16x16x64xbf16>
    %57 = vector.shape_cast %56 : vector<1x16x16x64xbf16> to vector<16x16x64xbf16>
    %58 = vector.shape_cast %57 : vector<16x16x64xbf16> to vector<256x64xbf16>
    %c1_72 = arith.constant 1 : index
    %c2_73 = arith.constant 2 : index
    %c16_74 = arith.constant 16 : index
    %c0_75 = arith.constant 0 : index
    %59 = vector.load %arg7[%c1_72, %c2_73, %c16_74, %c0_75] : memref<3x18x40x64xbf16, #tpu.memory_space<vmem>>, vector<1x16x16x64xbf16>
    %60 = vector.shape_cast %59 : vector<1x16x16x64xbf16> to vector<16x16x64xbf16>
    %61 = vector.shape_cast %60 : vector<16x16x64xbf16> to vector<256x64xbf16>
    %c2_76 = arith.constant 2 : index
    %c2_77 = arith.constant 2 : index
    %c16_78 = arith.constant 16 : index
    %c0_79 = arith.constant 0 : index
    %62 = vector.load %arg7[%c2_76, %c2_77, %c16_78, %c0_79] : memref<3x18x40x64xbf16, #tpu.memory_space<vmem>>, vector<1x16x16x64xbf16>
    %63 = vector.shape_cast %62 : vector<1x16x16x64xbf16> to vector<16x16x64xbf16>
    %64 = vector.shape_cast %63 : vector<16x16x64xbf16> to vector<256x64xbf16>
    %65 = tpu.concatenate %40, %43, %46, %49, %52, %55, %58, %61, %64 in 1 : vector<256x64xbf16>, vector<256x64xbf16>, vector<256x64xbf16>, vector<256x64xbf16>, vector<256x64xbf16>, vector<256x64xbf16>, vector<256x64xbf16>, vector<256x64xbf16>, vector<256x64xbf16> -> vector<256x576xbf16>
    %cst_80 = arith.constant dense<0.000000e+00> : vector<256x64xf32>
    %66 = tpu.matmul %65, %28, %cst_80 {dimension_numbers = #tpu.dot_dimension_numbers<[1], [0], [0], [1], [0, 0, 1, 1], [], []>} : vector<256x576xbf16>, vector<576x64xbf16>, vector<256x64xf32> -> vector<256x64xf32>
    %c0_81 = arith.constant 0 : index
    %c0_82 = arith.constant 0 : index
    %67 = vector.load %arg3[%c0_81, %c0_82] : memref<1x64xf32, #tpu.memory_space<vmem>>, vector<1x64xf32>
    %68 = vector.broadcast %67 : vector<1x64xf32> to vector<256x64xf32>
    %69 = arith.addf %66, %68 : vector<256x64xf32>
    %cst_83 = arith.constant 0.000000e+00 : f32
    %70 = vector.broadcast %cst_83 : f32 to vector<256x64xf32>
    %71 = arith.maximumf %69, %70 : vector<256x64xf32>
    %72 = arith.truncf %71 : vector<256x64xf32> to vector<256x64xbf16>
    %73 = vector.shape_cast %72 : vector<256x64xbf16> to vector<16x16x64xbf16>
    %c0_84 = arith.constant 0 : index
    %c0_85 = arith.constant 0 : index
    %74 = vector.load %arg4[%c0_84, %c0_85] : memref<576x64xbf16, #tpu.memory_space<vmem>>, vector<576x64xbf16>
    %c0_86 = arith.constant 0 : index
    %c1_87 = arith.constant 1 : index
    %c17_88 = arith.constant 17 : index
    %c0_89 = arith.constant 0 : index
    %75 = vector.load %arg7[%c0_86, %c1_87, %c17_88, %c0_89] : memref<3x18x40x64xbf16, #tpu.memory_space<vmem>>, vector<1x16x16x64xbf16>
    %76 = vector.shape_cast %75 : vector<1x16x16x64xbf16> to vector<16x16x64xbf16>
    %77 = vector.shape_cast %73 : vector<16x16x64xbf16> to vector<1x16x16x64xbf16>
    tpu.vector_store %arg7[%c0_86, %c1_87, %c17_88, %c0_89], %77 {strides = array<i32>} : memref<3x18x40x64xbf16, #tpu.memory_space<vmem>>, vector<1x16x16x64xbf16>,
    %c1_90 = arith.constant 1 : index
    %c1_91 = arith.constant 1 : index
    %c16_92 = arith.constant 16 : index
    %c0_93 = arith.constant 0 : index
    %78 = vector.load %arg7[%c1_90, %c1_91, %c16_92, %c0_93] : memref<3x18x40x64xbf16, #tpu.memory_space<vmem>>, vector<1x16x16x64xbf16>
    %79 = vector.shape_cast %78 : vector<1x16x16x64xbf16> to vector<16x16x64xbf16>
    %80 = vector.shape_cast %73 : vector<16x16x64xbf16> to vector<1x16x16x64xbf16>
    tpu.vector_store %arg7[%c1_90, %c1_91, %c16_92, %c0_93], %80 {strides = array<i32>} : memref<3x18x40x64xbf16, #tpu.memory_space<vmem>>, vector<1x16x16x64xbf16>,
    %c2_94 = arith.constant 2 : index
    %c1_95 = arith.constant 1 : index
    %c15_96 = arith.constant 15 : index
    %c0_97 = arith.constant 0 : index
    %81 = vector.load %arg7[%c2_94, %c1_95, %c15_96, %c0_97] : memref<3x18x40x64xbf16, #tpu.memory_space<vmem>>, vector<1x16x16x64xbf16>
    %82 = vector.shape_cast %81 : vector<1x16x16x64xbf16> to vector<16x16x64xbf16>
    %83 = vector.shape_cast %73 : vector<16x16x64xbf16> to vector<1x16x16x64xbf16>
    tpu.vector_store %arg7[%c2_94, %c1_95, %c15_96, %c0_97], %83 {strides = array<i32>} : memref<3x18x40x64xbf16, #tpu.memory_space<vmem>>, vector<1x16x16x64xbf16>,
    %c0_98 = arith.constant 0 : index
    %c0_99 = arith.constant 0 : index
    %c16_100 = arith.constant 16 : index
    %c0_101 = arith.constant 0 : index
    %84 = vector.load %arg7[%c0_98, %c0_99, %c16_100, %c0_101] : memref<3x18x40x64xbf16, #tpu.memory_space<vmem>>, vector<1x16x16x64xbf16>
    %85 = vector.shape_cast %84 : vector<1x16x16x64xbf16> to vector<16x16x64xbf16>
    %86 = vector.shape_cast %85 : vector<16x16x64xbf16> to vector<256x64xbf16>
    %c1_102 = arith.constant 1 : index
    %c0_103 = arith.constant 0 : index
    %c16_104 = arith.constant 16 : index
    %c0_105 = arith.constant 0 : index
    %87 = vector.load %arg7[%c1_102, %c0_103, %c16_104, %c0_105] : memref<3x18x40x64xbf16, #tpu.memory_space<vmem>>, vector<1x16x16x64xbf16>
    %88 = vector.shape_cast %87 : vector<1x16x16x64xbf16> to vector<16x16x64xbf16>
    %89 = vector.shape_cast %88 : vector<16x16x64xbf16> to vector<256x64xbf16>
    %c2_106 = arith.constant 2 : index
    %c0_107 = arith.constant 0 : index
    %c16_108 = arith.constant 16 : index
    %c0_109 = arith.constant 0 : index
    %90 = vector.load %arg7[%c2_106, %c0_107, %c16_108, %c0_109] : memref<3x18x40x64xbf16, #tpu.memory_space<vmem>>, vector<1x16x16x64xbf16>
    %91 = vector.shape_cast %90 : vector<1x16x16x64xbf16> to vector<16x16x64xbf16>
    %92 = vector.shape_cast %91 : vector<16x16x64xbf16> to vector<256x64xbf16>
    %c0_110 = arith.constant 0 : index
    %c1_111 = arith.constant 1 : index
    %c16_112 = arith.constant 16 : index
    %c0_113 = arith.constant 0 : index
    %93 = vector.load %arg7[%c0_110, %c1_111, %c16_112, %c0_113] : memref<3x18x40x64xbf16, #tpu.memory_space<vmem>>, vector<1x16x16x64xbf16>
    %94 = vector.shape_cast %93 : vector<1x16x16x64xbf16> to vector<16x16x64xbf16>
    %95 = vector.shape_cast %94 : vector<16x16x64xbf16> to vector<256x64xbf16>
    %c1_114 = arith.constant 1 : index
    %c1_115 = arith.constant 1 : index
    %c16_116 = arith.constant 16 : index
    %c0_117 = arith.constant 0 : index
    %96 = vector.load %arg7[%c1_114, %c1_115, %c16_116, %c0_117] : memref<3x18x40x64xbf16, #tpu.memory_space<vmem>>, vector<1x16x16x64xbf16>
    %97 = vector.shape_cast %96 : vector<1x16x16x64xbf16> to vector<16x16x64xbf16>
    %98 = vector.shape_cast %97 : vector<16x16x64xbf16> to vector<256x64xbf16>
    %c2_118 = arith.constant 2 : index
    %c1_119 = arith.constant 1 : index
    %c16_120 = arith.constant 16 : index
    %c0_121 = arith.constant 0 : index
    %99 = vector.load %arg7[%c2_118, %c1_119, %c16_120, %c0_121] : memref<3x18x40x64xbf16, #tpu.memory_space<vmem>>, vector<1x16x16x64xbf16>
    %100 = vector.shape_cast %99 : vector<1x16x16x64xbf16> to vector<16x16x64xbf16>
    %101 = vector.shape_cast %100 : vector<16x16x64xbf16> to vector<256x64xbf16>
    %c0_122 = arith.constant 0 : index
    %c2_123 = arith.constant 2 : index
    %c16_124 = arith.constant 16 : index
    %c0_125 = arith.constant 0 : index
    %102 = vector.load %arg7[%c0_122, %c2_123, %c16_124, %c0_125] : memref<3x18x40x64xbf16, #tpu.memory_space<vmem>>, vector<1x16x16x64xbf16>
    %103 = vector.shape_cast %102 : vector<1x16x16x64xbf16> to vector<16x16x64xbf16>
    %104 = vector.shape_cast %103 : vector<16x16x64xbf16> to vector<256x64xbf16>
    %c1_126 = arith.constant 1 : index
    %c2_127 = arith.constant 2 : index
    %c16_128 = arith.constant 16 : index
    %c0_129 = arith.constant 0 : index
    %105 = vector.load %arg7[%c1_126, %c2_127, %c16_128, %c0_129] : memref<3x18x40x64xbf16, #tpu.memory_space<vmem>>, vector<1x16x16x64xbf16>
    %106 = vector.shape_cast %105 : vector<1x16x16x64xbf16> to vector<16x16x64xbf16>
    %107 = vector.shape_cast %106 : vector<16x16x64xbf16> to vector<256x64xbf16>
    %c2_130 = arith.constant 2 : index
    %c2_131 = arith.constant 2 : index
    %c16_132 = arith.constant 16 : index
    %c0_133 = arith.constant 0 : index
    %108 = vector.load %arg7[%c2_130, %c2_131, %c16_132, %c0_133] : memref<3x18x40x64xbf16, #tpu.memory_space<vmem>>, vector<1x16x16x64xbf16>
    %109 = vector.shape_cast %108 : vector<1x16x16x64xbf16> to vector<16x16x64xbf16>
    %110 = vector.shape_cast %109 : vector<16x16x64xbf16> to vector<256x64xbf16>
    %111 = tpu.concatenate %86, %89, %92, %95, %98, %101, %104, %107, %110 in 1 : vector<256x64xbf16>, vector<256x64xbf16>, vector<256x64xbf16>, vector<256x64xbf16>, vector<256x64xbf16>, vector<256x64xbf16>, vector<256x64xbf16>, vector<256x64xbf16>, vector<256x64xbf16> -> vector<256x576xbf16>
    %cst_134 = arith.constant dense<0.000000e+00> : vector<256x64xf32>
    %112 = tpu.matmul %111, %74, %cst_134 {dimension_numbers = #tpu.dot_dimension_numbers<[1], [0], [0], [1], [0, 0, 1, 1], [], []>} : vector<256x576xbf16>, vector<576x64xbf16>, vector<256x64xf32> -> vector<256x64xf32>
    %c0_135 = arith.constant 0 : index
    %c0_136 = arith.constant 0 : index
    %113 = vector.load %arg5[%c0_135, %c0_136] : memref<1x64xf32, #tpu.memory_space<vmem>>, vector<1x64xf32>
    %114 = vector.broadcast %113 : vector<1x64xf32> to vector<256x64xf32>
    %115 = arith.addf %112, %114 : vector<256x64xf32>
    %c0_137 = arith.constant 0 : index
    %c0_138 = arith.constant 0 : index
    %c0_139 = arith.constant 0 : index
    %116 = vector.load %arg6[%c0_137, %c0_138, %c0_139] : memref<1x256x64xf32, #tpu.memory_space<vmem>>, vector<1x256x64xf32>
    %117 = vector.shape_cast %116 : vector<1x256x64xf32> to vector<256x64xf32>
    %118 = vector.shape_cast %115 : vector<256x64xf32> to vector<1x256x64xf32>
    tpu.vector_store %arg6[%c0_137, %c0_138, %c0_139], %118 {strides = array<i32>} : memref<1x256x64xf32, #tpu.memory_space<vmem>>, vector<1x256x64xf32>,
    return
  }
  func.func @transform_0(%arg0: i32) -> (i32, i32, i32, i32) {
    %c0_i32 = arith.constant 0 : i32
    %c0_i32_0 = arith.constant 0 : i32
    %c0_i32_1 = arith.constant 0 : i32
    %c0_i32_2 = arith.constant 0 : i32
    return %arg0, %c0_i32, %c0_i32_0, %c0_i32_1 : i32, i32, i32, i32
  }
  func.func @transform_1(%arg0: i32) -> (i32, i32) {
    %c0_i32 = arith.constant 0 : i32
    %c0_i32_0 = arith.constant 0 : i32
    %c0_i32_1 = arith.constant 0 : i32
    return %c0_i32, %c0_i32_0 : i32, i32
  }
  func.func @transform_2(%arg0: i32) -> (i32, i32) {
    %c0_i32 = arith.constant 0 : i32
    %c0_i32_0 = arith.constant 0 : i32
    %c0_i32_1 = arith.constant 0 : i32
    return %c0_i32, %c0_i32_0 : i32, i32
  }
  func.func @transform_3(%arg0: i32) -> (i32, i32) {
    %c0_i32 = arith.constant 0 : i32
    %c0_i32_0 = arith.constant 0 : i32
    %c0_i32_1 = arith.constant 0 : i32
    return %c0_i32, %c0_i32_0 : i32, i32
  }
  func.func @transform_4(%arg0: i32) -> (i32, i32) {
    %c0_i32 = arith.constant 0 : i32
    %c0_i32_0 = arith.constant 0 : i32
    %c0_i32_1 = arith.constant 0 : i32
    return %c0_i32, %c0_i32_0 : i32, i32
  }
  func.func @transform_5(%arg0: i32) -> (i32, i32, i32) {
    %c0_i32 = arith.constant 0 : i32
    %c0_i32_0 = arith.constant 0 : i32
    %c0_i32_1 = arith.constant 0 : i32
    return %arg0, %c0_i32, %c0_i32_0 : i32, i32, i32
  }
}

</mosaic_0001>

<bundles_post_ra>
// kernel: residual_block_forward.1
= control target key start
LH: loop header
LB: loop body
LE: loop exit
PB: predicated region body
PF: predicated region fallthrough
CT: control target
= control target key end

     0   :  { %10 = vsyncpa [#allocation4], 0  ;;  %s10845_s0 = inlined_call_operand.vmem [shape: bf16[2,16,16,64], index: 0, kind: input, shape index: {}]   ;;  %s10846_s1 = inlined_call_operand.vmem [shape: bf16[576,64], index: 1, kind: input, shape index: {}]   ;;  %s10847_s2 = inlined_call_operand.vmem [shape: f32[1,64], index: 2, kind: input, shape index: {}]   ;;  %s10848_s3 = inlined_call_operand.vmem [shape: bf16[576,64], index: 3, kind: input, shape index: {}]   ;;  %s10849_s4 = inlined_call_operand.vmem [shape: f32[1,64], index: 4, kind: input, shape index: {}]   ;;  %s10850_s5 = inlined_call_operand.hbm [shape: f32[2,256,64], index: 5, kind: output, shape index: {}]  }
   0x1   :  { %12 = vsyncpa [#allocation4 + $0x1], 0  ;;  %s8175_s18 = smov 0   ;;  %s8177_s19 = smov 0  }
   0x2   :  { %s8179_s20 = smov 0   ;;  %s8181_s21 = smov 0  }
   0x3 LB: > { %s8196_s22 = sadd.s32 4294967295, %s8138_s21   ;;  %s6632_s23 = sadd.s32 4294967294, %s8138_s21   ;;  %s8138_s21 = sphi %s8181_s21, %s11058_s21   ;;  %s8134_s20 = sphi %s8179_s20, %s11057_s20   ;;  %s8130_s19 = sphi %s8177_s19, %s11056_s19   ;;  %s8126_s18 = sphi %s8175_s18, %s11055_s18  }
   0x4   : > { %s8200_s24 = sadd.s32 1, %s8138_s21   ;;  %s135_s25 = sadd.s32 1, %s8134_s20 }
   0x5   : > { %s132_s26 = ssub.s32 %s8138_s21, %s8200_s24  ;;  %p145_p0 = scmp.ne.s32.totalorder %s8134_s20, %s8130_s19 }
   0x6   : > { %p133_p1 = scmp.eq.s32.totalorder %s132_s26, 0  ;;  %p146_p2 = scmp.eq.s32.totalorder %s8196_s22, 1 }
   0x7   : > { %p151_p3 = scmp.ne.s32.totalorder %s8130_s19, %s8126_s18  ;;  %p152_p4 = scmp.eq.s32.totalorder %s6632_s23, 1 }
   0x8   : > { %s8211_s27 = scalar_select %p133_p1, %s8134_s20, %s135_s25  }
   0x9   : > { %p8213_p5 = por %p146_p2, %p145_p0  ;;  %p8217_p6 = por %p152_p4, %p151_p3 }
   0xa   : > { %p6635_p7 = scmp.ge.s32.totalorder %s8138_s21, 1  ;;  %p190_p8 = scmp.lt.s32.totalorder %s8138_s21, 3 }
   0xc   : > { %p191_p9 = pnand %p6635_p7, %p190_p8 }
   0xe   : > { %194 = sbr.rel (%p191_p9) target bundleno = 1086 (0x43e), region = 40 }
  0x15   : > { %p218_p10 = scmp.lt.s32.totalorder %s8196_s22, 1  ;;  %vm243_vm0 = vcmask 516096   ;;  %vm244_vm1 = vsmask.f32 256  ;;  %v246_v1 = vld [vmem:[#allocation2 + $0x1c] sm:$0x1] }
  0x16   : > { %vm8225_vm2 = vmand %vm243_vm0, %vm244_vm1  ;;  %vm224_vm3 = vcmask 519168   ;;  %v249_v3 = vld [vmem:[#allocation2 + $0x30] sm:$0x1]  ;;  %v8140_v5 = vmov 0   ;;  %v252_v6 = vld [vmem:[#allocation2 + $0x44] sm:$0x1] }
  0x17   : > { %s219_s30 = scalar_select %p218_p10, %s8196_s22, 1  ;;  %v247_v2 = vsel %vm8225_vm2, 0, %v246_v1  ;;  %v250_v4 = vsel %vm8225_vm2, 0, %v249_v3  ;;  %231 = vst.msk [vmem:[#allocation2 + $0x170] sm:$0xf] %vm224_vm3, %v8140_v5  ;;  %v253_v8 = vsel %vm8225_vm2, 0, %v252_v6 }
  0x18   : > { %248 = vst [vmem:[#allocation2 + $0x1c] sm:$0x1] %v247_v2  ;;  %232 = vst.msk [vmem:[#allocation2 + $0x174] sm:$0xf] %vm224_vm3, %v8140_v5  ;;  %v255_v7 = vld [vmem:[#allocation2 + $0x58] sm:$0x1] }
  0x19   : > { %225 = vst.msk [vmem:[#allocation2 + $0x8] sm:$0xf] %vm224_vm3, %v8140_v5  ;;  %226 = vst.msk [vmem:[#allocation2 + $0xc] sm:$0xf] %vm224_vm3, %v8140_v5  ;;  %s7070_s6 = sshll.u32 %s219_s30, 7  ;;  %v256_v9 = vsel %vm8225_vm2, 0, %v255_v7 }
  0x1a   : > { %228 = vst.msk [vmem:[#allocation2 + $0x15c] sm:$0xf] %vm224_vm3, %v8140_v5  ;;  %229 = vst.msk [vmem:[#allocation2 + $0x160] sm:$0xf] %vm224_vm3, %v8140_v5  ;;  %v258_v10 = vld [vmem:[#allocation2 + $0x6c] sm:$0x1]  ;;  %s8256_s11 = scalar_lea.vmem %s10845_s0, %s7070_s6 }
  0x1b   : > { %234 = vst.msk [vmem:[#allocation2 + $0x2c4] sm:$0xf] %vm224_vm3, %v8140_v5  ;;  %235 = vst.msk [vmem:[#allocation2 + $0x2c8] sm:$0xf] %vm224_vm3, %v8140_v5  ;;  %v7753_v11 = vld [vmem:[%s10846_s1 + $0x40] sm:$0xff]   ;;  %v259_v12 = vsel %vm8225_vm2, 0, %v258_v10 }
  0x1c   : > { %237 = vst.msk [vmem:[#allocation2 + $0x2d8] sm:$0xf] %vm224_vm3, %v8140_v5  ;;  %238 = vst.msk [vmem:[#allocation2 + $0x2dc] sm:$0xf] %vm224_vm3, %v8140_v5  ;;  %vm450_vm4 = vsmask.f32 4368  ;;  %7104 = vmatprep.subr.bf16.mxu0 %v7753_v11 }
  0x1d   : > { %240 = vst.msk [vmem:[#allocation2 + $0x42c] sm:$0xf] %vm224_vm3, %v8140_v5  ;;  %241 = vst.msk [vmem:[#allocation2 + $0x430] sm:$0xf] %vm224_vm3, %v8140_v5  ;;  %vm773_vm5 = vsmask.f32 7938 }
  0x1e   : > { %251 = vst [vmem:[#allocation2 + $0x30] sm:$0x1] %v250_v4  ;;  %254 = vst [vmem:[#allocation2 + $0x44] sm:$0x1] %v253_v8  ;;  %v7754_v13 = vld [vmem:[%s10846_s1] sm:$0xff]   ;;  %v10922_v27 = vmov 0 }
  0x1f   : > { %257 = vst [vmem:[#allocation2 + $0x58] sm:$0x1] %v256_v9  ;;  %v8264_v14 = vld [vmem:[%s8256_s11] sm:$0xf]  ;;  %v8267_v15 = vld [vmem:[%s8256_s11 + $0x4] sm:$0xf]  ;;  %7105 = vmatpush3.bf16.msra.mxu0 %v7754_v13  ;;  %vm8296_vm6 = vmor %vm244_vm1, %vm450_vm4 }
  0x20   : > { %v8270_v16 = vld [vmem:[%s8256_s11 + $0x8] sm:$0xf]  ;;  %260 = vst [vmem:[#allocation2 + $0x6c] sm:$0x1] %v259_v12  ;;  %v453_v17 = vshrl.u32 %v8264_v14, 16  ;;  %v456_v18 = vshll.u32 %v8264_v14, 16  ;;  %vm8314_vm7 = vmand %vm224_vm3, %vm773_vm5 }
  0x21   : > { %v461_v19 = vshrl.u32 %v8267_v15, 16  ;;  %v464_v20 = vshll.u32 %v8267_v15, 16  ;;  %888 = vst.msk [vmem:[#allocation2 + $0x184] sm:$0xf] %vm224_vm3, %v8264_v14  ;;  %889 = vst.msk [vmem:[#allocation2 + $0x188] sm:$0xf] %vm224_vm3, %v8267_v15 }
  0x22   : > { %v8281_v21 = vld [vmem:[%s8256_s11 + $0xc] sm:$0xf]  ;;  %890 = vst.msk [vmem:[#allocation2 + $0x198] sm:$0xf] %vm224_vm3, %v8270_v16  ;;  %v10896_v22 = vshrl.u32 %v8270_v16, 16  ;;  %v10897_v23 = vshll.u32 %v8270_v16, 16 }
  0x23   : > { %v478_v24 = vshrl.u32 %v8281_v21, 16  ;;  %v10891_v25 = vshll.u32 %v8281_v21, 16  ;;  %891 = vst.msk [vmem:[#allocation2 + $0x19c] sm:$0xf] %vm224_vm3, %v8281_v21  ;;  %v8292_v26 = vld [vmem:[%s8256_s11 + $0x10] sm:$0xf] }
  0x24   : > { %v10923_v27 = vsel %vm8296_vm6, 4294967295, %v10922_v27  ;;  %v455_v28 = vrot.slane %v453_v17, 7  ;;  %v8304_v29 = vrot.slane %v461_v19, 7  ;;  %v8307_v30 = vld [vmem:[%s8256_s11 + $0x14] sm:$0xf]  ;;  %v10885_v31 = vshrl.u32 %v8292_v26, 16 }
  0x25   : > { %10924 = vst [vmem:[#allocation6_spill] sm:$0xff] %v10923_v27  ;;  %892 = vst.msk [vmem:[#allocation2 + $0x1ac] sm:$0xf] %vm224_vm3, %v8292_v26  ;;  %v775_v33 = vld [vmem:[#allocation2 + $0x1c] sm:$0xf]  ;;  %v472_v34 = vrot.slane %v10896_v22, 7 }
  0x26   : > { %v8322_v35 = vrot.slane %v478_v24, 7  ;;  %893 = vst.msk [vmem:[#allocation2 + $0x1b0] sm:$0xf] %vm224_vm3, %v8307_v30  ;;  %v458_v36 = vor.u32 %v456_v18, %v455_v28  ;;  %v459_v37 = vrot.slane %v455_v28, 4  ;;  %v466_v38 = vor.u32 %v464_v20, %v8304_v29  ;;  %v782_v39 = vld [vmem:[#allocation2 + $0x30] sm:$0xf] }
  0x27   : > { %v489_v40 = vrot.slane %v10885_v31, 7  ;;  %v475_v41 = vor.u32 %v10897_v23, %v472_v34  ;;  %v476_v42 = vrot.slane %v472_v34, 4  ;;  %v10890_v44 = vshll.u32 %v8292_v26, 16  ;;  %v789_v45 = vld [vmem:[#allocation2 + $0x44] sm:$0xf]  ;;  %s8141_s14 = smov 64  }
  0x28   : > { %v483_v43 = vor.u32 %v10891_v25, %v8322_v35  ;;  %v467_v46 = vsel %vm8296_vm6, %v459_v37, %v466_v38  ;;  %v776_v47 = vsel %vm8314_vm7, %v458_v36, %v775_v33  ;;  %v10882_v48 = vshrl.u32 %v8307_v30, 16  ;;  %v8345_v49 = vld [vmem:[%s8256_s11 + $0x18] sm:$0xf]  ;;  %v8348_v50 = vld [vmem:[%s8256_s11 + $0x1c] sm:$0xf]  ;;  %s215_s9 = sand.u32 1, %s8130_s19  }
  0x29   : > { %777 = vst [vmem:[#allocation2 + $0x1c] sm:$0xf] %v776_v47  ;;  %778 = vst.msk [vmem:[#allocation2 + $0x20] sm:$0xf] %vm224_vm3, %v467_v46  ;;  %v783_v52 = vsel %vm8314_vm7, %v475_v41, %v782_v39  ;;  %v492_v53 = vor.u32 %v10890_v44, %v489_v40  ;;  %v10884_v54 = vshll.u32 %v8307_v30, 16  ;;  %v493_v55 = vrot.slane %v489_v40, 4 }
  0x2a   : > { %v484_v51 = vsel %vm8296_vm6, %v476_v42, %v483_v43  ;;  %894 = vst.msk [vmem:[#allocation2 + $0x1c0] sm:$0xf] %vm224_vm3, %v8345_v49  ;;  %895 = vst.msk [vmem:[#allocation2 + $0x1c4] sm:$0xf] %vm224_vm3, %v8348_v50  ;;  %v8365_v56 = vrot.slane %v10882_v48, 7  ;;  %v10880_v58 = vshrl.u32 %v8345_v49, 16 }
  0x2b   : > { %784 = vst [vmem:[#allocation2 + $0x30] sm:$0xf] %v783_v52  ;;  %785 = vst.msk [vmem:[#allocation2 + $0x34] sm:$0xf] %vm224_vm3, %v484_v51  ;;  %v790_v57 = vsel %vm8314_vm7, %v492_v53, %v789_v45  ;;  %v10881_v59 = vshll.u32 %v8345_v49, 16  ;;  %v10872_v60 = vshrl.u32 %v8348_v50, 16 }
  0x2c   : > { %v500_v61 = vor.u32 %v10884_v54, %v8365_v56  ;;  %791 = vst [vmem:[#allocation2 + $0x44] sm:$0xf] %v790_v57  ;;  %v10873_v62 = vshll.u32 %v8348_v50, 16  ;;  %v506_v63 = vrot.slane %v10880_v58, 7  ;;  %v8383_v2 = vld [vmem:[%s8256_s11 + $0x20] sm:$0xf] }
  0x2d   : > { %v8380_v1 = vrot.slane %v10872_v60, 7  ;;  %v8386_v3 = vld [vmem:[%s8256_s11 + $0x24] sm:$0xf]  ;;  %v796_v5 = vld [vmem:[#allocation2 + $0x58] sm:$0xf]  ;;  %v10865_v6 = vshrl.u32 %v8383_v2, 16 }
  0x2e   : > { %v501_v4 = vsel %vm8296_vm6, %v493_v55, %v500_v61  ;;  %v10870_v7 = vshll.u32 %v8383_v2, 16  ;;  %v10863_v8 = vshrl.u32 %v8386_v3, 16  ;;  %896 = vst.msk [vmem:[#allocation2 + $0x1d4] sm:$0xf] %vm224_vm3, %v8383_v2  ;;  %897 = vst.msk [vmem:[#allocation2 + $0x1d8] sm:$0xf] %vm224_vm3, %v8386_v3  ;;  %v509_v10 = vor.u32 %v10881_v59, %v506_v63 }
  0x2f   : > { %v261_v9 = vld [vmem:[#allocation2 + $0x80] sm:$0x1]  ;;  %792 = vst.msk [vmem:[#allocation2 + $0x48] sm:$0xf] %vm224_vm3, %v501_v4  ;;  %v510_v11 = vrot.slane %v506_v63, 4  ;;  %v517_v12 = vor.u32 %v10873_v62, %v8380_v1  ;;  %v10864_v13 = vshll.u32 %v8386_v3, 16 }
  0x30   : > { %v803_v28 = vld [vmem:[#allocation2 + $0x6c] sm:$0xf]  ;;  %v8405_v33 = vld [vmem:[%s8256_s11 + $0x28] sm:$0xf]  ;;  %v264_v36 = vld [vmem:[#allocation2 + $0x94] sm:$0x1]  ;;  %v797_v41 = vsel %vm8314_vm7, %v509_v10, %v796_v5 }
  0x31   : > { %v8408_v34 = vld [vmem:[%s8256_s11 + $0x2c] sm:$0xf]  ;;  %v7715_v37 = vld [vmem:[#allocation2 + $0x1c] sm:$0xff]   ;;  %v523_v38 = vrot.slane %v10865_v6, 7  ;;  %898 = vst.msk [vmem:[#allocation2 + $0x1e8] sm:$0xf] %vm224_vm3, %v8405_v33  ;;  %v518_v40 = vsel %vm8296_vm6, %v510_v11, %v517_v12 }
  0x32   : > { %899 = vst.msk [vmem:[#allocation2 + $0x1ec] sm:$0xf] %vm224_vm3, %v8408_v34  ;;  %v7716_v39 = vld [vmem:[#allocation2 + $0x30] sm:$0xff]   ;;  %v8422_v42 = vrot.slane %v10863_v8, 7  ;;  %1871 = vrot.lane.b32.xlu0 %v7715_v37, %s8141_s14  ;;  %798 = vst [vmem:[#allocation2 + $0x58] sm:$0xf] %v797_v41 }
  0x33   : > { %v7717_v43 = vld [vmem:[#allocation2 + $0x170] sm:$0xff]   ;;  %799 = vst.msk [vmem:[#allocation2 + $0x5c] sm:$0xf] %vm224_vm3, %v518_v40  ;;  %v526_v45 = vor.u32 %v10870_v7, %v523_v38  ;;  %v527_v46 = vrot.slane %v523_v38, 4  ;;  %1873 = vrot.lane.b32.xlu1 %v7716_v39, %s8141_s14  ;;  %v7718_v47 = vld [vmem:[#allocation2 + $0x184] sm:$0xff]   ;;  %v262_v52 = vsel %vm8225_vm2, 0, %v261_v9 }
  0x34   : > { %v534_v51 = vor.u32 %v10864_v13, %v8422_v42  ;;  %v10856_v53 = vshrl.u32 %v8405_v33, 16  ;;  %v10858_v55 = vshll.u32 %v8405_v33, 16  ;;  %263 = vst [vmem:[#allocation2 + $0x80] sm:$0x1] %v262_v52  ;;  %v10851_v61 = vshrl.u32 %v8408_v34, 16  ;;  %v7757_v9 = vld [vmem:[%s10846_s1 + $0x48] sm:$0xff]  }
  0x35   : > { %v804_v57 = vsel %vm8314_vm7, %v526_v45, %v803_v28  ;;  %v10855_v63 = vshll.u32 %v8408_v34, 16  ;;  %v265_v4 = vsel %vm8225_vm2, 0, %v264_v36  ;;  %v8443_v5 = vld [vmem:[%s8256_s11 + $0x30] sm:$0xf]  ;;  %v8461_v36 = vld [vmem:[%s8256_s11 + $0x34] sm:$0xf]  ;;  %7106 = vmatprep.subr.bf16.mxu0 %v7757_v9 }
  0x36   : > { %v535_v10 = vsel %vm8296_vm6, %v527_v46, %v534_v51  ;;  %805 = vst [vmem:[#allocation2 + $0x6c] sm:$0xf] %v804_v57  ;;  %v540_v11 = vrot.slane %v10856_v53, 7  ;;  %266 = vst [vmem:[#allocation2 + $0x94] sm:$0x1] %v265_v4  ;;  %1679 = vrot.lane.b32.xlu0 %v7717_v43, %s8141_s14  ;;  %v7719_v12 = vld [vmem:[#allocation2 + $0x44] sm:$0xff]  }
  0x37   : > { %900 = vst.msk [vmem:[#allocation2 + $0x1fc] sm:$0xf] %vm224_vm3, %v8443_v5  ;;  %806 = vst.msk [vmem:[#allocation2 + $0x70] sm:$0xf] %vm224_vm3, %v535_v10  ;;  %v8458_v28 = vrot.slane %v10851_v61, 7  ;;  %1681 = vrot.lane.b32.xlu1 %v7718_v47, %s8141_s14  ;;  %v7720_v37 = vld [vmem:[#allocation2 + $0x198] sm:$0xff]  }
  0x38   : > { %v544_v38 = vrot.slane %v540_v11, 4  ;;  %v10852_v39 = vshrl.u32 %v8443_v5, 16  ;;  %v10854_v40 = vshll.u32 %v8443_v5, 16  ;;  %901 = vst.msk [vmem:[#allocation2 + $0x200] sm:$0xf] %vm224_vm3, %v8461_v36  ;;  %v543_v41 = vor.u32 %v10858_v55, %v540_v11  ;;  %v7722_v61 = vld [vmem:[#allocation2 + $0x1ac] sm:$0xff]  }
  0x39   : > { %v551_v43 = vor.u32 %v10855_v63, %v8458_v28  ;;  %v10853_v45 = vshrl.u32 %v8461_v36, 16  ;;  %v10857_v46 = vshll.u32 %v8461_v36, 16  ;;  %v267_v47 = vld [vmem:[#allocation2 + $0xa8] sm:$0x1]  ;;  %v8487_v10 = vld [vmem:[%s8256_s11 + $0x38] sm:$0xf] }
  0x3a   : > { %v7721_v51 = vld [vmem:[#allocation2 + $0x58] sm:$0xff]   ;;  %v557_v52 = vrot.slane %v10852_v39, 7  ;;  %1875 = vrot.lane.b32.xlu0 %v7719_v12, %s8141_s14  ;;  %v268_v9 = vsel %vm8225_vm2, 0, %v267_v47  ;;  %902 = vst.msk [vmem:[#allocation2 + $0x210] sm:$0xf] %vm224_vm3, %v8487_v10  ;;  %vm295_vm8 = vcmask 519171  }
  0x3b   : > { %v552_v57 = vsel %vm8296_vm6, %v544_v38, %v551_v43  ;;  %v8482_v4 = vrot.slane %v10853_v45, 7  ;;  %v8490_v11 = vld [vmem:[%s8256_s11 + $0x3c] sm:$0xf]  ;;  %1683 = vrot.lane.b32.xlu1 %v7720_v37, %s8141_s14  ;;  %v810_v39 = vld [vmem:[#allocation2 + $0x80] sm:$0xf]  ;;  %v10861_v43 = vshrl.u32 %v8487_v10, 16 }
  0x3c   : > { %813 = vst.msk [vmem:[#allocation2 + $0x84] sm:$0xf] %vm224_vm3, %v552_v57  ;;  %v560_v12 = vor.u32 %v10854_v40, %v557_v52  ;;  %v561_v38 = vrot.slane %v557_v52, 4  ;;  %269 = vst [vmem:[#allocation2 + $0xa8] sm:$0x1] %v268_v9  ;;  %v10862_v45 = vshll.u32 %v8487_v10, 16  ;;  %v811_v37 = vsel %vm8314_vm7, %v543_v41, %v810_v39 }
  0x3d   : > { %903 = vst.msk [vmem:[#allocation2 + $0x214] sm:$0xf] %vm224_vm3, %v8490_v11  ;;  %v568_v47 = vor.u32 %v10857_v46, %v8482_v4  ;;  %v817_v57 = vld [vmem:[#allocation2 + $0x94] sm:$0xf]  ;;  %v10859_v52 = vshrl.u32 %v8490_v11, 16  ;;  %v10860_v9 = vshll.u32 %v8490_v11, 16 }
  0x3e   : > { %v7724_v40 = vld [vmem:[#allocation2 + $0x1c0] sm:$0xff]   ;;  %812 = vst [vmem:[#allocation2 + $0x80] sm:$0xf] %v811_v37  ;;  %v818_v63 = vsel %vm8314_vm7, %v560_v12, %v817_v57  ;;  %v574_v53 = vrot.slane %v10861_v43, 7  ;;  %1877 = vrot.lane.b32.xlu0 %v7721_v51, %s8141_s14  ;;  %v7723_v39 = vld [vmem:[#allocation2 + $0x6c] sm:$0xff]   ;;  %vm2367_vm15 = vcmask 523264  }
  0x3f   : > { %v569_v41 = vsel %vm8296_vm6, %v561_v38, %v568_v47  ;;  %819 = vst [vmem:[#allocation2 + $0x94] sm:$0xf] %v818_v63  ;;  %v8518_v46 = vrot.slane %v10859_v52, 7  ;;  %v270_v55 = vld [vmem:[#allocation2 + $0xbc] sm:$0x1]  ;;  %1685 = vrot.lane.b32.xlu1 %v7722_v61, %s8141_s14  ;;  %s6636_s10 = sshll.u32 %s215_s9, 8 }
  0x40   : > { %820 = vst.msk [vmem:[#allocation2 + $0x98] sm:$0xf] %vm224_vm3, %v569_v41  ;;  %v577_v12 = vor.u32 %v10862_v45, %v574_v53  ;;  %v578_v37 = vrot.slane %v574_v53, 4  ;;  %v271_v51 = vsel %vm8225_vm2, 0, %v270_v55  ;;  %v8527_v38 = vld [vmem:[%s8256_s11 + $0x40] sm:$0xf] }
  0x41   : > { %v8530_v63 = vld [vmem:[%s8256_s11 + $0x44] sm:$0xf]  ;;  %v585_v47 = vor.u32 %v10860_v9, %v8518_v46  ;;  %272 = vst [vmem:[#allocation2 + $0xbc] sm:$0x1] %v271_v51  ;;  %v10867_v61 = vshrl.u32 %v8527_v38, 16  ;;  %v10869_v57 = vshll.u32 %v8527_v38, 16 }
  0x42   : > { %v10866_v41 = vshrl.u32 %v8530_v63, 16  ;;  %904 = vst.msk [vmem:[#allocation2 + $0x224] sm:$0xf] %vm224_vm3, %v8527_v38  ;;  %905 = vst.msk [vmem:[#allocation2 + $0x228] sm:$0xf] %vm224_vm3, %v8530_v63  ;;  %v7758_v55 = vld [vmem:[%s10846_s1 + $0x8] sm:$0xff]   ;;  %1879 = vrot.lane.b32.xlu0 %v7723_v39, %s8141_s14 }
  0x43   : > { %v273_v53 = vld [vmem:[#allocation2 + $0xd0] sm:$0x1]  ;;  %v10868_v52 = vshll.u32 %v8530_v63, 16  ;;  %v8549_v9 = vld [vmem:[%s8256_s11 + $0x48] sm:$0xf]  ;;  %v586_v45 = vsel %vm8296_vm6, %v578_v37, %v585_v47  ;;  %v591_v13 = vrot.slane %v10867_v61, 7  ;;  %7107 = vmatpush3.bf16.msra.mxu0 %v7758_v55  ;;  %1687 = vrot.lane.b32.xlu1 %v7724_v40, %s8141_s14 }
  0x44   : > { %v274_v51 = vsel %vm8225_vm2, 0, %v273_v53  ;;  %v8552_v43 = vld [vmem:[%s8256_s11 + $0x4c] sm:$0xf]  ;;  %v824_v8 = vld [vmem:[#allocation2 + $0xa8] sm:$0xf]  ;;  %v8561_v6 = vrot.slane %v10866_v41, 7 }
  0x45   : > { %275 = vst [vmem:[#allocation2 + $0xd0] sm:$0x1] %v274_v51  ;;  %906 = vst.msk [vmem:[#allocation2 + $0x238] sm:$0xf] %vm224_vm3, %v8549_v9  ;;  %v7726_v39 = vld [vmem:[#allocation2 + $0x1d4] sm:$0xff]   ;;  %v825_v37 = vsel %vm8314_vm7, %v577_v12, %v824_v8  ;;  %v10871_v47 = vshrl.u32 %v8549_v9, 16  ;;  %v594_v51 = vor.u32 %v10869_v57, %v591_v13 }
  0x46   : > { %10927 = vst [vmem:[#allocation7_spill] sm:$0xff] %v8561_v6  ;;  %907 = vst.msk [vmem:[#allocation2 + $0x23c] sm:$0xf] %vm224_vm3, %v8552_v43  ;;  %v7725_v53 = vld [vmem:[#allocation2 + $0x80] sm:$0xff]   ;;  %v595_v41 = vrot.slane %v591_v13, 4  ;;  %v602_v55 = vor.u32 %v10868_v52, %v8561_v6  ;;  %v10876_v40 = vshll.u32 %v8549_v9, 16 }
  0x47   : > { %827 = vst.msk [vmem:[#allocation2 + $0xac] sm:$0xf] %vm224_vm3, %v586_v45  ;;  %826 = vst [vmem:[#allocation2 + $0xa8] sm:$0xf] %v825_v37  ;;  %v7759_v8 = vld [vmem:[%s10846_s1 + $0x50] sm:$0xff]   ;;  %v7728_v12 = vld [vmem:[#allocation2 + $0x1e8] sm:$0xff]   ;;  %1881 = vrot.lane.b32.xlu0 %v7725_v53, %s8141_s14  ;;  %1689 = vrot.lane.b32.xlu1 %v7726_v39, %s8141_s14 }
  0x48   : > { %v608_v45 = vrot.slane %v10871_v47, 7  ;;  %v10874_v37 = vshrl.u32 %v8552_v43, 16  ;;  %v10875_v61 = vshll.u32 %v8552_v43, 16  ;;  %v7727_v13 = vld [vmem:[#allocation2 + $0x94] sm:$0xff]   ;;  %v603_v52 = vsel %vm8296_vm6, %v595_v41, %v602_v55  ;;  %v276_v57 = vld [vmem:[#allocation2 + $0xe4] sm:$0x1]  ;;  %7108 = vmatprep.subr.bf16.mxu0 %v7759_v8 }
  0x49   : > { %v831_v7 = vld [vmem:[#allocation2 + $0xbc] sm:$0xf]  ;;  %834 = vst.msk [vmem:[#allocation2 + $0xc0] sm:$0xf] %vm224_vm3, %v603_v52  ;;  %v8598_v53 = vrot.slane %v461_v19, 4  ;;  %v277_v39 = vsel %vm8225_vm2, 0, %v276_v57 }
  0x4a   : > { %v611_v47 = vor.u32 %v10876_v40, %v608_v45  ;;  %v612_v60 = vrot.slane %v608_v45, 4  ;;  %v8594_v62 = vrot.slane %v10874_v37, 7  ;;  %v832_v41 = vsel %vm8314_vm7, %v594_v51, %v831_v7  ;;  %v8605_v55 = vld [vmem:[%s8256_s11 + $0x50] sm:$0xf]  ;;  %v7730_v52 = vld [vmem:[#allocation2 + $0x1fc] sm:$0xff]   ;;  %s7103_s12 = sshll.u32 %s8196_s22, 12 }
  0x4b   : > { %833 = vst [vmem:[#allocation2 + $0xbc] sm:$0xf] %v832_v41  ;;  %278 = vst [vmem:[#allocation2 + $0xe4] sm:$0x1] %v277_v39  ;;  %v8611_v37 = vld [vmem:[%s8256_s11 + $0x54] sm:$0xf]  ;;  %1883 = vrot.lane.b32.xlu0 %v7727_v13, %s8141_s14  ;;  %1691 = vrot.lane.b32.xlu1 %v7728_v12, %s8141_s14  ;;  %s10790_s17 = scalar_lea.hbm %s10850_s5, %s7103_s12 }
  0x4c   : > { %10928 = vst [vmem:[#allocation8_spill] sm:$0xff] %v8594_v62  ;;  %v619_v8 = vor.u32 %v10875_v61, %v8594_v62  ;;  %v838_v45 = vld [vmem:[#allocation2 + $0xd0] sm:$0xf]  ;;  %v10878_v19 = vshrl.u32 %v8605_v55, 16  ;;  %v10879_v7 = vshll.u32 %v8605_v55, 16  ;;  %v10877_v51 = vshrl.u32 %v8611_v37, 16 }
  0x4d   : > { %908 = vst.msk [vmem:[#allocation2 + $0x24c] sm:$0xf] %vm224_vm3, %v8605_v55  ;;  %v839_v57 = vsel %vm8314_vm7, %v611_v47, %v838_v45  ;;  %v10883_v41 = vshll.u32 %v8611_v37, 16  ;;  %909 = vst.msk [vmem:[#allocation2 + $0x250] sm:$0xf] %vm224_vm3, %v8611_v37  ;;  %v8639_v12 = vrot.slane %v456_v18, 5 }
  0x4e   : > { %v7729_v39 = vld [vmem:[#allocation2 + $0xa8] sm:$0xff]   ;;  %v620_v61 = vsel %vm8296_vm6, %v612_v60, %v619_v8  ;;  %840 = vst [vmem:[#allocation2 + $0xd0] sm:$0xf] %v839_v57  ;;  %v625_v13 = vrot.slane %v10878_v19, 7  ;;  %v8632_v47 = vrot.slane %v10877_v51, 7  ;;  %v7760_v18 = vld [vmem:[%s10846_s1 + $0x10] sm:$0xff]  }
  0x4f   : > { %841 = vst.msk [vmem:[#allocation2 + $0xd4] sm:$0xf] %vm224_vm3, %v620_v61  ;;  %v279_v45 = vld [vmem:[#allocation2 + $0xf8] sm:$0x1]  ;;  %v8646_v61 = vld [vmem:[%s8256_s11 + $0x5c] sm:$0xf]  ;;  %1885 = vrot.lane.b32.xlu0 %v7729_v39, %s8141_s14  ;;  %1693 = vrot.lane.b32.xlu1 %v7730_v52, %s8141_s14 }
  0x50   : > { %10929 = vst [vmem:[#allocation9_spill] sm:$0xff] %v8632_v47  ;;  %v8635_v40 = vld [vmem:[%s8256_s11 + $0x58] sm:$0xf]  ;;  %v628_v60 = vor.u32 %v10879_v7, %v625_v13  ;;  %v629_v8 = vrot.slane %v625_v13, 4  ;;  %v280_v57 = vsel %vm8225_vm2, 0, %v279_v45  ;;  %v7732_v19 = vld [vmem:[#allocation2 + $0x210] sm:$0xff]   ;;  %v636_v13 = vor.u32 %v10883_v41, %v8632_v47  ;;  %7109 = vmatpush3.bf16.msra.mxu0 %v7760_v18 }
  0x51   : > { %v10886_v51 = vshrl.u32 %v8635_v40, 16  ;;  %910 = vst.msk [vmem:[#allocation2 + $0x260] sm:$0xf] %vm224_vm3, %v8635_v40  ;;  %281 = vst [vmem:[#allocation2 + $0xf8] sm:$0x1] %v280_v57  ;;  %v10889_v45 = vshll.u32 %v8635_v40, 16 }
  0x52   : > { %v10887_v7 = vshrl.u32 %v8646_v61, 16  ;;  %v10888_v58 = vshll.u32 %v8646_v61, 16  ;;  %911 = vst.msk [vmem:[#allocation2 + $0x264] sm:$0xf] %vm224_vm3, %v8646_v61  ;;  %v282_v59 = vld [vmem:[#allocation2 + $0x10c] sm:$0x1]  ;;  %v637_v54 = vsel %vm8296_vm6, %v629_v8, %v636_v13 }
  0x53   : > { %v642_v39 = vrot.slane %v10886_v51, 7  ;;  %v8667_v48 = vld [vmem:[%s8256_s11 + $0x60] sm:$0xf]  ;;  %v8671_v57 = vrot.slane %v453_v17, 4  ;;  %v845_v31 = vld [vmem:[#allocation2 + $0xe4] sm:$0xf]  ;;  %1695 = vrot.lane.b32.xlu1 %v7732_v19, %s8141_s14 }
  0x54   : > { %v7731_v41 = vld [vmem:[#allocation2 + $0xbc] sm:$0xff]   ;;  %v8677_v52 = vrot.slane %v10887_v7, 7  ;;  %912 = vst.msk [vmem:[#allocation2 + $0x274] sm:$0xf] %vm224_vm3, %v8667_v48  ;;  %v7734_v51 = vld [vmem:[#allocation2 + $0x224] sm:$0xff]   ;;  %v846_v14 = vsel %vm8314_vm7, %v628_v60, %v845_v31  ;;  %v283_v13 = vsel %vm8225_vm2, 0, %v282_v59 }
  0x55   : > { %848 = vst.msk [vmem:[#allocation2 + $0xe8] sm:$0xf] %vm224_vm3, %v637_v54  ;;  %v646_v17 = vrot.slane %v642_v39, 4  ;;  %1887 = vrot.lane.b32.xlu0 %v7731_v41, %s8141_s14  ;;  %847 = vst [vmem:[#allocation2 + $0xe4] sm:$0xf] %v846_v14  ;;  %v645_v8 = vor.u32 %v10889_v45, %v642_v39  ;;  %v10892_v31 = vshrl.u32 %v8667_v48, 16  ;;  %v925_v25 = vor.u32 %v8671_v57, %v8639_v12 }
  0x56   : > { %10930 = vst [vmem:[#allocation10_spill] sm:$0xff] %v8677_v52  ;;  %v653_v18 = vor.u32 %v10888_v58, %v8677_v52  ;;  %v8693_v7 = vld [vmem:[%s8256_s11 + $0x64] sm:$0xf]  ;;  %v7733_v54 = vld [vmem:[#allocation2 + $0xd0] sm:$0xff]   ;;  %284 = vst [vmem:[#allocation2 + $0x10c] sm:$0x1] %v283_v13 }
  0x57   : > { %v10895_v41 = vshll.u32 %v8667_v48, 16  ;;  %v10893_v60 = vshrl.u32 %v8693_v7, 16  ;;  %v10894_v39 = vshll.u32 %v8693_v7, 16  ;;  %913 = vst.msk [vmem:[#allocation2 + $0x278] sm:$0xf] %vm224_vm3, %v8693_v7  ;;  %v659_v14 = vrot.slane %v10892_v31, 7  ;;  %1697 = vrot.lane.b32.xlu1 %v7734_v51, %s8141_s14 }
  0x58   : > { %v654_v59 = vsel %vm8296_vm6, %v646_v17, %v653_v18  ;;  %v285_v19 = vld [vmem:[#allocation2 + $0x120] sm:$0x1]  ;;  %v8708_v13 = vrot.slane %v464_v20, 5  ;;  %v7736_v58 = vld [vmem:[#allocation2 + $0x238] sm:$0xff]   ;;  %v8728_v31 = vld [vmem:[%s8256_s11 + $0x6c] sm:$0xf] }
  0x59   : > { %v852_v45 = vld [vmem:[#allocation2 + $0xf8] sm:$0xf]  ;;  %855 = vst.msk [vmem:[#allocation2 + $0xfc] sm:$0xf] %vm224_vm3, %v654_v59  ;;  %v8713_v44 = vrot.slane %v10893_v60, 7  ;;  %1889 = vrot.lane.b32.xlu0 %v7733_v54, %s8141_s14  ;;  %v662_v15 = vor.u32 %v10895_v41, %v659_v14  ;;  %v663_v20 = vrot.slane %v659_v14, 4 }
  0x5a   : > { %v853_v17 = vsel %vm8314_vm7, %v645_v8, %v852_v45  ;;  %v286_v18 = vsel %vm8225_vm2, 0, %v285_v19  ;;  %v8725_v59 = vld [vmem:[%s8256_s11 + $0x68] sm:$0xf]  ;;  %v10898_v54 = vshrl.u32 %v8728_v31, 16  ;;  %915 = vst.msk [vmem:[#allocation2 + $0x28c] sm:$0xf] %vm224_vm3, %v8728_v31 }
  0x5b   : > { %10931 = vst [vmem:[#allocation11_spill] sm:$0xff] %v8713_v44  ;;  %854 = vst [vmem:[#allocation2 + $0xf8] sm:$0xf] %v853_v17  ;;  %v670_v57 = vor.u32 %v10894_v39, %v8713_v44  ;;  %v10900_v45 = vshrl.u32 %v8725_v59, 16  ;;  %v10901_v8 = vshll.u32 %v8725_v59, 16  ;;  %v7763_v51 = vld [vmem:[%s10846_s1 + $0x58] sm:$0xff]   ;;  %1699 = vrot.lane.b32.xlu1 %v7736_v58, %s8141_s14 }
  0x5c   : > { %287 = vst [vmem:[#allocation2 + $0x120] sm:$0x1] %v286_v18  ;;  %914 = vst.msk [vmem:[#allocation2 + $0x288] sm:$0xf] %vm224_vm3, %v8725_v59  ;;  %v10899_v14 = vshll.u32 %v8728_v31, 16  ;;  %v7735_v18 = vld [vmem:[#allocation2 + $0xe4] sm:$0xff]   ;;  %7110 = vmatprep.subr.bf16.mxu0 %v7763_v51 }
  0x5d   : > { %v288_v19 = vld [vmem:[#allocation2 + $0x134] sm:$0x1]  ;;  %v671_v60 = vsel %vm8296_vm6, %v663_v20, %v670_v57  ;;  %v676_v39 = vrot.slane %v10900_v45, 7  ;;  %v8753_v41 = vrot.slane %v10898_v54, 7  ;;  %v8759_v17 = vrot.slane %v478_v24, 4  ;;  %1891 = vrot.lane.b32.xlu0 %v7735_v18, %s8141_s14  ;;  %v7738_v57 = vld [vmem:[#allocation2 + $0x24c] sm:$0xff]  }
  0x5e   : > { %v289_v22 = vsel %vm8225_vm2, 0, %v288_v19  ;;  %v859_v23 = vld [vmem:[#allocation2 + $0x10c] sm:$0xf]  ;;  %862 = vst.msk [vmem:[#allocation2 + $0x110] sm:$0xf] %vm224_vm3, %v671_v60  ;;  %v8762_v20 = vrot.slane %v925_v25, 4 }
  0x5f   : > { %10932 = vst [vmem:[#allocation12_spill] sm:$0xff] %v8753_v41  ;;  %290 = vst [vmem:[#allocation2 + $0x134] sm:$0x1] %v289_v22  ;;  %v860_v19 = vsel %vm8314_vm7, %v662_v15, %v859_v23  ;;  %v679_v51 = vor.u32 %v10901_v8, %v676_v39  ;;  %v680_v24 = vrot.slane %v676_v39, 4  ;;  %v687_v22 = vor.u32 %v10899_v14, %v8753_v41  ;;  %v8774_v25 = vld [vmem:[%s8256_s11 + $0x70] sm:$0xf] }
  0x60   : > { %v8777_v60 = vld [vmem:[%s8256_s11 + $0x74] sm:$0xf]  ;;  %861 = vst [vmem:[#allocation2 + $0x10c] sm:$0xf] %v860_v19  ;;  %v10903_v58 = vshrl.u32 %v8774_v25, 16  ;;  %v7740_v39 = vld [vmem:[#allocation2 + $0x260] sm:$0xff]   ;;  %1701 = vrot.lane.b32.xlu1 %v7738_v57, %s8141_s14 }
  0x61   : > { %v10906_v23 = vshrl.u32 %v8777_v60, 16  ;;  %916 = vst.msk [vmem:[#allocation2 + $0x29c] sm:$0xf] %vm224_vm3, %v8774_v25  ;;  %917 = vst.msk [vmem:[#allocation2 + $0x2a0] sm:$0xf] %vm224_vm3, %v8777_v60  ;;  %v688_v54 = vsel %vm8296_vm6, %v680_v24, %v687_v22  ;;  %s10804_s22 = scalar_lea.sflag [#allocation4], %s215_s9 }
  0x62   : > { %v291_v14 = vld [vmem:[#allocation2 + $0x148] sm:$0x1]  ;;  %v8790_v19 = vld [vmem:[%s8256_s11 + $0x78] sm:$0xf]  ;;  %v8793_v45 = vld [vmem:[%s8256_s11 + $0x7c] sm:$0xf] }
  0x63   : > { %v7737_v8 = vld [vmem:[#allocation2 + $0xf8] sm:$0xff]   ;;  %v866_v18 = vld [vmem:[#allocation2 + $0x120] sm:$0xf]  ;;  %869 = vst.msk [vmem:[#allocation2 + $0x124] sm:$0xf] %vm224_vm3, %v688_v54  ;;  %v693_v15 = vrot.slane %v10903_v58, 7 }
  0x64   : > { %918 = vst.msk [vmem:[#allocation2 + $0x2b0] sm:$0xf] %vm224_vm3, %v8790_v19  ;;  %919 = vst.msk [vmem:[#allocation2 + $0x2b4] sm:$0xf] %vm224_vm3, %v8793_v45  ;;  %v867_v24 = vsel %vm8314_vm7, %v679_v51, %v866_v18  ;;  %v8807_v22 = vrot.slane %v10906_v23, 7  ;;  %v10934_v54 = vshll.u32 %v8270_v16, 16  ;;  %1893 = vrot.lane.b32.xlu0 %v7737_v8, %s8141_s14  ;;  %1703 = vrot.lane.b32.xlu1 %v7740_v39, %s8141_s14 }
  0x65   : > { %868 = vst [vmem:[#allocation2 + $0x120] sm:$0xf] %v867_v24  ;;  %v10935_v58 = vshll.u32 %v8774_v25, 16  ;;  %v697_v47 = vrot.slane %v693_v15, 4  ;;  %v292_v57 = vsel %vm8225_vm2, 0, %v291_v14  ;;  %v10911_v51 = vshrl.u32 %v8790_v19, 16 }
  0x66   : > { %10933 = vst [vmem:[#allocation13_spill] sm:$0xff] %v8807_v22  ;;  %v8811_v44 = vrot.slane %v10934_v54, 5  ;;  %v7764_v18 = vld [vmem:[%s10846_s1 + $0x18] sm:$0xff]   ;;  %v10936_v54 = vshll.u32 %v8777_v60, 16  ;;  %v873_v8 = vld [vmem:[#allocation2 + $0x134] sm:$0xf]  ;;  %v10940_v39 = vor.u32 %v8598_v53, %v8708_v13 }
  0x67   : > { %v696_v41 = vor.u32 %v10935_v58, %v693_v15  ;;  %v7742_v23 = vld [vmem:[#allocation2 + $0x274] sm:$0xff]   ;;  %293 = vst [vmem:[#allocation2 + $0x148] sm:$0x1] %v292_v57  ;;  %v10913_v24 = vshll.u32 %v8790_v19, 16  ;;  %v10910_v58 = vshrl.u32 %v8793_v45, 16  ;;  %v710_v15 = vrot.slane %v10911_v51, 7  ;;  %7111 = vmatpush3.bf16.msra.mxu0 %v7764_v18 }
  0x68   : > { %v704_v52 = vor.u32 %v10936_v54, %v8807_v22  ;;  %v10912_v6 = vshll.u32 %v8793_v45, 16  ;;  %vm296_vm9 = vsmask.f32 7950  ;;  %v7739_v62 = vld [vmem:[#allocation2 + $0x10c] sm:$0xff]   ;;  %vm920_vm11 = vsmask.f32 3328  ;;  %1705 = vrot.lane.b32.xlu1 %v7742_v23, %s8141_s14 }
  0x69   : > { %v874_v14 = vsel %vm8314_vm7, %v696_v41, %v873_v8  ;;  %v8837_v54 = vrot.slane %v10910_v58, 7  ;;  %v714_v41 = vrot.slane %v710_v15, 4  ;;  %vm8841_vm10 = vmand %vm295_vm8, %vm296_vm9  ;;  %v931_v18 = vrot.slane %v10940_v39, 4  ;;  %1895 = vrot.lane.b32.xlu0 %v7739_v62, %s8141_s14  ;;  %v307_v27 = vld [vmem:[#allocation2 + $0x32c] sm:$0x8]  ;;  %s10671_s11 = scalar_lea.vmem [#allocation3], %s6636_s10 }
  0x6a   : > { %v705_v57 = vsel %vm8296_vm6, %v697_v47, %v704_v52  ;;  %875 = vst [vmem:[#allocation2 + $0x134] sm:$0xf] %v874_v14  ;;  %v7744_v47 = vld [vmem:[#allocation2 + $0x288] sm:$0xff]   ;;  %v713_v52 = vor.u32 %v10913_v24, %v710_v15  ;;  %vm921_vm12 = vsmask.f32 7440  ;;  %v10943_v62 = vshrl.u32 %v8270_v16, 16  ;;  %vm8891_vm14 = vmand %vm224_vm3, %vm920_vm11 }
  0x6b   : > { %10937 = vst [vmem:[#allocation14_spill] sm:$0xff] %v8837_v54  ;;  %876 = vst.msk [vmem:[#allocation2 + $0x138] sm:$0xf] %vm224_vm3, %v705_v57  ;;  %v721_v14 = vor.u32 %v10912_v6, %v8837_v54  ;;  %v298_v57 = vld [vmem:[#allocation2 + $0x2f0] sm:$0x8]  ;;  %v10944_v24 = vshll.u32 %v8281_v21, 16 }
  0x6c   : > { %v299_v58 = vsel %vm8841_vm10, 0, %v298_v57  ;;  %vm8857_vm13 = vmor %vm920_vm11, %vm921_vm12  ;;  %v933_v53 = vrot.slane %v10943_v62, 4  ;;  %v7741_v39 = vld [vmem:[#allocation2 + $0x120] sm:$0xff]   ;;  %1707 = vrot.lane.b32.xlu1 %v7744_v47, %s8141_s14  ;;  %v10953_v47 = vshll.u32 %v8348_v50, 16  ;;  %s6570_s13 = sshll.u32 %s10671_s11, 4  ;;  %s8142_s25 = smov [#allocation3]   ;;  %s10792_s13 = int_to_ptr.vmem [resolvable:$true] %s6570_s13 }
  0x6d   : > { %v722_v15 = vsel %vm8296_vm6, %v714_v41, %v721_v14  ;;  %300 = vst [vmem:[#allocation2 + $0x2f0] sm:$0x8] %v299_v58  ;;  %v928_v57 = vsel %vm8857_vm13, %v8762_v20, %v8708_v13  ;;  %v301_v6 = vld [vmem:[#allocation2 + $0x304] sm:$0x8]  ;;  %v936_v22 = vrot.slane %v10944_v24, 5  ;;  %v10945_v58 = vshll.u32 %v8292_v26, 16  ;;  %1897 = vrot.lane.b32.xlu0 %v7741_v39, %s8141_s14 }
  0x6e   : > { %v880_v54 = vld [vmem:[#allocation2 + $0x148] sm:$0xf]  ;;  %883 = vst.msk [vmem:[#allocation2 + $0x14c] sm:$0xf] %vm224_vm3, %v722_v15  ;;  %1118 = vst.msk [vmem:[#allocation2 + $0x2ec] sm:$0xf] %vm224_vm3, %v928_v57  ;;  %v934_v23 = vor.u32 %v933_v53, %v8811_v44 }
  0x6f   : > { %v302_v16 = vsel %vm8841_vm10, 0, %v301_v6  ;;  %v8879_v41 = vrot.slane %v10945_v58, 5  ;;  %v881_v21 = vsel %vm8314_vm7, %v713_v52, %v880_v54  ;;  %v7746_v13 = vld [vmem:[#allocation2 + $0x29c] sm:$0xff]   ;;  %v939_v20 = vor.u32 %v8759_v17, %v936_v22  ;;  %v304_v24 = vld [vmem:[#allocation2 + $0x318] sm:$0x8]  ;;  %s8076_s23 = scalar_lea.vmem %s10792_s13, 4096 }
  0x70   : > { %303 = vst [vmem:[#allocation2 + $0x304] sm:$0x8] %v302_v16  ;;  %v10946_v14 = vshrl.u32 %v8292_v26, 16  ;;  %v10947_v6 = vshll.u32 %v8307_v30, 16  ;;  %882 = vst [vmem:[#allocation2 + $0x148] sm:$0xf] %v881_v21  ;;  %1709 = vrot.lane.b32.xlu1 %v7746_v13, %s8141_s14  ;;  %p8077_p11 = scmp.ne.s32.totalorder %s10792_s13, %s8076_s23 }
  0x71   : > { %v935_v39 = vrot.slane %v934_v23, 4  ;;  %v305_v54 = vsel %vm8841_vm10, 0, %v304_v24  ;;  %v10950_v17 = vshrl.u32 %v8307_v30, 16  ;;  %v10951_v26 = vshll.u32 %v8345_v49, 16  ;;  %s8080_s26 = sshll.u32 %s8142_s25, 4  ;;  %s8081_s26 = int_to_ptr.vmem [resolvable:$false] %s8080_s26 }
  0x72   : > { %v942_v62 = vrot.slane %v10946_v14, 4  ;;  %v945_v53 = vrot.slane %v10947_v6, 5  ;;  %v7743_v16 = vld [vmem:[#allocation2 + $0x134] sm:$0xff]   ;;  %v940_v58 = vrot.slane %v939_v20, 4  ;;  %306 = vst [vmem:[#allocation2 + $0x318] sm:$0x8] %v305_v54  ;;  %p8078_p12 = pnand %p8077_p11, %p8213_p5  ;;  %p8083_p0 = scmp.lt.s32.totalorder %s10792_s13, %s8081_s26 }
  0x73   : > { %v947_v52 = vrot.slane %v10950_v17, 4  ;;  %v8901_v57 = vrot.slane %v10951_v26, 5  ;;  %v937_v23 = vsel %vm8857_vm13, %v935_v39, %v936_v22  ;;  %1899 = vrot.lane.b32.xlu0 %v7743_v16, %s8141_s14  ;;  %v10952_v24 = vshrl.u32 %v8345_v49, 16  ;;  %v7765_v54 = vld [vmem:[%s10846_s1 + $0x60] sm:$0xff]   ;;  %s8082_s30 = scalar_lea.vmem %s8081_s26, 8192 }
  0x74   : > { %v943_v21 = vor.u32 %v942_v62, %v8879_v41  ;;  %1126 = vst.msk [vmem:[#allocation2 + $0x300] sm:$0xf] %vm224_vm3, %v937_v23  ;;  %v1120_v17 = vld [vmem:[#allocation2 + $0x2f0] sm:$0xf]  ;;  %v954_v20 = vrot.slane %v10953_v47, 5  ;;  %v308_v39 = vsel %vm8841_vm10, 0, %v307_v27  ;;  %7112 = vmatprep.subr.bf16.mxu0 %v7765_v54  ;;  %p8079_p13 = pneg %p8078_p12  ;;  %p8084_p1 = scmp.lt.s32.totalorder %s8082_s30, %s8076_s23 }
  0x75   : > { %v948_v14 = vor.u32 %v947_v52, %v945_v53  ;;  %v951_v6 = vrot.slane %v10952_v24, 4  ;;  %v1121_v22 = vsel %vm8891_vm14, %v931_v18, %v1120_v17  ;;  %309 = vst [vmem:[#allocation2 + $0x32c] sm:$0x8] %v308_v39  ;;  %v10954_v13 = vshrl.u32 %v8348_v50, 16  ;;  %v7747_v27 = vld [vmem:[#allocation2 + $0x198] sm:$0xff]  }
  0x76   : > { %v944_v30 = vrot.slane %v943_v21, 4  ;;  %1122 = vst [vmem:[#allocation2 + $0x2f0] sm:$0xf] %v1121_v22  ;;  %v10955_v16 = vshll.u32 %v8383_v2, 16  ;;  %v10956_v47 = vshrl.u32 %v8383_v2, 16  ;;  %v7749_v22 = vld [vmem:[#allocation2 + $0x1ac] sm:$0xff]   ;;  %p8085_p2 = por %p8084_p1, %p8083_p0 }
  0x77   : > { %v949_v26 = vrot.slane %v948_v14, 4  ;;  %v952_v49 = vor.u32 %v951_v6, %v8901_v57  ;;  %v1127_v52 = vld [vmem:[#allocation2 + $0x304] sm:$0xf]  ;;  %v956_v18 = vrot.slane %v10954_v13, 4  ;;  %v7745_v21 = vld [vmem:[#allocation2 + $0x148] sm:$0xff]   ;;  %v10957_v54 = vshll.u32 %v8386_v3, 16 }
  0x78   : > { %v946_v62 = vsel %vm8857_vm13, %v944_v30, %v945_v53  ;;  %v8929_v53 = vrot.slane %v10955_v16, 5  ;;  %v1128_v23 = vsel %vm8891_vm14, %v940_v58, %v1127_v52  ;;  %1901 = vrot.lane.b32.xlu0 %v7745_v21, %s8141_s14  ;;  %v960_v58 = vrot.slane %v10956_v47, 4  ;;  %v7766_v13 = vld [vmem:[%s10846_s1 + $0x20] sm:$0xff]   ;;  %p8086_p3 = pnand %p8085_p2, %p8079_p13 }
  0x79   : > { %1133 = vst.msk [vmem:[#allocation2 + $0x314] sm:$0xf] %vm224_vm3, %v946_v62  ;;  %v953_v14 = vrot.slane %v952_v49, 4  ;;  %1129 = vst [vmem:[#allocation2 + $0x304] sm:$0xf] %v1128_v23  ;;  %v957_v24 = vor.u32 %v956_v18, %v954_v20  ;;  %v10958_v52 = vshrl.u32 %v8386_v3, 16  ;;  %7113 = vmatpush3.bf16.msra.mxu0 %v7766_v13 }
  0x7a   : > { %v1134_v30 = vld [vmem:[#allocation2 + $0x318] sm:$0xf]  ;;  %v310_v62 = vld [vmem:[#allocation2 + $0x340] sm:$0x8]  ;;  %v961_v49 = vor.u32 %v960_v58, %v8929_v53  ;;  %v10959_v18 = vshll.u32 %v8405_v33, 16 }
  0x7b   : > { %v1135_v50 = vsel %vm8891_vm14, %v949_v26, %v1134_v30  ;;  %v955_v6 = vsel %vm8857_vm13, %v953_v14, %v954_v20  ;;  %v958_v17 = vrot.slane %v957_v24, 4  ;;  %v311_v39 = vsel %vm8841_vm10, 0, %v310_v62 }
  0x7c   : > { %1136 = vst [vmem:[#allocation2 + $0x318] sm:$0xf] %v1135_v50  ;;  %1140 = vst.msk [vmem:[#allocation2 + $0x328] sm:$0xf] %vm224_vm3, %v955_v6  ;;  %v963_v26 = vrot.slane %v10957_v54, 5  ;;  %v965_v20 = vrot.slane %v10958_v52, 4  ;;  %2255 = vrot.lane.b32.xlu0 %v7747_v27, %s8141_s14 }
  0x7d   : > { %v7748_v2 = vld [vmem:[#allocation2 + $0x2ec] sm:$0xff]   ;;  %312 = vst [vmem:[#allocation2 + $0x340] sm:$0x8] %v311_v39  ;;  %v8954_v16 = vrot.slane %v10959_v18, 5  ;;  %v962_v23 = vrot.slane %v961_v49, 4  ;;  %v10960_v30 = vshrl.u32 %v8405_v33, 16 }
  0x7e   : > { %v1141_v21 = vld [vmem:[#allocation2 + $0x32c] sm:$0xf]  ;;  %v966_v14 = vor.u32 %v965_v20, %v963_v26  ;;  %2063 = vrot.lane.b32.xlu1 %v7748_v2, %s8141_s14  ;;  %v7751_v50 = vld [vmem:[#allocation2 + $0x1c0] sm:$0xff]   ;;  %v10961_v62 = vshll.u32 %v8408_v34, 16  ;;  %v10962_v49 = vshrl.u32 %v8408_v34, 16 }
  0x7f   : > { %v969_v3 = vrot.slane %v10960_v30, 4  ;;  %v1142_v27 = vsel %vm8891_vm14, %v958_v17, %v1141_v21  ;;  %v964_v6 = vsel %vm8857_vm13, %v962_v23, %v963_v26  ;;  %v7755_v17 = vld [vmem:[#allocation2 + $0x1d4] sm:$0xff]   ;;  %v7769_v2 = vld [vmem:[%s10846_s1 + $0x68] sm:$0xff]   ;;  %v10964_v30 = vshrl.u32 %v8443_v5, 16 }
  0x80   : > { %v7750_v24 = vld [vmem:[#allocation2 + $0x300] sm:$0xff]   ;;  %1143 = vst [vmem:[#allocation2 + $0x32c] sm:$0xf] %v1142_v27  ;;  %v967_v47 = vrot.slane %v966_v14, 4  ;;  %v972_v39 = vrot.slane %v10961_v62, 5  ;;  %2257 = vrot.lane.b32.xlu0 %v7749_v22, %s8141_s14  ;;  %v974_v54 = vrot.slane %v10962_v49, 4  ;;  %7114 = vmatprep.subr.bf16.mxu0 %v7769_v2 }
  0x81   : > { %v970_v58 = vor.u32 %v969_v3, %v8954_v16  ;;  %1147 = vst.msk [vmem:[#allocation2 + $0x33c] sm:$0xf] %vm224_vm3, %v964_v6  ;;  %v313_v52 = vld [vmem:[#allocation2 + $0x354] sm:$0x8]  ;;  %v10963_v22 = vshll.u32 %v8443_v5, 16  ;;  %v7770_v14 = vld [vmem:[%s10846_s1 + $0x28] sm:$0xff]  }
  0x82   : > { %2065 = vrot.lane.b32.xlu1 %v7750_v24, %s8141_s14  ;;  %v314_v26 = vsel %vm8841_vm10, 0, %v313_v52  ;;  %v975_v21 = vor.u32 %v974_v54, %v972_v39  ;;  %v978_v3 = vrot.slane %v10964_v30, 4  ;;  %v10965_v27 = vshll.u32 %v8461_v36, 16  ;;  %7115 = vmatpush3.bf16.msra.mxu0 %v7770_v14  ;;  %v316_v49 = vld [vmem:[#allocation2 + $0x368] sm:$0x8]  ;;  %v7767_v52 = vld [vmem:[#allocation2 + $0x1fc] sm:$0xff]  }
  0x83   : > { %v7752_v33 = vld [vmem:[#allocation2 + $0x314] sm:$0xff]   ;;  %v971_v13 = vrot.slane %v970_v58, 4  ;;  %v8978_v18 = vrot.slane %v10963_v22, 5  ;;  %315 = vst [vmem:[#allocation2 + $0x354] sm:$0x8] %v314_v26  ;;  %v10966_v62 = vshrl.u32 %v8461_v36, 16 }
  0x84   : > { %v1148_v20 = vld [vmem:[#allocation2 + $0x340] sm:$0xf]  ;;  %2259 = vrot.lane.b32.xlu0 %v7751_v50, %s8141_s14  ;;  %v7761_v50 = vld [vmem:[#allocation2 + $0x1e8] sm:$0xff]   ;;  %v981_v6 = vrot.slane %v10965_v27, 5  ;;  %v7775_v36 = vld [vmem:[%s10846_s1 + $0x78] sm:$0xff]   ;;  %v10968_v30 = vshrl.u32 %v8487_v10, 16 }
  0x85   : > { %v1149_v34 = vsel %vm8891_vm14, %v967_v47, %v1148_v20  ;;  %v973_v23 = vsel %vm8857_vm13, %v971_v13, %v972_v39  ;;  %v7771_v47 = vld [vmem:[%s10846_s1 + $0x70] sm:$0xff]   ;;  %v979_v58 = vor.u32 %v978_v3, %v8978_v18  ;;  %v983_v5 = vrot.slane %v10966_v62, 4  ;;  %v7776_v2 = vld [vmem:[%s10846_s1 + $0x38] sm:$0xff]  }
  0x86   : > { %1150 = vst [vmem:[#allocation2 + $0x340] sm:$0xf] %v1149_v34  ;;  %2067 = vrot.lane.b32.xlu1 %v7752_v33, %s8141_s14  ;;  %1154 = vst.msk [vmem:[#allocation2 + $0x350] sm:$0xf] %vm224_vm3, %v973_v23  ;;  %v976_v39 = vrot.slane %v975_v21, 4  ;;  %v7772_v33 = vld [vmem:[%s10846_s1 + $0x30] sm:$0xff]   ;;  %7116 = vmatprep.subr.bf16.mxu0 %v7771_v47 }
  0x87   : > { %v7756_v24 = vld [vmem:[#allocation2 + $0x328] sm:$0xff]   ;;  %v980_v54 = vrot.slane %v979_v58, 4  ;;  %v317_v20 = vsel %vm8841_vm10, 0, %v316_v49  ;;  %v984_v26 = vor.u32 %v983_v5, %v981_v6  ;;  %7117 = vmatpush3.bf16.msra.mxu0 %v7772_v33  ;;  %v10967_v21 = vshll.u32 %v8487_v10, 16  ;;  %v319_v10 = vld [vmem:[#allocation2 + $0x37c] sm:$0x8] }
  0x88   : > { %2261 = vrot.lane.b32.xlu0 %v7755_v17, %s8141_s14  ;;  %318 = vst [vmem:[#allocation2 + $0x368] sm:$0x8] %v317_v20  ;;  %7118 = vmatprep.subr.bf16.mxu0 %v7775_v36  ;;  %v987_v3 = vrot.slane %v10968_v30, 4  ;;  %v10970_v58 = vshrl.u32 %v8490_v11, 16  ;;  %v10971_v5 = vshll.u32 %v8527_v38, 16  ;;  %v320_v49 = vsel %vm8841_vm10, 0, %v319_v10 }
  0x89   : > { %v982_v13 = vsel %vm8857_vm13, %v980_v54, %v981_v6  ;;  %v9021_v23 = vrot.slane %v10967_v21, 5  ;;  %v985_v14 = vrot.slane %v984_v26, 4  ;;  %v7773_v6 = vld [vmem:[#allocation2 + $0x210] sm:$0xff]   ;;  %v7779_v20 = vld [vmem:[#allocation2 + $0x224] sm:$0xff]   ;;  %321 = vst [vmem:[#allocation2 + $0x37c] sm:$0x8] %v320_v49 }
  0x8a   : > { %2069 = vrot.lane.b32.xlu1 %v7756_v24, %s8141_s14  ;;  %v1155_v17 = vld [vmem:[#allocation2 + $0x354] sm:$0xf]  ;;  %1161 = vst.msk [vmem:[#allocation2 + $0x364] sm:$0xf] %vm224_vm3, %v982_v13  ;;  %v9029_v24 = vld [vmem:[%s10846_s1 + $0x100] sm:$0xff]   ;;  %v992_v62 = vrot.slane %v10970_v58, 4 }
  0x8b   : > { %v1156_v34 = vsel %vm8891_vm14, %v976_v39, %v1155_v17  ;;  %7119 = vmatpush3.bf16.msra.mxu0 %v7776_v2  ;;  %v988_v47 = vor.u32 %v987_v3, %v9021_v23  ;;  %v9040_v39 = vrot.slane %v10971_v5, 5  ;;  %v322_v21 = vld [vmem:[#allocation2 + $0x390] sm:$0x8]  ;;  %v7783_v3 = vld [vmem:[#allocation2 + $0x238] sm:$0xff]   ;;  %v325_v58 = vld [vmem:[#allocation2 + $0x3a4] sm:$0x8] }
  0x8c   : > { %2263 = vrot.lane.b32.xlu0 %v7761_v50, %s8141_s14  ;;  %1157 = vst [vmem:[#allocation2 + $0x354] sm:$0xf] %v1156_v34  ;;  %v10969_v50 = vshll.u32 %v8490_v11, 16  ;;  %7592 = vmatprep.subr.bf16.mxu0 %v9029_v24  ;;  %v10972_v11 = vshrl.u32 %v8527_v38, 16  ;;  %v10974_v38 = vshrl.u32 %v8530_v63, 16  ;;  %v7787_v5 = vld [vmem:[#allocation2 + $0x24c] sm:$0xff]  }
  0x8d   : > { %v7762_v22 = vld [vmem:[#allocation2 + $0x33c] sm:$0xff]   ;;  %v989_v54 = vrot.slane %v988_v47, 4  ;;  %v10976_v49 = vshrl.u32 %v8549_v9, 16 }
  0x8e   : > { %2071 = vrot.lane.b32.xlu1 %v7762_v22, %s8141_s14  ;;  %v990_v27 = vrot.slane %v10969_v50, 5  ;;  %v996_v36 = vrot.slane %v10972_v11, 4  ;;  %v10973_v22 = vshll.u32 %v8530_v63, 16  ;;  %v323_v50 = vsel %vm8841_vm10, 0, %v322_v21 }
  0x8f   : > { %v1162_v33 = vld [vmem:[#allocation2 + $0x368] sm:$0xf]  ;;  %324 = vst [vmem:[#allocation2 + $0x390] sm:$0x8] %v323_v50  ;;  %v10980_v21 = vshrl.u32 %v8605_v55, 16 }
  0x90   : > { %2265 = vrot.lane.b32.xlu0 %v7767_v52, %s8141_s14  ;;  %v1163_v52 = vsel %vm8891_vm14, %v985_v14, %v1162_v33  ;;  %v993_v26 = vor.u32 %v992_v62, %v990_v27  ;;  %v991_v13 = vsel %vm8857_vm13, %v989_v54, %v990_v27  ;;  %v997_v2 = vor.u32 %v996_v36, %v9040_v39  ;;  %v1169_v63 = vld [vmem:[#allocation2 + $0x37c] sm:$0xf] }
  0x91   : > { %1164 = vst [vmem:[#allocation2 + $0x368] sm:$0xf] %v1163_v52  ;;  %1168 = vst.msk [vmem:[#allocation2 + $0x378] sm:$0xf] %vm224_vm3, %v991_v13  ;;  %v999_v34 = vrot.slane %v10973_v22, 5  ;;  %v1001_v14 = vrot.slane %v10974_v38, 4 }
  0x92   : > { %v994_v30 = vrot.slane %v993_v26, 4  ;;  %v10975_v62 = vshll.u32 %v8549_v9, 16  ;;  %v326_v33 = vsel %vm8841_vm10, 0, %v325_v58  ;;  %v1005_v54 = vrot.slane %v10976_v49, 4 }
  0x93   : > { %v7768_v17 = vld [vmem:[#allocation2 + $0x350] sm:$0xff]   ;;  %v1002_v27 = vor.u32 %v1001_v14, %v999_v34  ;;  %v10977_v52 = vshll.u32 %v8552_v43, 16  ;;  %327 = vst [vmem:[#allocation2 + $0x3a4] sm:$0x8] %v326_v33  ;;  %v10978_v36 = vshrl.u32 %v8552_v43, 16  ;;  %v10979_v9 = vshll.u32 %v8605_v55, 16 }
  0x94   : > { %2267 = vrot.lane.b32.xlu0 %v7773_v6, %s8141_s14  ;;  %2073 = vrot.lane.b32.xlu1 %v7768_v17, %s8141_s14  ;;  %v998_v6 = vrot.slane %v997_v2, 4  ;;  %v9065_v10 = vrot.slane %v10975_v62, 5  ;;  %v1170_v11 = vsel %vm8891_vm14, %v994_v30, %v1169_v63  ;;  %v1014_v38 = vrot.slane %v10980_v21, 4  ;;  %v7791_v30 = vld [vmem:[#allocation2 + $0x260] sm:$0xff]  }
  0x95   : > { %v1010_v17 = vrot.slane %v10978_v36, 4  ;;  %1171 = vst [vmem:[#allocation2 + $0x37c] sm:$0xf] %v1170_v11  ;;  %v1003_v13 = vrot.slane %v1002_v27, 4  ;;  %v9082_v22 = vrot.slane %v10979_v9, 5  ;;  %v10981_v27 = vshll.u32 %v8611_v37, 16 }
  0x96   : > { %v1000_v47 = vsel %vm8857_vm13, %v998_v6, %v999_v34  ;;  %v1006_v2 = vor.u32 %v1005_v54, %v9065_v10  ;;  %v1176_v43 = vld [vmem:[#allocation2 + $0x390] sm:$0xf]  ;;  %v328_v6 = vld [vmem:[#allocation2 + $0x3b8] sm:$0x8]  ;;  %v10982_v63 = vshrl.u32 %v8611_v37, 16  ;;  %v7794_v54 = vld [vmem:[%s10846_s1 + $0xc0] sm:$0xff]  }
  0x97   : > { %1175 = vst.msk [vmem:[#allocation2 + $0x38c] sm:$0xf] %vm224_vm3, %v1000_v47  ;;  %v1017_v47 = vrot.slane %v10981_v27, 5  ;;  %v1177_v58 = vsel %vm8891_vm14, %v1003_v13, %v1176_v43  ;;  %v329_v55 = vsel %vm8841_vm10, 0, %v328_v6  ;;  %7216 = vmatprep.subr.bf16.mxu1 %v7794_v54  ;;  %v10984_v13 = vshrl.u32 %v8635_v40, 16  ;;  %v7777_v9 = vld [vmem:[#allocation2 + $0x2d8] sm:$0xff]  }
  0x98   : > { %2269 = vrot.lane.b32.xlu0 %v7779_v20, %s8141_s14  ;;  %v1008_v20 = vrot.slane %v10977_v52, 5  ;;  %v7774_v26 = vld [vmem:[#allocation2 + $0x364] sm:$0xff]   ;;  %v1007_v14 = vrot.slane %v1006_v2, 4  ;;  %v1019_v33 = vrot.slane %v10982_v63, 4  ;;  %1178 = vst [vmem:[#allocation2 + $0x390] sm:$0xf] %v1177_v58 }
  0x99   : > { %2075 = vrot.lane.b32.xlu1 %v7774_v26, %s8141_s14  ;;  %330 = vst [vmem:[#allocation2 + $0x3b8] sm:$0x8] %v329_v55  ;;  %v10983_v26 = vshll.u32 %v8635_v40, 16  ;;  %v1023_v2 = vrot.slane %v10984_v13, 4  ;;  %v10986_v6 = vshrl.u32 %v8646_v61, 16  ;;  %v7780_v27 = vld [vmem:[#allocation2 + $0x8] sm:$0xff]  }
  0x9a   : > { %v1011_v34 = vor.u32 %v1010_v17, %v1008_v20  ;;  %v1009_v62 = vsel %vm8857_vm13, %v1007_v14, %v1008_v20  ;;  %v1183_v52 = vld [vmem:[#allocation2 + $0x3a4] sm:$0xf]  ;;  %v10985_v14 = vshll.u32 %v8646_v61, 16  ;;  %v7800_v63 = vld [vmem:[%s10846_s1 + $0xc8] sm:$0xff]   ;;  %v10988_v61 = vshrl.u32 %v8667_v48, 16 }
  0x9b   : > { %1182 = vst.msk [vmem:[#allocation2 + $0x3a0] sm:$0xf] %vm224_vm3, %v1009_v62  ;;  %v7795_v20 = vld [vmem:[%s10846_s1 + $0x80] sm:$0xff]   ;;  %v9108_v11 = vrot.slane %v10983_v26, 5  ;;  %v7802_v26 = vld [vmem:[%s10846_s1 + $0x88] sm:$0xff]  }
  0x9c   : > { %2271 = vrot.lane.b32.xlu0 %v7783_v3, %s8141_s14  ;;  %v1012_v50 = vrot.slane %v1011_v34, 4  ;;  %v1015_v3 = vor.u32 %v1014_v38, %v9082_v22  ;;  %v7781_v37 = vld [vmem:[#allocation2 + $0x378] sm:$0xff]   ;;  %7217 = vmatpush3.bf16.msra.mxu1 %v7795_v20  ;;  %v1026_v43 = vrot.slane %v10985_v14, 5  ;;  %v331_v20 = vld [vmem:[#allocation2 + $0x3cc] sm:$0x8] }
  0x9d   : > { %2077 = vrot.lane.b32.xlu1 %v7781_v37, %s8141_s14  ;;  %v1024_v21 = vor.u32 %v1023_v2, %v9108_v11  ;;  %v7798_v38 = vld [vmem:[#allocation2 + $0x274] sm:$0xff]   ;;  %7218 = vmatprep.subr.bf16.mxu1 %v7800_v63 }
  0x9e   : > { %v1016_v49 = vrot.slane %v1015_v3, 4  ;;  %v1184_v36 = vsel %vm8891_vm14, %v1012_v50, %v1183_v52  ;;  %v7782_v50 = vld [vmem:[#allocation2 + $0x2ec] sm:$0xff]   ;;  %v1028_v3 = vrot.slane %v10986_v6, 4  ;;  %v10989_v6 = vshll.u32 %v8693_v7, 16 }
  0x9f   : > { %1185 = vst [vmem:[#allocation2 + $0x3a4] sm:$0xf] %v1184_v36  ;;  %v1025_v40 = vrot.slane %v1024_v21, 4  ;;  %v332_v36 = vsel %vm8841_vm10, 0, %v331_v20  ;;  %v7808_v20 = vld [vmem:[%s10846_s1 + $0xd8] sm:$0xff]  }
  0xa0   : > { %2273 = vrot.lane.b32.xlu0 %v7787_v5, %s8141_s14  ;;  %v1020_v5 = vor.u32 %v1019_v33, %v1017_v47  ;;  %v1018_v17 = vsel %vm8857_vm13, %v1016_v49, %v1017_v47  ;;  %v10987_v47 = vshll.u32 %v8667_v48, 16  ;;  %v1190_v55 = vld [vmem:[#allocation2 + $0x3b8] sm:$0xf]  ;;  %v1032_v49 = vrot.slane %v10988_v61, 4  ;;  %v7797_v48 = vld [vmem:[%s10846_s1 + $0x108] sm:$0xff]   ;;  %7219 = vmatpush3.bf16.msra.mxu1 %v7802_v26  ;;  %v7786_v61 = vld [vmem:[#allocation2 + $0x300] sm:$0xff]  }
  0xa1   : > { %1189 = vst.msk [vmem:[#allocation2 + $0x3b4] sm:$0xf] %vm224_vm3, %v1018_v17  ;;  %v1027_v33 = vsel %vm8857_vm13, %v1025_v40, %v1026_v43  ;;  %v1029_v17 = vor.u32 %v1028_v3, %v1026_v43  ;;  %333 = vst [vmem:[#allocation2 + $0x3cc] sm:$0x8] %v332_v36  ;;  %v7784_v40 = vld [vmem:[#allocation2 + $0x1c] sm:$0xff]   ;;  %v7804_v43 = vld [vmem:[%s10846_s1 + $0x90] sm:$0xff]  }
  0xa2   : > { %v1021_v34 = vrot.slane %v1020_v5, 4  ;;  %v9127_v58 = vrot.slane %v10987_v47, 5  ;;  %1196 = vst.msk [vmem:[#allocation2 + $0x3c8] sm:$0xf] %vm224_vm3, %v1027_v33  ;;  %v1035_v3 = vrot.slane %v10989_v6, 5  ;;  %v10993_v36 = vshll.u32 %v8728_v31, 16 }
  0xa3   : > { %v334_v26 = vld [vmem:[#allocation2 + $0x3e0] sm:$0x8] }
  0xa4   : > { %2275 = vrot.lane.b32.xlu0 %v7791_v30, %s8141_s14  ;;  %v7785_v30 = vld [vmem:[#allocation2 + $0x38c] sm:$0xff]   ;;  %v1872_v62 = vpop.permute.xlu0 %1871  ;;  %v1191_v5 = vsel %vm8891_vm14, %v1021_v34, %v1190_v55  ;;  %v1033_v13 = vor.u32 %v1032_v49, %v9127_v58  ;;  %v10991_v55 = vshll.u32 %v8725_v59, 16  ;;  %v7812_v6 = vld [vmem:[%s10846_s1 + $0xa0] sm:$0xff]  }
  0xa5   : > { %v1874_v54 = vpop.permute.xlu1 %1873  ;;  %v2434_v52 = vsel %vm2367_vm15, %v7777_v9, %v1872_v62  ;;  %2079 = vrot.lane.b32.xlu1 %v7785_v30, %s8141_s14  ;;  %1192 = vst [vmem:[#allocation2 + $0x3b8] sm:$0xf] %v1191_v5  ;;  %v7803_v34 = vld [vmem:[%s10846_s1 + $0xd0] sm:$0xff]   ;;  %v10990_v30 = vshrl.u32 %v8693_v7, 16  ;;  %v10992_v7 = vshrl.u32 %v8725_v59, 16 }
  0xa6   : > { %2927 = vmatprep.mubr.bf16.mxu0 %v2434_v52  ;;  %v7789_v37 = vld [vmem:[#allocation2 + $0x3a0] sm:$0xff]   ;;  %v2438_v9 = vsel %vm2367_vm15, %v7782_v50, %v1874_v54  ;;  %v1034_v21 = vrot.slane %v1033_v13, 4  ;;  %v1030_v50 = vrot.slane %v1029_v17, 4  ;;  %7220 = vmatprep.subr.bf16.mxu1 %v7803_v34  ;;  %v9168_v63 = vrot.slane %v10991_v55, 5 }
  0xa7   : > { %v1037_v47 = vrot.slane %v10990_v30, 4  ;;  %7221 = vmatpush3.bf16.msra.mxu1 %v7804_v43  ;;  %v1041_v49 = vrot.slane %v10992_v7, 4  ;;  %v1044_v17 = vrot.slane %v10993_v36, 5  ;;  %v10994_v30 = vshrl.u32 %v8728_v31, 16  ;;  %v7816_v31 = vld [vmem:[%s10846_s1 + $0xe8] sm:$0xff]  }
  0xa8   : > { %2277 = vrot.lane.b32.xlu0 %v7798_v38, %s8141_s14  ;;  %v1680_v2 = vpop.permute.xlu0 %1679  ;;  %v1036_v62 = vsel %vm8857_vm13, %v1034_v21, %v1035_v3  ;;  %v1197_v5 = vld [vmem:[#allocation2 + $0x3cc] sm:$0xf]  ;;  %7222 = vmatprep.subr.bf16.mxu1 %v7808_v20 }
  0xa9   : > { %v1682_v38 = vpop.permute.xlu1 %1681  ;;  %v2370_v14 = vsel %vm2367_vm15, %v7780_v27, %v1680_v2  ;;  %2081 = vrot.lane.b32.xlu1 %v7789_v37, %s8141_s14  ;;  %v7806_v27 = vld [vmem:[#allocation2 + $0x288] sm:$0xff]   ;;  %1203 = vst.msk [vmem:[#allocation2 + $0x3dc] sm:$0xf] %vm224_vm3, %v1036_v62  ;;  %v1038_v52 = vor.u32 %v1037_v47, %v1035_v3  ;;  %v1042_v37 = vor.u32 %v1041_v49, %v9168_v63  ;;  %v335_v2 = vsel %vm8841_vm10, 0, %v334_v26  ;;  %v7790_v3 = vld [vmem:[#allocation2 + $0x314] sm:$0xff]  }
  0xaa   : > { %2928 = vmatmul.mubr.bf16.vlgmr.msra.gmra.mrb[0].mxu0 %v2370_v14  ;;  %v2374_v13 = vsel %vm2367_vm15, %v7784_v40, %v1682_v38  ;;  %v1198_v59 = vsel %vm8891_vm14, %v1030_v50, %v1197_v5  ;;  %336 = vst [vmem:[#allocation2 + $0x3e0] sm:$0x8] %v335_v2  ;;  %v7788_v40 = vld [vmem:[#allocation2 + $0x30] sm:$0xff]   ;;  %v1046_v47 = vrot.slane %v10994_v30, 4  ;;  %v10997_v5 = vshll.u32 %v8777_v60, 16 }
  0xab   : > { %7593 = vmatpush3.bf16.msra.mxu0 %v9029_v24  ;;  %2935 = vmatprep.mubr.bf16.mxu0 %v2438_v9  ;;  %v7810_v9 = vld [vmem:[%s10846_s1 + $0x98] sm:$0xff]   ;;  %1199 = vst [vmem:[#allocation2 + $0x3cc] sm:$0xf] %v1198_v59  ;;  %v1043_v38 = vrot.slane %v1042_v37, 4  ;;  %v1039_v43 = vrot.slane %v1038_v52, 4  ;;  %v10999_v30 = vshrl.u32 %v8790_v19, 16 }
  0xac   : > { %v1876_v33 = vpop.permute.xlu0 %1875  ;;  %7594 = vmatprep.subr.bf16.mxu0 %v7797_v48  ;;  %v7793_v24 = vld [vmem:[#allocation2 + $0x3b4] sm:$0xff]   ;;  %2279 = vrot.lane.b32.xlu0 %v7806_v27, %s8141_s14  ;;  %v10995_v27 = vshll.u32 %v8774_v25, 16  ;;  %v1053_v20 = vrot.slane %v10997_v5, 5 }
  0xad   : > { %v1684_v54 = vpop.permute.xlu1 %1683  ;;  %2083 = vrot.lane.b32.xlu1 %v7793_v24, %s8141_s14  ;;  %v2442_v21 = vsel %vm2367_vm15, %v7786_v61, %v1876_v33  ;;  %7223 = vmatpush3.bf16.msra.mxu1 %v7810_v9  ;;  %v1045_v50 = vsel %vm8857_vm13, %v1043_v38, %v1044_v17  ;;  %v7814_v33 = vld [vmem:[#allocation2 + $0x29c] sm:$0xff]   ;;  %v10996_v61 = vshrl.u32 %v8774_v25, 16  ;;  %v337_v24 = vld [vmem:[#allocation2 + $0x3f4] sm:$0x8]  ;;  %v7792_v38 = vld [vmem:[#allocation2 + $0x44] sm:$0xff]  }
  0xae   : > { %v9202_v62 = vrot.slane %v10995_v27, 5  ;;  %1210 = vst.msk [vmem:[#allocation2 + $0x3f0] sm:$0xf] %vm224_vm3, %v1045_v50  ;;  %v2378_v26 = vsel %vm2367_vm15, %v7788_v40, %v1684_v54  ;;  %v338_v36 = vsel %vm8841_vm10, 0, %v337_v24  ;;  %v7820_v40 = vld [vmem:[%s10846_s1 + $0xb0] sm:$0xff]  }
  0xaf   : > { %7595 = vmatpush3.bf16.msra.mxu0 %v7797_v48  ;;  %v7811_v48 = vld [vmem:[%s10846_s1 + $0xe0] sm:$0xff]   ;;  %v1050_v7 = vrot.slane %v10996_v61, 4  ;;  %339 = vst [vmem:[#allocation2 + $0x3f4] sm:$0x8] %v338_v36  ;;  %v11000_v61 = vshrl.u32 %v8777_v60, 16 }
  0xb0   : > { %v1878_v34 = vpop.permute.xlu0 %1877  ;;  %7224 = vmatprep.subr.bf16.mxu1 %v7811_v48  ;;  %2281 = vrot.lane.b32.xlu0 %v7814_v33, %s8141_s14  ;;  %v7822_v33 = vld [vmem:[#allocation2 + $0x2b0] sm:$0xff]  }
  0xb1   : > { %v1686_v14 = vpop.permute.xlu1 %1685  ;;  %7225 = vmatpush3.bf16.msra.mxu1 %v7812_v6  ;;  %v1051_v52 = vor.u32 %v1050_v7, %v9202_v62  ;;  %v1204_v25 = vld [vmem:[#allocation2 + $0x3e0] sm:$0xf]  ;;  %v2446_v2 = vsel %vm2367_vm15, %v7790_v3, %v1878_v34  ;;  %v7796_v34 = vld [vmem:[#allocation2 + $0x328] sm:$0xff]   ;;  %v10998_v6 = vshll.u32 %v8790_v19, 16  ;;  %v1055_v7 = vrot.slane %v11000_v61, 4 }
  0xb2   : > { %2936 = vmatmul.mubr.bf16.gmra.mrb[4].mxu0 %v2374_v13  ;;  %v7801_v37 = vld [vmem:[#allocation2 + $0x3c8] sm:$0xff]   ;;  %v1047_v13 = vor.u32 %v1046_v47, %v1044_v17  ;;  %v1205_v9 = vsel %vm8891_vm14, %v1039_v43, %v1204_v25  ;;  %7226 = vmatprep.subr.bf16.mxu1 %v7816_v31  ;;  %v7819_v17 = vld [vmem:[%s10846_s1 + $0xf0] sm:$0xff]   ;;  %v1059_v47 = vrot.slane %v10999_v30, 4  ;;  %v11001_v19 = vshll.u32 %v8793_v45, 16  ;;  %v343_v61 = vld [vmem:[#allocation2 + $0x41c] sm:$0x8] }
  0xb3   : > { %2943 = vmatprep.mubr.bf16.mxu0 %v2442_v21  ;;  %v7818_v21 = vld [vmem:[%s10846_s1 + $0xa8] sm:$0xff]   ;;  %v1052_v54 = vrot.slane %v1051_v52, 4  ;;  %2085 = vrot.lane.b32.xlu1 %v7801_v37, %s8141_s14  ;;  %1206 = vst [vmem:[#allocation2 + $0x3e0] sm:$0xf] %v1205_v9  ;;  %v9240_v3 = vrot.slane %v10998_v6, 5  ;;  %v7824_v52 = vld [vmem:[%s10846_s1 + $0xf8] sm:$0xff]  }
  0xb4   : > { %v1880_v55 = vpop.permute.xlu0 %1879  ;;  %v1048_v50 = vrot.slane %v1047_v13, 4  ;;  %2283 = vrot.lane.b32.xlu0 %v7822_v33, %s8141_s14  ;;  %v1062_v5 = vrot.slane %v11001_v19, 5  ;;  %v340_v25 = vld [vmem:[#allocation2 + $0x408] sm:$0x8]  ;;  %v7830_v6 = vld [vmem:[%s10846_s1 + $0x110] sm:$0xff]  }
  0xb5   : > { %v9207_v49 = vpop.permute.xlu1 %1687  ;;  %7227 = vmatpush3.bf16.msra.mxu1 %v7818_v21  ;;  %v1054_v43 = vsel %vm8857_vm13, %v1052_v54, %v1053_v20  ;;  %v1060_v24 = vor.u32 %v1059_v47, %v9240_v3  ;;  %v2450_v36 = vsel %vm2367_vm15, %v7796_v34, %v1880_v55  ;;  %v341_v9 = vsel %vm8841_vm10, 0, %v340_v25  ;;  %v7799_v55 = vld [vmem:[#allocation2 + $0x58] sm:$0xff]   ;;  %v7831_v47 = vld [vmem:[#allocation2 + $0x2c4] sm:$0xff]   ;;  %7596 = vmatprep.subr.bf16.mxu0 %v7830_v6  ;;  %v7807_v25 = vld [vmem:[#allocation2 + $0x6c] sm:$0xff]  }
  0xb6   : > { %7228 = vmatprep.subr.bf16.mxu1 %v7819_v17  ;;  %1217 = vst.msk [vmem:[#allocation2 + $0x404] sm:$0xf] %vm224_vm3, %v1054_v43  ;;  %v1211_v37 = vld [vmem:[#allocation2 + $0x3f4] sm:$0xf]  ;;  %v1056_v21 = vor.u32 %v1055_v7, %v1053_v20  ;;  %342 = vst [vmem:[#allocation2 + $0x408] sm:$0x8] %v341_v9  ;;  %v2386_v33 = vsel %vm2367_vm15, %v7799_v55, %v9207_v49  ;;  %7597 = vmatpush3.bf16.msra.mxu0 %v7830_v6 }
  0xb7   : > { %v7805_v20 = vld [vmem:[#allocation2 + $0x33c] sm:$0xff]  }
  0xb8   : > { %2285 = vrot.lane.b32.xlu0 %v7831_v47, %s8141_s14 }
  0xb9   : > { %v9219_v59 = vpop.permute.xlu0 %1881  ;;  %v9227_v48 = vpop.permute.xlu1 %1689  ;;  %7229 = vmatpush3.bf16.msra.mxu1 %v7820_v40  ;;  %v1057_v40 = vrot.slane %v1056_v21, 4 }
  0xba   : > { %2944 = vmatmul.mubr.bf16.gmra.mrb[8].mxu0 %v2378_v26  ;;  %v2382_v26 = vsel %vm2367_vm15, %v7792_v38, %v1686_v14  ;;  %v7809_v13 = vld [vmem:[#allocation2 + $0x3dc] sm:$0xff]   ;;  %7230 = vmatprep.subr.bf16.mxu1 %v7824_v52  ;;  %v1061_v38 = vrot.slane %v1060_v24, 4  ;;  %v2454_v24 = vsel %vm2367_vm15, %v7805_v20, %v9219_v59  ;;  %v7813_v59 = vld [vmem:[#allocation2 + $0x350] sm:$0xff]   ;;  %v2390_v9 = vsel %vm2367_vm15, %v7807_v25, %v9227_v48 }
  0xbb   : > { %2951 = vmatprep.mubr.bf16.mxu0 %v2446_v2  ;;  %v1212_v2 = vsel %vm8891_vm14, %v1048_v50, %v1211_v37  ;;  %v7826_v14 = vld [vmem:[%s10846_s1 + $0xb8] sm:$0xff]   ;;  %2087 = vrot.lane.b32.xlu1 %v7809_v13, %s8141_s14  ;;  %v11002_v50 = vshrl.u32 %v8793_v45, 16  ;;  %v7815_v20 = vld [vmem:[#allocation2 + $0x80] sm:$0xff]  }
  0xbc   : > { %1213 = vst [vmem:[#allocation2 + $0x3f4] sm:$0xf] %v1212_v2  ;;  %v1063_v17 = vsel %vm8857_vm13, %v1061_v38, %v1062_v5 }
  0xbd   : > { %v9245_v27 = vpop.permute.xlu0 %1883  ;;  %v9249_v31 = vpop.permute.xlu1 %1691  ;;  %7231 = vmatpush3.bf16.msra.mxu1 %v7826_v14  ;;  %1224 = vst.msk [vmem:[#allocation2 + $0x418] sm:$0xf] %vm224_vm3, %v1063_v17  ;;  %v1064_v30 = vrot.slane %v11002_v50, 4  ;;  %v1218_v19 = vld [vmem:[#allocation2 + $0x408] sm:$0xf] }
  0xbe   : > { %v1219_v37 = vsel %vm8891_vm14, %v1057_v40, %v1218_v19  ;;  %v2458_v21 = vsel %vm2367_vm15, %v7813_v59, %v9245_v27  ;;  %v7821_v40 = vld [vmem:[#allocation2 + $0x364] sm:$0xff]   ;;  %v2394_v27 = vsel %vm2367_vm15, %v7815_v20, %v9249_v31  ;;  %v7837_v20 = vld [vmem:[#allocation2 + $0xbc] sm:$0xff]  }
  0xbf   : > { %v1065_v49 = vor.u32 %v1064_v30, %v1062_v5  ;;  %1220 = vst [vmem:[#allocation2 + $0x408] sm:$0xf] %v1219_v37  ;;  %v7832_v37 = vld [vmem:[#allocation2 + $0xa8] sm:$0xff]  }
  0xc1   : > { %v9259_v60 = vpop.permute.xlu0 %1885  ;;  %v9266_v54 = vpop.permute.xlu1 %1693  ;;  %v1066_v2 = vrot.slane %v1065_v49, 4  ;;  %v7836_v49 = vld [vmem:[#allocation2 + $0x38c] sm:$0xff]  }
  0xc2   : > { %2952 = vmatmul.mubr.bf16.gmra.mrb[12].mxu0 %v2382_v26  ;;  %v344_v26 = vsel %vm8841_vm10, 0, %v343_v61  ;;  %v2462_v50 = vsel %vm2367_vm15, %v7821_v40, %v9259_v60 }
  0xc3   : > { %2959 = vmatprep.mubr.bf16.mxu0 %v2450_v36  ;;  %v7817_v52 = vld [vmem:[#allocation2 + $0x3f0] sm:$0xff]   ;;  %345 = vst [vmem:[#allocation2 + $0x41c] sm:$0x8] %v344_v26 }
  0xc4   : > { %2089 = vrot.lane.b32.xlu1 %v7817_v52, %s8141_s14  ;;  %v7829_v52 = vld [vmem:[#allocation2 + $0x378] sm:$0xff]  }
  0xc5   : > { %v9277_v43 = vpop.permute.xlu1 %1695 }
  0xc6   : > { %v7825_v38 = vld [vmem:[#allocation2 + $0x404] sm:$0xff]  }
  0xc7   : > { %v9274_v34 = vpop.permute.xlu0 %1887 }
  0xc8   : > { %2091 = vrot.lane.b32.xlu1 %v7825_v38, %s8141_s14  ;;  %v2466_v26 = vsel %vm2367_vm15, %v7829_v52, %v9274_v34  ;;  %v7834_v34 = vld [vmem:[#allocation2 + $0x44] sm:$0xff]  }
  0xc9   : > { %v9291_v45 = vpop.permute.xlu1 %1697 }
  0xca   : > { %2960 = vmatmul.mubr.bf16.gmra.mrb[16].mxu0 %v2386_v33  ;;  %v1225_v14 = vld [vmem:[#allocation2 + $0x41c] sm:$0xf] }
  0xcb   : > { %v1890_v7 = vpop.permute.xlu0 %1889  ;;  %2967 = vmatprep.mubr.bf16.mxu0 %v2454_v24  ;;  %v1226_v55 = vsel %vm8891_vm14, %v1066_v2, %v1225_v14  ;;  %v7849_v33 = vld [vmem:[%s10846_s1 + $0x118] sm:$0xff]   ;;  %v7827_v2 = vld [vmem:[#allocation2 + $0x30] sm:$0xff]  }
  0xcc   : > { %1227 = vst [vmem:[#allocation2 + $0x41c] sm:$0xf] %v1226_v55  ;;  %v7823_v24 = vld [vmem:[#allocation2 + $0x94] sm:$0xff]   ;;  %7598 = vmatprep.subr.bf16.mxu0 %v7849_v33  ;;  %v2470_v14 = vsel %vm2367_vm15, %v7836_v49, %v1890_v7  ;;  %v2406_v7 = vsel %vm2367_vm15, %v7837_v20, %v9291_v45  ;;  %v7848_v20 = vld [vmem:[#allocation2 + $0x3c8] sm:$0xff]  }
  0xcd   : > { %v9298_v13 = vpop.permute.xlu1 %1699  ;;  %7599 = vmatpush3.bf16.msra.mxu0 %v7849_v33  ;;  %v2398_v19 = vsel %vm2367_vm15, %v7823_v24, %v9266_v54  ;;  %v7838_v24 = vld [vmem:[#allocation2 + $0x58] sm:$0xff]   ;;  %v7841_v49 = vld [vmem:[#allocation2 + $0xd0] sm:$0xff]  }
  0xce   : > { %v2410_v45 = vsel %vm2367_vm15, %v7841_v49, %v9298_v13  ;;  %v7854_v49 = vld [vmem:[#allocation2 + $0x10c] sm:$0xff]  }
  0xcf   : > { %v9296_v36 = vpop.permute.xlu0 %1891 }
  0xd2   : > { %v9304_v5 = vpop.permute.xlu1 %1701  ;;  %2968 = vmatmul.mubr.bf16.gmra.mrb[20].mxu0 %v2390_v9  ;;  %v2402_v9 = vsel %vm2367_vm15, %v7832_v37, %v9277_v43  ;;  %v7835_v43 = vld [vmem:[#allocation2 + $0x198] sm:$0xff]  }
  0xd3   : > { %2975 = vmatprep.mubr.bf16.mxu0 %v2458_v21  ;;  %v7833_v47 = vld [vmem:[#allocation2 + $0x418] sm:$0xff]   ;;  %v7828_v21 = vld [vmem:[#allocation2 + $0x184] sm:$0xff]  }
  0xd4   : > { %2093 = vrot.lane.b32.xlu1 %v7833_v47, %s8141_s14 }
  0xd6   : > { %v9308_v17 = vpop.permute.xlu0 %1893  ;;  %v9311_v48 = vpop.permute.xlu1 %1703 }
  0xda   : > { %v9319_v30 = vpop.permute.xlu1 %1705  ;;  %2976 = vmatmul.mubr.bf16.gmra.mrb[24].mxu0 %v2394_v27  ;;  %v7840_v27 = vld [vmem:[#allocation2 + $0x3a0] sm:$0xff]  }
  0xdb   : > { %v9313_v6 = vpop.permute.xlu0 %1895  ;;  %2983 = vmatprep.mubr.bf16.mxu0 %v2462_v50  ;;  %v2474_v52 = vsel %vm2367_vm15, %v7840_v27, %v9296_v36 }
  0xde   : > { %v9329_v60 = vpop.permute.xlu1 %1707 }
  0xdf   : > { %v9324_v61 = vpop.permute.xlu0 %1897 }
  0xe2   : > { %2984 = vmatmul.mubr.bf16.gmra.mrb[28].mxu0 %v2398_v19  ;;  %v9337_v59 = vpop.permute.xlu1 %1709 }
  0xe3   : > { %2991 = vmatprep.mubr.bf16.mxu0 %v2466_v26 }
  0xe5   : > { %v9327_v31 = vpop.permute.xlu0 %1899 }
  0xea   : > { %v9335_v25 = vpop.permute.xlu0 %1901  ;;  %2992 = vmatmul.mubr.bf16.gmra.mrb[32].mxu0 %v2402_v9  ;;  %v7839_v9 = vld [vmem:[#allocation2 + $0x1ac] sm:$0xff]  }
  0xeb   : > { %2999 = vmatprep.mubr.bf16.mxu0 %v2470_v14  ;;  %v7842_v14 = vld [vmem:[#allocation2 + $0x6c] sm:$0xff]  }
  0xee   : > { %v2256_v38 = vpop.permute.xlu0 %2255 }
  0xef   : > { %v2562_v54 = vsel %vm2367_vm15, %v7827_v2, %v2256_v38  ;;  %v7844_v2 = vld [vmem:[#allocation2 + $0x3b4] sm:$0xff]  }
  0xf0   : > { %v2064_v55 = vpop.permute.xlu1 %2063  ;;  %3088 = vmatprep.mubr.bf16.mxu1 %v2562_v54  ;;  %v2478_v36 = vsel %vm2367_vm15, %v7844_v2, %v9308_v17  ;;  %v2482_v17 = vsel %vm2367_vm15, %v7848_v20, %v9313_v6 }
  0xf1   : > { %v2498_v40 = vsel %vm2367_vm15, %v7828_v21, %v2064_v55  ;;  %v7845_v55 = vld [vmem:[#allocation2 + $0xe4] sm:$0xff]  }
  0xf2   : > { %3089 = vmatmul.mubr.bf16.vlgmr.msra.gmra.mrb[0].mxu1 %v2498_v40  ;;  %v2258_v50 = vpop.permute.xlu0 %2257  ;;  %3000 = vmatmul.mubr.bf16.gmra.mrb[36].mxu0 %v2406_v7  ;;  %v7843_v40 = vld [vmem:[#allocation2 + $0x1c0] sm:$0xff]   ;;  %v2414_v13 = vsel %vm2367_vm15, %v7845_v55, %v9304_v5  ;;  %v7850_v7 = vld [vmem:[#allocation2 + $0xf8] sm:$0xff]  }
  0xf3   : > { %v2566_v47 = vsel %vm2367_vm15, %v7834_v34, %v2258_v50  ;;  %3007 = vmatprep.mubr.bf16.mxu0 %v2474_v52  ;;  %v7846_v50 = vld [vmem:[#allocation2 + $0x80] sm:$0xff]   ;;  %v7847_v52 = vld [vmem:[#allocation2 + $0x1d4] sm:$0xff]   ;;  %v2418_v5 = vsel %vm2367_vm15, %v7850_v7, %v9311_v48  ;;  %v2422_v48 = vsel %vm2367_vm15, %v7854_v49, %v9319_v30 }
  0xf4   : > { %v2066_v33 = vpop.permute.xlu1 %2065  ;;  %3096 = vmatprep.mubr.bf16.mxu1 %v2566_v47  ;;  %v7861_v55 = vld [vmem:[#allocation2 + $0x404] sm:$0xff]   ;;  %v7863_v7 = vld [vmem:[#allocation2 + $0xd0] sm:$0xff]  }
  0xf5   : > { %v2502_v26 = vsel %vm2367_vm15, %v7835_v43, %v2066_v33  ;;  %v7867_v49 = vld [vmem:[#allocation2 + $0xe4] sm:$0xff]  }
  0xf6   : > { %v2260_v19 = vpop.permute.xlu0 %2259 }
  0xf7   : > { %v2570_v37 = vsel %vm2367_vm15, %v7838_v24, %v2260_v19  ;;  %v7853_v24 = vld [vmem:[#allocation2 + $0x3dc] sm:$0xff]  }
  0xf8   : > { %v2068_v21 = vpop.permute.xlu1 %2067  ;;  %v2486_v6 = vsel %vm2367_vm15, %v7853_v24, %v9324_v61  ;;  %v7865_v24 = vld [vmem:[#allocation2 + $0x300] sm:$0xff]  }
  0xf9   : > { %v2506_v54 = vsel %vm2367_vm15, %v7839_v9, %v2068_v21  ;;  %v7857_v9 = vld [vmem:[#allocation2 + $0x3f0] sm:$0xff]  }
  0xfa   : > { %3097 = vmatmul.mubr.bf16.gmra.mrb[4].mxu1 %v2502_v26  ;;  %v2262_v38 = vpop.permute.xlu0 %2261  ;;  %3008 = vmatmul.mubr.bf16.gmra.mrb[40].mxu0 %v2410_v45  ;;  %v7851_v26 = vld [vmem:[#allocation2 + $0x94] sm:$0xff]   ;;  %v7852_v45 = vld [vmem:[#allocation2 + $0x1e8] sm:$0xff]   ;;  %v2490_v61 = vsel %vm2367_vm15, %v7857_v9, %v9327_v31  ;;  %v2494_v31 = vsel %vm2367_vm15, %v7861_v55, %v9335_v25 }
  0xfb   : > { %3104 = vmatprep.mubr.bf16.mxu1 %v2570_v37  ;;  %v2574_v34 = vsel %vm2367_vm15, %v7842_v14, %v2262_v38  ;;  %3015 = vmatprep.mubr.bf16.mxu0 %v2478_v36  ;;  %v7855_v14 = vld [vmem:[#allocation2 + $0xa8] sm:$0xff]  }
  0xfc   : > { %v2070_v27 = vpop.permute.xlu1 %2069  ;;  %v7872_v55 = vld [vmem:[#allocation2 + $0x24c] sm:$0xff]  }
  0xfd   : > { %v2510_v43 = vsel %vm2367_vm15, %v7843_v40, %v2070_v27  ;;  %v7856_v40 = vld [vmem:[#allocation2 + $0x1fc] sm:$0xff]  }
  0xfe   : > { %v2264_v47 = vpop.permute.xlu0 %2263  ;;  %v7859_v27 = vld [vmem:[#allocation2 + $0xbc] sm:$0xff]  }
  0xff   : > { %v2578_v33 = vsel %vm2367_vm15, %v7846_v50, %v2264_v47  ;;  %v7862_v47 = vld [vmem:[#allocation2 + $0x134] sm:$0xff]  }
 0x100   : > { %v2072_v19 = vpop.permute.xlu1 %2071 }
 0x101   : > { %v2514_v2 = vsel %vm2367_vm15, %v7847_v52, %v2072_v19 }
 0x102   : > { %3105 = vmatmul.mubr.bf16.gmra.mrb[8].mxu1 %v2506_v54  ;;  %3016 = vmatmul.mubr.bf16.gmra.mrb[44].mxu0 %v2414_v13  ;;  %v2266_v37 = vpop.permute.xlu0 %2265  ;;  %v7858_v54 = vld [vmem:[#allocation2 + $0x120] sm:$0xff]  }
 0x103   : > { %3112 = vmatprep.mubr.bf16.mxu1 %v2574_v34  ;;  %3023 = vmatprep.mubr.bf16.mxu0 %v2482_v17  ;;  %v2582_v21 = vsel %vm2367_vm15, %v7851_v26, %v2266_v37  ;;  %v2426_v30 = vsel %vm2367_vm15, %v7858_v54, %v9329_v60  ;;  %v2430_v60 = vsel %vm2367_vm15, %v7862_v47, %v9337_v59  ;;  %v7864_v26 = vld [vmem:[#allocation2 + $0x224] sm:$0xff]   ;;  %v7866_v37 = vld [vmem:[#allocation2 + $0x314] sm:$0xff]  }
 0x104   : > { %v7876_v47 = vld [vmem:[#allocation2 + $0x260] sm:$0xff]  }
 0x106   : > { %v2074_v38 = vpop.permute.xlu1 %2073  ;;  %v2268_v36 = vpop.permute.xlu0 %2267 }
 0x107   : > { %v2518_v34 = vsel %vm2367_vm15, %v7852_v45, %v2074_v38  ;;  %v2586_v20 = vsel %vm2367_vm15, %v7855_v14, %v2268_v36  ;;  %v7868_v45 = vld [vmem:[#allocation2 + $0x238] sm:$0xff]   ;;  %v7873_v36 = vld [vmem:[#allocation2 + $0x350] sm:$0xff]  }
 0x108   : > { %v7870_v14 = vld [vmem:[#allocation2 + $0x33c] sm:$0xff]  }
 0x10a   : > { %3113 = vmatmul.mubr.bf16.gmra.mrb[12].mxu1 %v2510_v43  ;;  %3024 = vmatmul.mubr.bf16.gmra.mrb[48].mxu0 %v2418_v5  ;;  %v2270_v50 = vpop.permute.xlu0 %2269 }
 0x10b   : > { %3120 = vmatprep.mubr.bf16.mxu1 %v2578_v33  ;;  %3031 = vmatprep.mubr.bf16.mxu0 %v2486_v6  ;;  %v2076_v13 = vpop.permute.xlu1 %2075  ;;  %v2590_v43 = vsel %vm2367_vm15, %v7859_v27, %v2270_v50  ;;  %v7860_v33 = vld [vmem:[#allocation2 + $0x210] sm:$0xff]  }
 0x10c   : > { %v2522_v17 = vsel %vm2367_vm15, %v7856_v40, %v2076_v13  ;;  %v7875_v27 = vld [vmem:[#allocation2 + $0x10c] sm:$0xff]   ;;  %v7877_v13 = vld [vmem:[#allocation2 + $0x378] sm:$0xff]  }
 0x10e   : > { %v2272_v19 = vpop.permute.xlu0 %2271 }
 0x10f   : > { %v2078_v52 = vpop.permute.xlu1 %2077  ;;  %v2594_v25 = vsel %vm2367_vm15, %v7863_v7, %v2272_v19  ;;  %v7881_v7 = vld [vmem:[#allocation2 + $0x3a0] sm:$0xff]   ;;  %v7880_v19 = vld [vmem:[#allocation2 + $0x274] sm:$0xff]  }
 0x110   : > { %v2526_v5 = vsel %vm2367_vm15, %v7860_v33, %v2078_v52  ;;  %v7879_v33 = vld [vmem:[#allocation2 + $0x120] sm:$0xff]  }
 0x112   : > { %3121 = vmatmul.mubr.bf16.gmra.mrb[16].mxu1 %v2514_v2  ;;  %3032 = vmatmul.mubr.bf16.gmra.mrb[52].mxu0 %v2422_v48  ;;  %v7869_v2 = vld [vmem:[#allocation2 + $0x328] sm:$0xff]   ;;  %v2274_v9 = vpop.permute.xlu0 %2273  ;;  %v7871_v48 = vld [vmem:[#allocation2 + $0xf8] sm:$0xff]  }
 0x113   : > { %3128 = vmatprep.mubr.bf16.mxu1 %v2582_v21  ;;  %3039 = vmatprep.mubr.bf16.mxu0 %v2490_v61  ;;  %v2598_v59 = vsel %vm2367_vm15, %v7867_v49, %v2274_v9  ;;  %v7884_v9 = vld [vmem:[#allocation2 + $0x288] sm:$0xff]  }
 0x116   : > { %v2276_v61 = vpop.permute.xlu0 %2275 }
 0x117   : > { %v2080_v6 = vpop.permute.xlu1 %2079 }
 0x118   : > { %v2530_v21 = vsel %vm2367_vm15, %v7864_v26, %v2080_v6  ;;  %v7883_v26 = vld [vmem:[#allocation2 + $0x134] sm:$0xff]  }
 0x11a   : > { %3129 = vmatmul.mubr.bf16.gmra.mrb[20].mxu1 %v2518_v34  ;;  %3040 = vmatmul.mubr.bf16.gmra.mrb[56].mxu0 %v2426_v30  ;;  %v2602_v34 = vsel %vm2367_vm15, %v7871_v48, %v2276_v61  ;;  %v2278_v30 = vpop.permute.xlu0 %2277  ;;  %v7888_v61 = vld [vmem:[#allocation2 + $0x29c] sm:$0xff]  }
 0x11b   : > { %3136 = vmatprep.mubr.bf16.mxu1 %v2586_v20  ;;  %3047 = vmatprep.mubr.bf16.mxu0 %v2494_v31  ;;  %v2082_v38 = vpop.permute.xlu1 %2081  ;;  %v7874_v20 = vld [vmem:[#allocation2 + $0x364] sm:$0xff]   ;;  %v2606_v31 = vsel %vm2367_vm15, %v7875_v27, %v2278_v30  ;;  %v7892_v30 = vld [vmem:[#allocation2 + $0x2b0] sm:$0xff]  }
 0x11c   : > { %v2534_v54 = vsel %vm2367_vm15, %v7868_v45, %v2082_v38  ;;  %v7887_v45 = vld [vmem:[#allocation2 + $0x148] sm:$0xff]  }
 0x11f   : > { %v2084_v40 = vpop.permute.xlu1 %2083 }
 0x120   : > { %v2538_v50 = vsel %vm2367_vm15, %v7872_v55, %v2084_v40  ;;  %v7891_v55 = vld [vmem:[#allocation2 + $0x15c] sm:$0xff]  }
 0x122   : > { %3137 = vmatmul.mubr.bf16.gmra.mrb[24].mxu1 %v2522_v17  ;;  %3048 = vmatmul.mubr.bf16.gmra.mrb[60].mxu0 %v2430_v60  ;;  %v7878_v17 = vld [vmem:[#allocation2 + $0x38c] sm:$0xff]  }
 0x123   : > { %3144 = vmatprep.mubr.bf16.mxu1 %v2590_v43  ;;  %7600 = vmatprep.mubr.msk.bf16.mxu0 %vm2367_vm15, %v7865_v24  ;;  %v2280_v24 = vpop.permute.xlu0 %2279 }
 0x124   : > { %v2610_v60 = vsel %vm2367_vm15, %v7879_v33, %v2280_v24 }
 0x125   : > { %v2086_v43 = vpop.permute.xlu1 %2085 }
 0x126   : > { %v2542_v52 = vsel %vm2367_vm15, %v7876_v47, %v2086_v43 }
 0x127   : > { %v2282_v6 = vpop.permute.xlu0 %2281 }
 0x12a   : > { %3145 = vmatmul.mubr.bf16.gmra.mrb[28].mxu1 %v2526_v5  ;;  %7601 = vmatmul.mubr.msk.bf16.vlgmr.msra.gmra.mrb[64].mxu0 %vm2367_vm15, %v7866_v37  ;;  %v7882_v5 = vld [vmem:[#allocation2 + $0x3b4] sm:$0xff]   ;;  %v7885_v37 = vld [vmem:[#allocation2 + $0x3c8] sm:$0xff]  }
 0x12b   : > { %3152 = vmatprep.mubr.bf16.mxu1 %v2594_v25  ;;  %7604 = vmatprep.mubr.msk.bf16.mxu0 %vm2367_vm15, %v7869_v2  ;;  %v2614_v2 = vsel %vm2367_vm15, %v7883_v26, %v2282_v6  ;;  %v2284_v38 = vpop.permute.xlu0 %2283 }
 0x12d   : > { %v2088_v25 = vpop.permute.xlu1 %2087 }
 0x12e   : > { %v2546_v49 = vsel %vm2367_vm15, %v7880_v19, %v2088_v25  ;;  %v1115_v25 = vld [vmem:[#allocation2 + $0x2e8] sm:$0x8] }
 0x12f   : > { %v2286_v40 = vpop.permute.xlu0 %2285 }
 0x132   : > { %3153 = vmatmul.mubr.bf16.gmra.mrb[32].mxu1 %v2530_v21  ;;  %7605 = vmatmul.mubr.msk.bf16.gmra.mrb[68].mxu0 %vm2367_vm15, %v7870_v14  ;;  %v7886_v21 = vld [vmem:[#allocation2 + $0x3dc] sm:$0xff]   ;;  %v7889_v14 = vld [vmem:[#allocation2 + $0x3f0] sm:$0xff]  }
 0x133   : > { %3160 = vmatprep.mubr.bf16.mxu1 %v2598_v59  ;;  %7608 = vmatprep.mubr.msk.bf16.mxu0 %vm2367_vm15, %v7873_v36  ;;  %v2618_v36 = vsel %vm2367_vm15, %v7887_v45, %v2284_v38 }
 0x136   : > { %v2090_v59 = vpop.permute.xlu1 %2089 }
 0x137   : > { %v2550_v48 = vsel %vm2367_vm15, %v7884_v9, %v2090_v59  ;;  %v468_v59 = vrot.slane %v8304_v29, 4 }
 0x13a   : > { %3161 = vmatmul.mubr.bf16.gmra.mrb[36].mxu1 %v2534_v54  ;;  %7609 = vmatmul.mubr.msk.bf16.gmra.mrb[72].mxu0 %vm2367_vm15, %v7874_v20  ;;  %v7890_v54 = vld [vmem:[#allocation2 + $0x404] sm:$0xff]   ;;  %v7893_v20 = vld [vmem:[#allocation2 + $0x418] sm:$0xff]  }
 0x13b   : > { %3168 = vmatprep.mubr.bf16.mxu1 %v2602_v34  ;;  %7612 = vmatprep.mubr.msk.bf16.mxu0 %vm2367_vm15, %v7877_v13  ;;  %v2092_v34 = vpop.permute.xlu1 %2091  ;;  %v2622_v13 = vsel %vm2367_vm15, %v7891_v55, %v2286_v40  ;;  %v519_v40 = vrot.slane %v8380_v1, 4  ;;  %v1151_v1 = vld [vmem:[#allocation2 + $0x34c] sm:$0x8] }
 0x13c   : > { %v2554_v27 = vsel %vm2367_vm15, %v7888_v61, %v2092_v34  ;;  %v1137_v61 = vld [vmem:[#allocation2 + $0x324] sm:$0x8]  ;;  %v1130_v34 = vld [vmem:[#allocation2 + $0x310] sm:$0x8] }
 0x13d   : > { %v1138_v29 = vsel %vm8841_vm10, %v8901_v57, %v1137_v61  ;;  %v502_v57 = vrot.slane %v8365_v56, 4  ;;  %v1152_v56 = vsel %vm8841_vm10, %v8954_v16, %v1151_v1 }
 0x13e   : > { %1139 = vst [vmem:[#allocation2 + $0x324] sm:$0x8] %v1138_v29  ;;  %1153 = vst [vmem:[#allocation2 + $0x34c] sm:$0x8] %v1152_v56  ;;  %v1165_v29 = vld [vmem:[#allocation2 + $0x374] sm:$0x8] }
 0x142   : > { %3169 = vmatmul.mubr.bf16.gmra.mrb[40].mxu1 %v2538_v50  ;;  %7613 = vmatmul.mubr.msk.bf16.gmra.mrb[76].mxu0 %vm2367_vm15, %v7878_v17  ;;  %v7894_v50 = vld [vmem:[#allocation2 + $0x42c] sm:$0xff]  }
 0x143   : > { %3176 = vmatprep.mubr.bf16.mxu1 %v2606_v31  ;;  %7616 = vmatprep.mubr.msk.bf16.mxu0 %vm2367_vm15, %v7881_v7 }
 0x146   : > { %v2094_v31 = vpop.permute.xlu1 %2093 }
 0x147   : > { %v2558_v47 = vsel %vm2367_vm15, %v7892_v30, %v2094_v31 }
 0x14a   : > { %3177 = vmatmul.mubr.bf16.gmra.mrb[44].mxu1 %v2542_v52  ;;  %7617 = vmatmul.mubr.msk.bf16.gmra.mrb[80].mxu0 %vm2367_vm15, %v7882_v5 }
 0x14b   : > { %3184 = vmatprep.mubr.bf16.mxu1 %v2610_v60  ;;  %7620 = vmatprep.mubr.msk.bf16.mxu0 %vm2367_vm15, %v7885_v37  ;;  %v1123_v60 = vld [vmem:[#allocation2 + $0x2fc] sm:$0x8]  ;;  %v1116_v37 = vsel %vm8841_vm10, %v8639_v12, %v1115_v25 }
 0x14c   : > { %v1124_v5 = vsel %vm8841_vm10, %v8811_v44, %v1123_v60  ;;  %1117 = vst [vmem:[#allocation2 + $0x2e8] sm:$0x8] %v1116_v37 }
 0x14d   : > { %1125 = vst [vmem:[#allocation2 + $0x2fc] sm:$0x8] %v1124_v5 }
 0x152   : > { %3185 = vmatmul.mubr.bf16.gmra.mrb[48].mxu1 %v2546_v49  ;;  %7621 = vmatmul.mubr.msk.bf16.gmra.mrb[84].mxu0 %vm2367_vm15, %v7886_v21  ;;  %v786_v21 = vld [vmem:[#allocation2 + $0x38] sm:$0x1] }
 0x153   : > { %3192 = vmatprep.mubr.bf16.mxu1 %v2614_v2  ;;  %7624 = vmatprep.mubr.msk.bf16.mxu0 %vm2367_vm15, %v7889_v14  ;;  %v485_v2 = vrot.slane %v8322_v35, 4  ;;  %v779_v14 = vld [vmem:[#allocation2 + $0x24] sm:$0x1] }
 0x154   : > { %v780_v12 = vsel %vm8225_vm2, %v468_v59, %v779_v14  ;;  %v536_v14 = vrot.slane %v8422_v42, 4  ;;  %v1166_v42 = vsel %vm8841_vm10, %v9021_v23, %v1165_v29  ;;  %v7902_v29 = vld [vmem:[%s10848_s3 + $0x48] sm:$0xff]  }
 0x155   : > { %v787_v44 = vsel %vm8225_vm2, %v485_v2, %v786_v21  ;;  %781 = vst [vmem:[#allocation2 + $0x24] sm:$0x1] %v780_v12  ;;  %v814_v21 = vld [vmem:[#allocation2 + $0x88] sm:$0x1]  ;;  %1167 = vst [vmem:[#allocation2 + $0x374] sm:$0x8] %v1166_v42 }
 0x156   : > { %788 = vst [vmem:[#allocation2 + $0x38] sm:$0x1] %v787_v44 }
 0x15a   : > { %3193 = vmatmul.mubr.bf16.gmra.mrb[52].mxu1 %v2550_v48  ;;  %7625 = vmatmul.mubr.msk.bf16.gmra.mrb[88].mxu0 %vm2367_vm15, %v7890_v54 }
 0x15b   : > { %3200 = vmatprep.mubr.bf16.mxu1 %v2618_v36  ;;  %7628 = vmatprep.mubr.msk.bf16.mxu0 %vm2367_vm15, %v7893_v20  ;;  %v1131_v20 = vsel %vm8841_vm10, %v8879_v41, %v1130_v34 }
 0x15c   : > { %1132 = vst [vmem:[#allocation2 + $0x310] sm:$0x8] %v1131_v20  ;;  %v1158_v20 = vld [vmem:[#allocation2 + $0x360] sm:$0x8] }
 0x162   : > { %3201 = vmatmul.mubr.bf16.gmra.mrb[56].mxu1 %v2554_v27  ;;  %7629 = vmatmul.mubr.msk.bf16.gmra.mrb[92].mxu0 %vm2367_vm15, %v7894_v50  ;;  %v800_v27 = vld [vmem:[#allocation2 + $0x60] sm:$0x1] }
 0x163   : > { %3208 = vmatprep.mubr.bf16.mxu1 %v2622_v13  ;;  %v801_v13 = vsel %vm8225_vm2, %v519_v40, %v800_v27  ;;  %v1159_v27 = vsel %vm8841_vm10, %v8978_v18, %v1158_v20 }
 0x164   : > { %802 = vst [vmem:[#allocation2 + $0x60] sm:$0x1] %v801_v13  ;;  %1160 = vst [vmem:[#allocation2 + $0x360] sm:$0x8] %v1159_v27 }
 0x16a   : > { %3209 = vmatmul.mubr.bf16.gmra.mrb[60].mxu1 %v2558_v47 }
 0x17d   : > { %v7120_v17 = vpop.f32.mrb[0].mxu0 }
 0x17e   : > { %v7121_v43 = vpop.f32.mrb[1].mxu0 }
 0x17f   : > { %v9416_v33 = vadd.f32 %v7121_v43, %v7120_v17  ;;  %v7123_v7 = vpop.f32.mrb[2].mxu0  ;;  %v793_v17 = vld [vmem:[#allocation2 + $0x4c] sm:$0x1] }
 0x180   : > { %v7124_v24 = vpop.f32.mrb[3].mxu0  ;;  %v794_v41 = vsel %vm8225_vm2, %v502_v57, %v793_v17  ;;  %v828_v17 = vld [vmem:[#allocation2 + $0xb0] sm:$0x1] }
 0x181   : > { %v9418_v52 = vadd.f32 %v7124_v24, %v7123_v7  ;;  %v7896_v7 = vld [vmem:[#allocation2 + $0x170] sm:$0xff]   ;;  %795 = vst [vmem:[#allocation2 + $0x4c] sm:$0x1] %v794_v41 }
 0x182   : > { %4826 = vrot.lane.b32.xlu1 %v7896_v7, %s8141_s14  ;;  %v821_v7 = vld [vmem:[#allocation2 + $0x9c] sm:$0x1] }
 0x185   : > { %v7126_v19 = vpop.f32.mrb[4].mxu0 }
 0x186   : > { %v7127_v26 = vpop.f32.mrb[5].mxu0 }
 0x187   : > { %v9426_v6 = vadd.f32 %v7127_v26, %v7126_v19  ;;  %v7129_v49 = vpop.f32.mrb[6].mxu0  ;;  %v1144_v19 = vld [vmem:[#allocation2 + $0x338] sm:$0x8] }
 0x188   : > { %v7130_v9 = vpop.f32.mrb[7].mxu0  ;;  %v1145_v25 = vsel %vm8841_vm10, %v8929_v53, %v1144_v19  ;;  %v7895_v53 = vld [vmem:[%s10848_s3 + $0x40] sm:$0xff]  }
 0x189   : > { %v9430_v45 = vadd.f32 %v7130_v9, %v7129_v49  ;;  %1146 = vst [vmem:[#allocation2 + $0x338] sm:$0x8] %v1145_v25  ;;  %v553_v9 = vrot.slane %v8458_v28, 4  ;;  %v7897_v28 = vld [vmem:[%s10848_s3] sm:$0xff]   ;;  %7348 = vmatprep.subr.bf16.mxu1 %v7895_v53 }
 0x18a   : > { %7349 = vmatpush3.bf16.msra.mxu1 %v7897_v28 }
 0x18b   : > { %v815_v16 = vsel %vm8225_vm2, %v553_v9, %v814_v21  ;;  %7350 = vmatprep.subr.bf16.mxu1 %v7902_v29  ;;  %v11004_v29 = vld [vmem:[#allocation7_spill] sm:$0xff] }
 0x18c   : > { %816 = vst [vmem:[#allocation2 + $0x88] sm:$0x1] %v815_v16 }
 0x18d   : > { %v7132_v38 = vpop.f32.mrb[8].mxu0 }
 0x18e   : > { %v7133_v48 = vpop.f32.mrb[9].mxu0 }
 0x18f   : > { %v9436_v36 = vadd.f32 %v7133_v48, %v7132_v38  ;;  %v7135_v35 = vpop.f32.mrb[10].mxu0  ;;  %v807_v48 = vld [vmem:[#allocation2 + $0x74] sm:$0x1] }
 0x190   : > { %v7136_v54 = vpop.f32.mrb[11].mxu0  ;;  %v808_v61 = vsel %vm8225_vm2, %v536_v14, %v807_v48 }
 0x191   : > { %v9441_v55 = vadd.f32 %v7136_v54, %v7135_v35  ;;  %809 = vst [vmem:[#allocation2 + $0x74] sm:$0x1] %v808_v61 }
 0x195   : > { %v7138_v30 = vpop.f32.mrb[12].mxu0 }
 0x196   : > { %v7139_v50 = vpop.f32.mrb[13].mxu0 }
 0x197   : > { %v9450_v31 = vadd.f32 %v7139_v50, %v7138_v30  ;;  %v7141_v47 = vpop.f32.mrb[14].mxu0 }
 0x198   : > { %v7142_v43 = vpop.f32.mrb[15].mxu0 }
 0x199   : > { %v9454_v24 = vadd.f32 %v7142_v43, %v7141_v47  ;;  %v587_v47 = vrot.slane %v8518_v46, 4  ;;  %v570_v43 = vrot.slane %v8482_v4, 4  ;;  %v1179_v46 = vld [vmem:[#allocation2 + $0x39c] sm:$0x8] }
 0x19a   : > { %v1180_v25 = vsel %vm8841_vm10, %v9065_v10, %v1179_v46 }
 0x19b   : > { %v829_v23 = vsel %vm8225_vm2, %v587_v47, %v828_v17  ;;  %v822_v18 = vsel %vm8225_vm2, %v570_v43, %v821_v7  ;;  %1181 = vst [vmem:[#allocation2 + $0x39c] sm:$0x8] %v1180_v25  ;;  %v1172_v17 = vld [vmem:[#allocation2 + $0x388] sm:$0x8] }
 0x19c   : > { %830 = vst [vmem:[#allocation2 + $0xb0] sm:$0x1] %v829_v23  ;;  %823 = vst [vmem:[#allocation2 + $0x9c] sm:$0x1] %v822_v18  ;;  %v1173_v7 = vsel %vm8841_vm10, %v9040_v39, %v1172_v17 }
 0x19d   : > { %v7144_v60 = vpop.f32.mrb[16].mxu0  ;;  %1174 = vst [vmem:[#allocation2 + $0x388] sm:$0x8] %v1173_v7 }
 0x19e   : > { %v7145_v5 = vpop.f32.mrb[17].mxu0 }
 0x19f   : > { %v9463_v26 = vadd.f32 %v7145_v5, %v7144_v60  ;;  %v7147_v37 = vpop.f32.mrb[18].mxu0 }
 0x1a0   : > { %v7148_v49 = vpop.f32.mrb[19].mxu0 }
 0x1a1   : > { %v9465_v2 = vadd.f32 %v7148_v49, %v7147_v37  ;;  %v9509_v49 = vld [vmem:[%s10847_s2] ss:$0 sm:$0xff] }
 0x1a2   : > { %v2930_v14 = vadd.f32 %v9416_v33, %v9509_v49  ;;  %v2933_v48 = vadd.f32 %v9418_v52, %v9509_v49  ;;  %v7904_v52 = vld [vmem:[%s10848_s3 + $0x8] sm:$0xff]   ;;  %v2938_v23 = vadd.f32 %v9426_v6, %v9509_v49  ;;  %v2941_v46 = vadd.f32 %v9430_v45, %v9509_v49 }
 0x1a3   : > { %7351 = vmatpush3.bf16.msra.mxu1 %v7904_v52  ;;  %v2946_v45 = vadd.f32 %v9436_v36, %v9509_v49 }
 0x1a5   : > { %v7150_v59 = vpop.f32.mrb[20].mxu0 }
 0x1a6   : > { %v7151_v44 = vpop.f32.mrb[21].mxu0 }
 0x1a7   : > { %v9474_v12 = vadd.f32 %v7151_v44, %v7150_v59  ;;  %v7153_v38 = vpop.f32.mrb[22].mxu0 }
 0x1a8   : > { %v7154_v35 = vpop.f32.mrb[23].mxu0 }
 0x1a9   : > { %v9481_v54 = vadd.f32 %v7154_v35, %v7153_v38 }
 0x1ad   : > { %v7156_v34 = vpop.f32.mrb[24].mxu0 }
 0x1ae   : > { %v7157_v40 = vpop.f32.mrb[25].mxu0 }
 0x1af   : > { %v9489_v13 = vadd.f32 %v7157_v40, %v7156_v34  ;;  %v7159_v30 = vpop.f32.mrb[26].mxu0 }
 0x1b0   : > { %v7160_v50 = vpop.f32.mrb[27].mxu0 }
 0x1b1   : > { %v9491_v57 = vadd.f32 %v7160_v50, %v7159_v30 }
 0x1b5   : > { %v7162_v41 = vpop.f32.mrb[28].mxu0 }
 0x1b6   : > { %v7163_v1 = vpop.f32.mrb[29].mxu0 }
 0x1b7   : > { %v9499_v60 = vadd.f32 %v7163_v1, %v7162_v41  ;;  %v7165_v56 = vpop.f32.mrb[30].mxu0  ;;  %v11003_v1 = vld [vmem:[#allocation8_spill] sm:$0xff] }
 0x1b8   : > { %v7166_v19 = vpop.f32.mrb[31].mxu0  ;;  %v621_v18 = vrot.slane %v11003_v1, 4 }
 0x1b9   : > { %v9501_v5 = vadd.f32 %v7166_v19, %v7165_v56  ;;  %v842_v56 = vld [vmem:[#allocation2 + $0xd8] sm:$0x1] }
 0x1ba   : > { %v843_v6 = vsel %vm8225_vm2, %v621_v18, %v842_v56 }
 0x1bb   : > { %844 = vst [vmem:[#allocation2 + $0xd8] sm:$0x1] %v843_v6 }
 0x1bd   : > { %v7168_v4 = vpop.f32.mrb[32].mxu0 }
 0x1be   : > { %v7169_v37 = vpop.f32.mrb[33].mxu0 }
 0x1bf   : > { %v9511_v9 = vadd.f32 %v7169_v37, %v7168_v4  ;;  %v7171_v21 = vpop.f32.mrb[34].mxu0 }
 0x1c0   : > { %v7172_v59 = vpop.f32.mrb[35].mxu0 }
 0x1c1   : > { %v9513_v53 = vadd.f32 %v7172_v59, %v7171_v21 }
 0x1c5   : > { %v7232_v16 = vpop.f32.mrb[0].mxu1  ;;  %v7174_v34 = vpop.f32.mrb[36].mxu0 }
 0x1c6   : > { %v7233_v44 = vpop.f32.mrb[1].mxu1  ;;  %v7175_v42 = vpop.f32.mrb[37].mxu0 }
 0x1c7   : > { %v7234_v10 = vadd.f32 %v7233_v44, %v7232_v16  ;;  %v7235_v38 = vpop.f32.mrb[2].mxu1  ;;  %v9526_v40 = vadd.f32 %v7175_v42, %v7174_v34  ;;  %v7177_v33 = vpop.f32.mrb[38].mxu0  ;;  %v604_v34 = vrot.slane %v11004_v29, 4  ;;  %v835_v42 = vld [vmem:[#allocation2 + $0xc4] sm:$0x1] }
 0x1c8   : > { %v7236_v28 = vpop.f32.mrb[3].mxu1  ;;  %v7178_v30 = vpop.f32.mrb[39].mxu0 }
 0x1c9   : > { %v7237_v35 = vadd.f32 %v7236_v28, %v7235_v38  ;;  %v9519_v61 = vadd.f32 %v7234_v10, %v2930_v14  ;;  %v9528_v47 = vadd.f32 %v7178_v30, %v7177_v33  ;;  %v2949_v33 = vadd.f32 %v9441_v55, %v9509_v49 }
 0x1ca   : > { %v836_v17 = vsel %vm8225_vm2, %v604_v34, %v835_v42 }
 0x1cb   : > { %v9524_v20 = vadd.f32 %v7237_v35, %v2933_v48  ;;  %837 = vst [vmem:[#allocation2 + $0xc4] sm:$0x1] %v836_v17 }
 0x1cd   : > { %v7238_v27 = vpop.f32.mrb[4].mxu1  ;;  %v7180_v37 = vpop.f32.mrb[40].mxu0 }
 0x1ce   : > { %v7239_v50 = vpop.f32.mrb[5].mxu1  ;;  %v7181_v21 = vpop.f32.mrb[41].mxu0 }
 0x1cf   : > { %v7240_v43 = vadd.f32 %v7239_v50, %v7238_v27  ;;  %v7241_v41 = vpop.f32.mrb[6].mxu1  ;;  %v9547_v39 = vadd.f32 %v7181_v21, %v7180_v37  ;;  %v7183_v59 = vpop.f32.mrb[42].mxu0  ;;  %v1193_v50 = vld [vmem:[#allocation2 + $0x3c4] sm:$0x8]  ;;  %v2957_v21 = vadd.f32 %v9454_v24, %v9509_v49 }
 0x1d0   : > { %v7242_v19 = vpop.f32.mrb[7].mxu1  ;;  %v7184_v14 = vpop.f32.mrb[43].mxu0  ;;  %v1194_v36 = vsel %vm8841_vm10, %v9108_v11, %v1193_v50 }
 0x1d1   : > { %v7243_v25 = vadd.f32 %v7242_v19, %v7241_v41  ;;  %v9541_v4 = vadd.f32 %v7240_v43, %v2938_v23  ;;  %v9549_v38 = vadd.f32 %v7184_v14, %v7183_v59  ;;  %1195 = vst [vmem:[#allocation2 + $0x3c4] sm:$0x8] %v1194_v36  ;;  %v1186_v19 = vld [vmem:[#allocation2 + $0x3b0] sm:$0x8]  ;;  %v11005_v14 = vld [vmem:[#allocation10_spill] sm:$0xff] }
 0x1d2   : > { %v1187_v11 = vsel %vm8841_vm10, %v9082_v22, %v1186_v19  ;;  %v11006_v36 = vld [vmem:[#allocation9_spill] sm:$0xff] }
 0x1d3   : > { %v9545_v16 = vadd.f32 %v7243_v25, %v2941_v46  ;;  %v2954_v46 = vadd.f32 %v9450_v31, %v9509_v49  ;;  %1188 = vst [vmem:[#allocation2 + $0x3b0] sm:$0x8] %v1187_v11  ;;  %v7912_v19 = vld [vmem:[%s10848_s3 + $0x50] sm:$0xff]  }
 0x1d4   : > { %7352 = vmatprep.subr.bf16.mxu1 %v7912_v19 }
 0x1d5   : > { %v7244_v44 = vpop.f32.mrb[8].mxu1  ;;  %v7186_v52 = vpop.f32.mrb[44].mxu0 }
 0x1d6   : > { %v7245_v10 = vpop.f32.mrb[9].mxu1  ;;  %v7187_v23 = vpop.f32.mrb[45].mxu0 }
 0x1d7   : > { %v7246_v28 = vadd.f32 %v7245_v10, %v7244_v44  ;;  %v7247_v48 = vpop.f32.mrb[10].mxu1  ;;  %v9565_v41 = vadd.f32 %v7187_v23, %v7186_v52  ;;  %v7189_v55 = vpop.f32.mrb[46].mxu0  ;;  %v655_v10 = vrot.slane %v11005_v14, 4  ;;  %v638_v23 = vrot.slane %v11006_v36, 4  ;;  %v870_v36 = vld [vmem:[#allocation2 + $0x128] sm:$0x1] }
 0x1d8   : > { %v7248_v35 = vpop.f32.mrb[11].mxu1  ;;  %v7190_v1 = vpop.f32.mrb[47].mxu0 }
 0x1d9   : > { %v7249_v27 = vadd.f32 %v7248_v35, %v7247_v48  ;;  %v9556_v30 = vadd.f32 %v7246_v28, %v2946_v45  ;;  %v9567_v56 = vadd.f32 %v7190_v1, %v7189_v55  ;;  %v856_v45 = vld [vmem:[#allocation2 + $0x100] sm:$0x1]  ;;  %v849_v55 = vld [vmem:[#allocation2 + $0xec] sm:$0x1] }
 0x1da   : > { %v857_v35 = vsel %vm8225_vm2, %v655_v10, %v856_v45 }
 0x1db   : > { %v9563_v43 = vadd.f32 %v7249_v27, %v2949_v33  ;;  %858 = vst [vmem:[#allocation2 + $0x100] sm:$0x1] %v857_v35  ;;  %v2962_v27 = vadd.f32 %v9463_v26, %v9509_v49  ;;  %v850_v26 = vsel %vm8225_vm2, %v638_v23, %v849_v55 }
 0x1dc   : > { %851 = vst [vmem:[#allocation2 + $0xec] sm:$0x1] %v850_v26  ;;  %v2978_v26 = vadd.f32 %v9489_v13, %v9509_v49  ;;  %v1221_v13 = vld [vmem:[#allocation2 + $0x414] sm:$0x8] }
 0x1dd   : > { %v7250_v7 = vpop.f32.mrb[12].mxu1  ;;  %v7192_v28 = vpop.f32.mrb[48].mxu0 }
 0x1de   : > { %v7251_v18 = vpop.f32.mrb[13].mxu1  ;;  %v7193_v48 = vpop.f32.mrb[49].mxu0 }
 0x1df   : > { %v7252_v25 = vadd.f32 %v7251_v18, %v7250_v7  ;;  %v7253_v6 = vpop.f32.mrb[14].mxu1  ;;  %v9583_v29 = vadd.f32 %v7193_v48, %v7192_v28  ;;  %v7195_v22 = vpop.f32.mrb[50].mxu0  ;;  %v2965_v7 = vadd.f32 %v9465_v2, %v9509_v49  ;;  %v7914_v28 = vld [vmem:[%s10848_s3 + $0x10] sm:$0xff]   ;;  %v1200_v48 = vld [vmem:[#allocation2 + $0x3d8] sm:$0x8] }
 0x1e0   : > { %v7254_v37 = vpop.f32.mrb[15].mxu1  ;;  %v7196_v42 = vpop.f32.mrb[51].mxu0  ;;  %7353 = vmatpush3.bf16.msra.mxu1 %v7914_v28 }
 0x1e1   : > { %v7255_v59 = vadd.f32 %v7254_v37, %v7253_v6  ;;  %v9576_v44 = vadd.f32 %v7252_v25, %v2954_v46  ;;  %v9585_v33 = vadd.f32 %v7196_v42, %v7195_v22  ;;  %v1207_v46 = vld [vmem:[#allocation2 + $0x3ec] sm:$0x8] }
 0x1e2   : > { %v1208_v6 = vsel %vm8841_vm10, %v9168_v63, %v1207_v46  ;;  %v2970_v63 = vadd.f32 %v9474_v12, %v9509_v49 }
 0x1e3   : > { %v9579_v31 = vadd.f32 %v7255_v59, %v2957_v21  ;;  %1209 = vst [vmem:[#allocation2 + $0x3ec] sm:$0x8] %v1208_v6 }
 0x1e5   : > { %v7256_v34 = vpop.f32.mrb[16].mxu1  ;;  %v7198_v25 = vpop.f32.mrb[52].mxu0 }
 0x1e6   : > { %v7257_v24 = vpop.f32.mrb[17].mxu1  ;;  %v7199_v11 = vpop.f32.mrb[53].mxu0 }
 0x1e7   : > { %v7258_v50 = vadd.f32 %v7257_v24, %v7256_v34  ;;  %v7259_v52 = vpop.f32.mrb[18].mxu1  ;;  %v9604_v2 = vadd.f32 %v7199_v11, %v7198_v25  ;;  %v7201_v21 = vpop.f32.mrb[54].mxu0  ;;  %v1201_v34 = vsel %vm8841_vm10, %v9127_v58, %v1200_v48  ;;  %v2973_v24 = vadd.f32 %v9481_v54, %v9509_v49 }
 0x1e8   : > { %v7260_v17 = vpop.f32.mrb[19].mxu1  ;;  %v7202_v14 = vpop.f32.mrb[55].mxu0  ;;  %1202 = vst [vmem:[#allocation2 + $0x3d8] sm:$0x8] %v1201_v34 }
 0x1e9   : > { %v7261_v1 = vadd.f32 %v7260_v17, %v7259_v52  ;;  %v9592_v18 = vadd.f32 %v7258_v50, %v2962_v27  ;;  %v9606_v45 = vadd.f32 %v7202_v14, %v7201_v21  ;;  %v11007_v52 = vld [vmem:[#allocation12_spill] sm:$0xff] }
 0x1ea   : > { %v689_v17 = vrot.slane %v11007_v52, 4  ;;  %v1222_v52 = vsel %vm8841_vm10, %v9240_v3, %v1221_v13  ;;  %v2994_v3 = vadd.f32 %v9511_v9, %v9509_v49  ;;  %v9672_v9 = vadd.f32 %v9549_v38, %v9509_v49 }
 0x1eb   : > { %v9602_v37 = vadd.f32 %v7261_v1, %v2965_v7  ;;  %1223 = vst [vmem:[#allocation2 + $0x414] sm:$0x8] %v1222_v52 }
 0x1ec   : > { %v871_v7 = vsel %vm8225_vm2, %v689_v17, %v870_v36 }
 0x1ed   : > { %v7262_v59 = vpop.f32.mrb[20].mxu1  ;;  %v7204_v23 = vpop.f32.mrb[56].mxu0  ;;  %872 = vst [vmem:[#allocation2 + $0x128] sm:$0x1] %v871_v7  ;;  %v2986_v7 = vadd.f32 %v9499_v60, %v9509_v49  ;;  %v9658_v60 = vadd.f32 %v9526_v40, %v9509_v49 }
 0x1ee   : > { %v7263_v10 = vpop.f32.mrb[21].mxu1  ;;  %v7205_v12 = vpop.f32.mrb[57].mxu0 }
 0x1ef   : > { %v7264_v35 = vadd.f32 %v7263_v10, %v7262_v59  ;;  %v7265_v22 = vpop.f32.mrb[22].mxu1  ;;  %v9625_v58 = vadd.f32 %v7205_v12, %v7204_v23  ;;  %v7207_v1 = vpop.f32.mrb[58].mxu0  ;;  %v11008_v59 = vld [vmem:[#allocation11_spill] sm:$0xff]  ;;  %v2981_v10 = vadd.f32 %v9491_v57, %v9509_v49 }
 0x1f0   : > { %v7266_v42 = vpop.f32.mrb[23].mxu1  ;;  %v7208_v46 = vpop.f32.mrb[59].mxu0  ;;  %v672_v14 = vrot.slane %v11008_v59, 4  ;;  %v1214_v12 = vld [vmem:[#allocation2 + $0x400] sm:$0x8]  ;;  %v11009_v59 = vld [vmem:[#allocation14_spill] sm:$0xff] }
 0x1f1   : > { %v7267_v27 = vadd.f32 %v7266_v42, %v7265_v22  ;;  %v9618_v50 = vadd.f32 %v7264_v35, %v2970_v63  ;;  %v9627_v25 = vadd.f32 %v7208_v46, %v7207_v1  ;;  %v863_v63 = vld [vmem:[#allocation2 + $0x114] sm:$0x1]  ;;  %v1215_v46 = vsel %vm8841_vm10, %v9202_v62, %v1214_v12 }
 0x1f2   : > { %v864_v22 = vsel %vm8225_vm2, %v672_v14, %v863_v63  ;;  %1216 = vst [vmem:[#allocation2 + $0x400] sm:$0x8] %v1215_v46  ;;  %v723_v14 = vrot.slane %v11009_v59, 4 }
 0x1f3   : > { %v9621_v55 = vadd.f32 %v7267_v27, %v2973_v24  ;;  %865 = vst [vmem:[#allocation2 + $0x114] sm:$0x1] %v864_v22  ;;  %v877_v22 = vld [vmem:[#allocation2 + $0x13c] sm:$0x1] }
 0x1f5   : > { %v7268_v19 = vpop.f32.mrb[24].mxu1  ;;  %v7210_v35 = vpop.f32.mrb[60].mxu0 }
 0x1f6   : > { %v7269_v54 = vpop.f32.mrb[25].mxu1  ;;  %v7211_v34 = vpop.f32.mrb[61].mxu0 }
 0x1f7   : > { %v7270_v6 = vadd.f32 %v7269_v54, %v7268_v19  ;;  %v7271_v11 = vpop.f32.mrb[26].mxu1  ;;  %v7212_v24 = vadd.f32 %v7211_v34, %v7210_v35  ;;  %v7213_v27 = vpop.f32.mrb[62].mxu0  ;;  %v2989_v54 = vadd.f32 %v9501_v5, %v9509_v49  ;;  %v9668_v5 = vadd.f32 %v9547_v39, %v9509_v49  ;;  %v11010_v35 = vld [vmem:[#allocation13_spill] sm:$0xff] }
 0x1f8   : > { %v7272_v21 = vpop.f32.mrb[27].mxu1  ;;  %v7214_v17 = vpop.f32.mrb[63].mxu0  ;;  %v706_v38 = vrot.slane %v11010_v35, 4  ;;  %v9693_v34 = vadd.f32 %v9585_v33, %v9509_v49 }
 0x1f9   : > { %v7273_v28 = vadd.f32 %v7272_v21, %v7271_v11  ;;  %v9634_v48 = vadd.f32 %v7270_v6, %v2978_v26  ;;  %v7215_v23 = vadd.f32 %v7214_v17, %v7213_v27  ;;  %v9654_v26 = vadd.f32 %v9513_v53, %v9509_v49 }
 0x1fa   : > { %v9662_v11 = vadd.f32 %v9528_v47, %v9509_v49  ;;  %v9676_v53 = vadd.f32 %v9565_v41, %v9509_v49  ;;  %v884_v47 = vld [vmem:[#allocation2 + $0x150] sm:$0x1]  ;;  %v9689_v41 = vadd.f32 %v9583_v29, %v9509_v49  ;;  %11012 = vst [vmem:[#allocation7_spill] sm:$0xff] %v9693_v34  ;;  %v9700_v27 = vadd.f32 %v9604_v2, %v9509_v49 }
 0x1fb   : > { %v9638_v42 = vadd.f32 %v7273_v28, %v2981_v10  ;;  %v9681_v10 = vadd.f32 %v9567_v56, %v9509_v49  ;;  %v878_v33 = vsel %vm8225_vm2, %v706_v38, %v877_v22  ;;  %v7922_v22 = vld [vmem:[%s10848_s3 + $0x58] sm:$0xff]  }
 0x1fc   : > { %11011 = vst [vmem:[#allocation8_spill] sm:$0xff] %v9689_v41  ;;  %11013 = vst [vmem:[#allocation10_spill] sm:$0xff] %v9700_v27  ;;  %7354 = vmatprep.subr.bf16.mxu1 %v7922_v22  ;;  %v3933_v41 = vld [vmem:[#allocation2 + $0x80] sm:$0xf] }
 0x1fd   : > { %v7274_v57 = vpop.f32.mrb[28].mxu1  ;;  %v7602_v40 = vpop.f32.mrb[64].mxu0  ;;  %879 = vst [vmem:[#allocation2 + $0x13c] sm:$0x1] %v878_v33 }
 0x1fe   : > { %v7275_v36 = vpop.f32.mrb[29].mxu1  ;;  %v3260_v28 = vadd.f32 %v7602_v40, %v9541_v4  ;;  %v3251_v39 = vpop.f32.mrb[65].mxu0  ;;  %v885_v4 = vsel %vm8225_vm2, %v723_v14, %v884_v47  ;;  %v4266_v47 = vld [vmem:[#allocation2 + $0x2e8] sm:$0x8] }
 0x1ff   : > { %v7276_v1 = vadd.f32 %v7275_v36, %v7274_v57  ;;  %v7277_v19 = vpop.f32.mrb[30].mxu1  ;;  %v3252_v13 = vadd.f32 %v3251_v39, %v9519_v61  ;;  %v7603_v56 = vpop.f32.mrb[66].mxu0  ;;  %886 = vst [vmem:[#allocation2 + $0x150] sm:$0x1] %v885_v4  ;;  %v9707_v61 = vadd.f32 %v9606_v45, %v9509_v49  ;;  %v9711_v36 = vadd.f32 %v9625_v58, %v9509_v49  ;;  %v3905_v39 = vld [vmem:[#allocation2 + $0x30] sm:$0xf] }
 0x200   : > { %v7278_v6 = vpop.f32.mrb[31].mxu1  ;;  %v3380_v57 = vmax.f32 %v3260_v28, 0.0  ;;  %v3263_v17 = vadd.f32 %v7603_v56, %v9545_v16  ;;  %v3254_v29 = vpop.f32.mrb[67].mxu0  ;;  %v9716_v16 = vadd.f32 %v9627_v25, %v9509_v49  ;;  %v9719_v45 = vadd.f32 %v7212_v24, %v9509_v49  ;;  %v4273_v25 = vld [vmem:[#allocation2 + $0x2fc] sm:$0x8]  ;;  %v7932_v56 = vld [vmem:[%s10848_s3 + $0x60] sm:$0xff]  }
 0x201   : > { %v7279_v62 = vadd.f32 %v7278_v6, %v7277_v19  ;;  %v9664_v21 = vadd.f32 %v7276_v1, %v2986_v7  ;;  %11014 = vst [vmem:[#allocation9_spill] sm:$0xff] %v9707_v61  ;;  %11015 = vst [vmem:[#allocation12_spill] sm:$0xff] %v9711_v36  ;;  %v3378_v2 = vmax.f32 %v3252_v13, 0.0  ;;  %v3255_v7 = vadd.f32 %v3254_v29, %v9524_v20  ;;  %v7924_v13 = vld [vmem:[%s10848_s3 + $0x18] sm:$0xff]  }
 0x202   : > { %11016 = vst [vmem:[#allocation11_spill] sm:$0xff] %v9716_v16  ;;  %v7073_v46 = vpack.c.bf16 %v3380_v57, %v3380_v57  ;;  %11017 = vst [vmem:[#allocation14_spill] sm:$0xff] %v9719_v45  ;;  %v9722_v6 = vadd.f32 %v7215_v23, %v9509_v49  ;;  %7355 = vmatpush3.bf16.msra.mxu1 %v7924_v13 }
 0x203   : > { %v9684_v63 = vadd.f32 %v7279_v62, %v2989_v54  ;;  %v3381_v54 = vmax.f32 %v3263_v17, 0.0  ;;  %v7071_v62 = vpack.c.bf16 %v3378_v2, %v3378_v2  ;;  %v3379_v40 = vmax.f32 %v3255_v7, 0.0  ;;  %7356 = vmatprep.subr.bf16.mxu1 %v7932_v56 }
 0x204   : > { %11018 = vst [vmem:[#allocation13_spill] sm:$0xff] %v9722_v6  ;;  %v3596_v20 = vshrl.u32 %v7073_v46, 16  ;;  %v3599_v14 = vshll.u32 %v7073_v46, 16  ;;  %4044 = vst.msk [vmem:[#allocation2 + $0x198] sm:$0xf] %vm224_vm3, %v7073_v46 }
 0x205   : > { %v7280_v52 = vpop.f32.mrb[32].mxu1  ;;  %v7074_v28 = vpack.c.bf16 %v3381_v54, %v3381_v54  ;;  %v3579_v35 = vshrl.u32 %v7071_v62, 16  ;;  %v3582_v38 = vshll.u32 %v7071_v62, 16  ;;  %4042 = vst.msk [vmem:[#allocation2 + $0x184] sm:$0xf] %vm224_vm3, %v7071_v62  ;;  %v9728_v24 = vpack.c.bf16 %v3379_v40, %v3379_v40  ;;  %v9730_v49 = vpop.f32.mrb[68].mxu0 }
 0x206   : > { %v7281_v12 = vpop.f32.mrb[33].mxu1  ;;  %v3598_v4 = vrot.slane %v3596_v20, 7  ;;  %v4084_v57 = vrot.slane %v3596_v20, 4  ;;  %v7934_v20 = vld [vmem:[%s10848_s3 + $0x20] sm:$0xff]  }
 0x207   : > { %v7282_v1 = vadd.f32 %v7281_v12, %v7280_v52  ;;  %v7283_v19 = vpop.f32.mrb[34].mxu1  ;;  %v4083_v52 = vrot.slane %v3599_v14, 5  ;;  %v3604_v17 = vshrl.u32 %v7074_v28, 16  ;;  %4045 = vst.msk [vmem:[#allocation2 + $0x19c] sm:$0xf] %vm224_vm3, %v7074_v28  ;;  %v9746_v29 = vrot.slane %v3579_v35, 7  ;;  %7357 = vmatpush3.bf16.msra.mxu1 %v7934_v20 }
 0x208   : > { %v7284_v58 = vpop.f32.mrb[35].mxu1  ;;  %v4074_v33 = vrot.slane %v3582_v38, 5  ;;  %v4075_v12 = vrot.slane %v3579_v35, 4  ;;  %v3607_v2 = vshll.u32 %v7074_v28, 16  ;;  %4043 = vst.msk [vmem:[#allocation2 + $0x188] sm:$0xf] %vm224_vm3, %v9728_v24 }
 0x209   : > { %v9724_v59 = vadd.f32 %v7284_v58, %v7283_v19  ;;  %v9732_v23 = vadd.f32 %v7282_v1, %v2994_v3  ;;  %v9744_v3 = vpop.f32.mrb[69].mxu0  ;;  %v3601_v1 = vor.u32 %v3599_v14, %v3598_v4  ;;  %v3602_v19 = vrot.slane %v3598_v4, 4  ;;  %v3898_v58 = vld [vmem:[#allocation2 + $0x1c] sm:$0xf] }
 0x20a   : > { %v9750_v7 = vpop.f32.mrb[70].mxu0  ;;  %v4085_v46 = vor.u32 %v4084_v57, %v4083_v52  ;;  %v4274_v54 = vsel %vm8841_vm10, %v4083_v52, %v4273_v25  ;;  %v3584_v28 = vor.u32 %v3582_v38, %v9746_v29  ;;  %v3585_v35 = vrot.slane %v9746_v29, 4  ;;  %v7942_v25 = vld [vmem:[%s10848_s3 + $0x68] sm:$0xff]  }
 0x20b   : > { %v9754_v40 = vpop.f32.mrb[71].mxu0  ;;  %4275 = vst [vmem:[#allocation2 + $0x2fc] sm:$0x8] %v4274_v54  ;;  %v4076_v14 = vor.u32 %v4075_v12, %v4074_v33  ;;  %v4267_v22 = vsel %vm8841_vm10, %v4074_v33, %v4266_v47  ;;  %v3906_v13 = vsel %vm8314_vm7, %v3601_v1, %v3905_v39  ;;  %v3606_v57 = vrot.slane %v3604_v17, 7  ;;  %v3909_v54 = vld [vmem:[#allocation2 + $0x38] sm:$0x1]  ;;  %7358 = vmatprep.subr.bf16.mxu1 %v7942_v25 }
 0x20c   : > { %v4086_v52 = vrot.slane %v4085_v46, 4  ;;  %4268 = vst [vmem:[#allocation2 + $0x2e8] sm:$0x8] %v4267_v22  ;;  %v4087_v38 = vrot.slane %v3607_v2, 5  ;;  %3907 = vst [vmem:[#allocation2 + $0x30] sm:$0xf] %v3906_v13  ;;  %v3899_v29 = vsel %vm8314_vm7, %v3584_v28, %v3898_v58 }
 0x20d   : > { %v7286_v62 = vpop.f32.mrb[36].mxu1  ;;  %v4077_v47 = vrot.slane %v4076_v14, 4  ;;  %v4089_v33 = vrot.slane %v3604_v17, 4  ;;  %v3587_v56 = vshrl.u32 %v9728_v24, 16  ;;  %3900 = vst [vmem:[#allocation2 + $0x1c] sm:$0xf] %v3899_v29  ;;  %v3609_v6 = vor.u32 %v3607_v2, %v3606_v57 }
 0x20e   : > { %v7287_v4 = vpop.f32.mrb[37].mxu1  ;;  %v3611_v36 = vrot.slane %v3606_v57, 4  ;;  %v4088_v39 = vsel %vm8857_vm13, %v4086_v52, %v4087_v38  ;;  %v4277_v1 = vld [vmem:[#allocation2 + $0x304] sm:$0xf]  ;;  %v3590_v46 = vshll.u32 %v9728_v24, 16  ;;  %v7610_v14 = vpop.f32.mrb[72].mxu0 }
 0x20f   : > { %v7289_v16 = vpop.f32.mrb[38].mxu1  ;;  %v3902_v22 = vld [vmem:[#allocation2 + $0x24] sm:$0x1]  ;;  %v4090_v13 = vor.u32 %v4089_v33, %v4087_v38  ;;  %4276 = vst.msk [vmem:[#allocation2 + $0x300] sm:$0xf] %vm224_vm3, %v4088_v39  ;;  %v3589_v58 = vrot.slane %v3587_v56, 7  ;;  %v9775_v17 = vadd.f32 %v7287_v4, %v7286_v62  ;;  %v3610_v52 = vsel %vm8296_vm6, %v3602_v19, %v3609_v6 }
 0x210   : > { %v7290_v12 = vpop.f32.mrb[39].mxu1  ;;  %v4080_v28 = vrot.slane %v3587_v56, 4  ;;  %v7944_v2 = vld [vmem:[%s10848_s3 + $0x28] sm:$0xff]   ;;  %v3910_v24 = vsel %vm8225_vm2, %v3611_v36, %v3909_v54  ;;  %v4078_v20 = vrot.slane %v3590_v46, 5  ;;  %v3283_v29 = vpop.f32.mrb[73].mxu0  ;;  %v7952_v62 = vld [vmem:[%s10848_s3 + $0x70] sm:$0xff]   ;;  %v3276_v6 = vadd.f32 %v9730_v49, %v9576_v44 }
 0x211   : > { %v9784_v38 = vadd.f32 %v7290_v12, %v7289_v16  ;;  %v7898_v33 = vld [vmem:[#allocation2 + $0x184] sm:$0xff]   ;;  %3908 = vst.msk [vmem:[#allocation2 + $0x34] sm:$0xf] %vm224_vm3, %v3610_v52  ;;  %3911 = vst [vmem:[#allocation2 + $0x38] sm:$0x1] %v3910_v24  ;;  %v4091_v4 = vrot.slane %v4090_v13, 4  ;;  %v3592_v25 = vor.u32 %v3590_v46, %v3589_v58  ;;  %v3268_v54 = vadd.f32 %v9744_v3, %v9556_v30 }
 0x212   : > { %v3594_v56 = vrot.slane %v3589_v58, 4  ;;  %v4270_v39 = vld [vmem:[#allocation2 + $0x2f0] sm:$0xf]  ;;  %v9792_v36 = vpop.f32.mrb[74].mxu0  ;;  %v4079_v16 = vsel %vm8857_vm13, %v4077_v47, %v4078_v20  ;;  %v4081_v19 = vor.u32 %v4080_v28, %v4078_v20  ;;  %v3279_v12 = vadd.f32 %v9750_v7, %v9579_v31  ;;  %4828 = vrot.lane.b32.xlu1 %v7898_v33, %s8141_s14  ;;  %v7899_v46 = vld [vmem:[#allocation2 + $0x198] sm:$0xff]   ;;  %7359 = vmatpush3.bf16.msra.mxu1 %v7944_v2 }
 0x213   : > { %v9800_v13 = vpop.f32.mrb[75].mxu0  ;;  %v4278_v44 = vsel %vm8891_vm14, %v4091_v4, %v4277_v1  ;;  %v3593_v49 = vsel %vm8296_vm6, %v3585_v35, %v3592_v25  ;;  %4269 = vst.msk [vmem:[#allocation2 + $0x2ec] sm:$0xf] %vm224_vm3, %v4079_v16  ;;  %v3384_v30 = vmax.f32 %v3276_v6, 0.0  ;;  %v7954_v31 = vld [vmem:[%s10848_s3 + $0x30] sm:$0xff]   ;;  %v3382_v1 = vmax.f32 %v3268_v54, 0.0  ;;  %7360 = vmatprep.subr.bf16.mxu1 %v7952_v62 }
 0x214   : > { %v3903_v47 = vsel %vm8225_vm2, %v3594_v56, %v3902_v22  ;;  %4279 = vst [vmem:[#allocation2 + $0x304] sm:$0xf] %v4278_v44  ;;  %3901 = vst.msk [vmem:[#allocation2 + $0x20] sm:$0xf] %vm224_vm3, %v3593_v49  ;;  %v4082_v7 = vrot.slane %v4081_v19, 4  ;;  %v3385_v35 = vmax.f32 %v3279_v12, 0.0  ;;  %v3271_v22 = vadd.f32 %v9754_v40, %v9563_v43 }
 0x215   : > { %v7292_v52 = vpop.f32.mrb[40].mxu1  ;;  %3904 = vst [vmem:[#allocation2 + $0x24] sm:$0x1] %v3903_v47  ;;  %v7077_v28 = vpack.c.bf16 %v3384_v30, %v3384_v30  ;;  %v9819_v20 = vadd.f32 %v7610_v14, %v9618_v50  ;;  %v9822_v33 = vadd.f32 %v3283_v29, %v9592_v18  ;;  %v4287_v25 = vld [vmem:[#allocation2 + $0x324] sm:$0x8]  ;;  %v7075_v56 = vpack.c.bf16 %v3382_v1, %v3382_v1  ;;  %v9831_v14 = vpop.f32.mrb[76].mxu0 }
 0x216   : > { %v7293_v3 = vpop.f32.mrb[41].mxu1  ;;  %v4271_v4 = vsel %vm8891_vm14, %v4082_v7, %v4270_v39  ;;  %v7078_v6 = vpack.c.bf16 %v3385_v35, %v3385_v35  ;;  %v3383_v16 = vmax.f32 %v3271_v22, 0.0  ;;  %4830 = vrot.lane.b32.xlu1 %v7899_v46, %s8141_s14  ;;  %v4280_v62 = vld [vmem:[#allocation2 + $0x310] sm:$0x8]  ;;  %7361 = vmatpush3.bf16.msra.mxu1 %v7954_v31  ;;  %v3919_v29 = vld [vmem:[#allocation2 + $0x58] sm:$0xf] }
 0x217   : > { %v7295_v58 = vpop.f32.mrb[42].mxu1  ;;  %v9816_v24 = vadd.f32 %v7293_v3, %v7292_v52  ;;  %4272 = vst [vmem:[#allocation2 + $0x2f0] sm:$0xf] %v4271_v4  ;;  %v3630_v43 = vshrl.u32 %v7077_v28, 16  ;;  %v3633_v40 = vshll.u32 %v7077_v28, 16  ;;  %v3613_v39 = vshrl.u32 %v7075_v56, 16 }
 0x218   : > { %v7296_v2 = vpop.f32.mrb[43].mxu1  ;;  %4048 = vst.msk [vmem:[#allocation2 + $0x1c0] sm:$0xf] %vm224_vm3, %v7077_v28  ;;  %v3616_v19 = vshll.u32 %v7075_v56, 16  ;;  %4046 = vst.msk [vmem:[#allocation2 + $0x1ac] sm:$0xf] %vm224_vm3, %v7075_v56  ;;  %v9837_v3 = vpack.c.bf16 %v3383_v16, %v3383_v16 }
 0x219   : > { %v9828_v50 = vadd.f32 %v7296_v2, %v7295_v58  ;;  %v3638_v54 = vshrl.u32 %v7078_v6, 16  ;;  %v3641_v12 = vshll.u32 %v7078_v6, 16  ;;  %4049 = vst.msk [vmem:[#allocation2 + $0x1c4] sm:$0xf] %vm224_vm3, %v7078_v6  ;;  %v9835_v52 = vpop.f32.mrb[77].mxu0  ;;  %v3632_v44 = vrot.slane %v3630_v43, 7 }
 0x21a   : > { %v4101_v49 = vrot.slane %v3633_v40, 5  ;;  %v4102_v47 = vrot.slane %v3630_v43, 4  ;;  %v3912_v30 = vld [vmem:[#allocation2 + $0x44] sm:$0xf]  ;;  %v9839_v46 = vpop.f32.mrb[78].mxu0  ;;  %v9841_v31 = vrot.slane %v3613_v39, 7 }
 0x21b   : > { %v4092_v7 = vrot.slane %v3616_v19, 5  ;;  %v4093_v1 = vrot.slane %v3613_v39, 4  ;;  %v3640_v35 = vrot.slane %v3638_v54, 7  ;;  %v3923_v22 = vld [vmem:[#allocation2 + $0x60] sm:$0x1]  ;;  %v9845_v28 = vpop.f32.mrb[79].mxu0  ;;  %v3635_v2 = vor.u32 %v3633_v40, %v3632_v44 }
 0x21c   : > { %v3636_v4 = vrot.slane %v3632_v44, 4  ;;  %v4103_v56 = vor.u32 %v4102_v47, %v4101_v49  ;;  %v4288_v6 = vsel %vm8841_vm10, %v4101_v49, %v4287_v25  ;;  %4047 = vst.msk [vmem:[#allocation2 + $0x1b0] sm:$0xf] %vm224_vm3, %v9837_v3  ;;  %v7900_v43 = vld [vmem:[#allocation2 + $0x1c] sm:$0xff]   ;;  %v3618_v39 = vor.u32 %v3616_v19, %v9841_v31 }
 0x21d   : > { %v9843_v58 = vpop.f32.mrb[44].mxu1  ;;  %4289 = vst [vmem:[#allocation2 + $0x324] sm:$0x8] %v4288_v6  ;;  %v4094_v45 = vor.u32 %v4093_v1, %v4092_v7  ;;  %v4281_v40 = vsel %vm8841_vm10, %v4092_v7, %v4280_v62  ;;  %v3920_v25 = vsel %vm8314_vm7, %v3635_v2, %v3919_v29  ;;  %v3643_v47 = vor.u32 %v3641_v12, %v3640_v35  ;;  %v7962_v19 = vld [vmem:[%s10848_s3 + $0x78] sm:$0xff]   ;;  %v4291_v2 = vld [vmem:[#allocation2 + $0x32c] sm:$0xf] }
 0x21e   : > { %v9851_v16 = vpop.f32.mrb[45].mxu1  ;;  %v4104_v49 = vrot.slane %v4103_v56, 4  ;;  %4282 = vst [vmem:[#allocation2 + $0x310] sm:$0x8] %v4281_v40  ;;  %v3645_v34 = vrot.slane %v3640_v35, 4  ;;  %5018 = vrot.lane.b32.xlu0 %v7900_v43, %s8141_s14  ;;  %v3913_v62 = vsel %vm8314_vm7, %v3618_v39, %v3912_v30  ;;  %v4105_v1 = vrot.slane %v3641_v12, 5  ;;  %7362 = vmatprep.subr.bf16.mxu1 %v7962_v19 }
 0x21f   : > { %v9857_v44 = vpop.f32.mrb[46].mxu1  ;;  %3921 = vst [vmem:[#allocation2 + $0x58] sm:$0xf] %v3920_v25  ;;  %v4095_v7 = vrot.slane %v4094_v45, 4  ;;  %v4107_v6 = vrot.slane %v3638_v54, 4  ;;  %v3644_v29 = vsel %vm8296_vm6, %v3636_v4, %v3643_v47  ;;  %v3621_v56 = vshrl.u32 %v9837_v3, 16 }
 0x220   : > { %v9861_v61 = vpop.f32.mrb[47].mxu1  ;;  %3914 = vst [vmem:[#allocation2 + $0x44] sm:$0xf] %v3913_v62  ;;  %v3924_v35 = vsel %vm8225_vm2, %v3645_v34, %v3923_v22  ;;  %v3624_v43 = vshll.u32 %v9837_v3, 16  ;;  %v7903_v40 = vld [vmem:[#allocation2 + $0x30] sm:$0xff]   ;;  %v9875_v25 = vpop.f32.mrb[80].mxu0  ;;  %v4106_v45 = vsel %vm8857_vm13, %v4104_v49, %v4105_v1  ;;  %v3295_v62 = vadd.f32 %v9792_v36, %v9621_v55 }
 0x221   : > { %3922 = vst.msk [vmem:[#allocation2 + $0x5c] sm:$0xf] %vm224_vm3, %v3644_v29  ;;  %3925 = vst [vmem:[#allocation2 + $0x60] sm:$0x1] %v3924_v35  ;;  %v4108_v54 = vor.u32 %v4107_v6, %v4105_v1  ;;  %v3916_v12 = vld [vmem:[#allocation2 + $0x4c] sm:$0x1] }
 0x222   : > { %v11020_v30 = vmax.f32 %v9819_v20, 0.0  ;;  %v3386_v22 = vmax.f32 %v9822_v33, 0.0  ;;  %v9884_v4 = vpop.f32.mrb[81].mxu0  ;;  %4290 = vst.msk [vmem:[#allocation2 + $0x328] sm:$0xf] %vm224_vm3, %v4106_v45  ;;  %v3623_v3 = vrot.slane %v3621_v56, 7  ;;  %5020 = vrot.lane.b32.xlu0 %v7903_v40, %s8141_s14 }
 0x223   : > { %v4096_v39 = vrot.slane %v3624_v43, 5  ;;  %v4098_v47 = vrot.slane %v3621_v56, 4  ;;  %v4301_v19 = vld [vmem:[#allocation2 + $0x34c] sm:$0x8]  ;;  %v9890_v49 = vpop.f32.mrb[82].mxu0  ;;  %v4109_v20 = vrot.slane %v4108_v54, 4 }
 0x224   : > { %v7081_v34 = vpack.c.bf16 %v11020_v30, %v11020_v30  ;;  %v4284_v1 = vld [vmem:[#allocation2 + $0x318] sm:$0xf]  ;;  %v7079_v33 = vpack.c.bf16 %v3386_v22, %v3386_v22  ;;  %v7901_v35 = vld [vmem:[#allocation2 + $0x1ac] sm:$0xff]   ;;  %v3626_v45 = vor.u32 %v3624_v43, %v3623_v3  ;;  %v3628_v30 = vrot.slane %v3623_v3, 4  ;;  %v9897_v36 = vpop.f32.mrb[83].mxu0 }
 0x225   : > { %v4097_v56 = vsel %vm8857_vm13, %v4095_v7, %v4096_v39  ;;  %v4099_v18 = vor.u32 %v4098_v47, %v4096_v39  ;;  %v9895_v55 = vpop.f32.mrb[48].mxu1  ;;  %v4292_v40 = vsel %vm8891_vm14, %v4109_v20, %v4291_v2  ;;  %4832 = vrot.lane.b32.xlu1 %v7901_v35, %s8141_s14  ;;  %v11021_v43 = vrot.slane %v9841_v31, 4 }
 0x226   : > { %v3664_v6 = vshrl.u32 %v7081_v34, 16  ;;  %v3667_v29 = vshll.u32 %v7081_v34, 16  ;;  %4052 = vst.msk [vmem:[#allocation2 + $0x1e8] sm:$0xf] %vm224_vm3, %v7081_v34  ;;  %4283 = vst.msk [vmem:[#allocation2 + $0x314] sm:$0xf] %vm224_vm3, %v4097_v56  ;;  %v3917_v2 = vsel %vm8225_vm2, %v3628_v30, %v3916_v12 }
 0x227   : > { %4050 = vst.msk [vmem:[#allocation2 + $0x1d4] sm:$0xf] %vm224_vm3, %v7079_v33  ;;  %v9906_v7 = vpop.f32.mrb[49].mxu1  ;;  %4293 = vst [vmem:[#allocation2 + $0x32c] sm:$0xf] %v4292_v40  ;;  %v3627_v3 = vsel %vm8296_vm6, %v11021_v43, %v3626_v45  ;;  %v4100_v39 = vrot.slane %v4099_v18, 4 }
 0x228   : > { %v9902_v54 = vrot.slane %v3664_v6, 7  ;;  %v4119_v34 = vrot.slane %v3667_v29, 5  ;;  %v4120_v22 = vrot.slane %v3664_v6, 4  ;;  %v3647_v47 = vshrl.u32 %v7079_v33, 16  ;;  %v9914_v20 = vpop.f32.mrb[50].mxu1  ;;  %v7905_v6 = vld [vmem:[#allocation2 + $0x1c0] sm:$0xff]  }
 0x229   : > { %3915 = vst.msk [vmem:[#allocation2 + $0x48] sm:$0xf] %vm224_vm3, %v3627_v3  ;;  %3918 = vst [vmem:[#allocation2 + $0x4c] sm:$0x1] %v3917_v2  ;;  %v3926_v45 = vld [vmem:[#allocation2 + $0x6c] sm:$0xf]  ;;  %v4285_v18 = vsel %vm8891_vm14, %v4100_v39, %v4284_v1  ;;  %4834 = vrot.lane.b32.xlu1 %v7905_v6, %s8141_s14  ;;  %v9949_v6 = vadd.f32 %v9861_v61, %v9857_v44  ;;  %v3300_v44 = vadd.f32 %v9835_v52, %v9634_v48 }
 0x22a   : > { %v3669_v35 = vor.u32 %v3667_v29, %v9902_v54  ;;  %v4121_v40 = vor.u32 %v4120_v22, %v4119_v34  ;;  %v4302_v31 = vsel %vm8841_vm10, %v4119_v34, %v4301_v19  ;;  %v4294_v43 = vld [vmem:[#allocation2 + $0x338] sm:$0x8]  ;;  %v9921_v27 = vpop.f32.mrb[51].mxu1  ;;  %v9925_v12 = vrot.slane %v3647_v47, 7  ;;  %4286 = vst [vmem:[#allocation2 + $0x318] sm:$0xf] %v4285_v18 }
 0x22b   : > { %4303 = vst [vmem:[#allocation2 + $0x34c] sm:$0x8] %v4302_v31  ;;  %v3650_v30 = vshll.u32 %v7079_v33, 16  ;;  %v4111_v3 = vrot.slane %v3647_v47, 4  ;;  %v3389_v2 = vmax.f32 %v3295_v62, 0.0  ;;  %v3287_v19 = vadd.f32 %v9800_v13, %v9602_v37  ;;  %v9934_v34 = vpop.f32.mrb[84].mxu0 }
 0x22c   : > { %v3934_v29 = vsel %vm8314_vm7, %v3669_v35, %v3933_v41  ;;  %v9929_v22 = vrot.slane %v4121_v40, 4  ;;  %v7964_v1 = vld [vmem:[%s10848_s3 + $0x38] sm:$0xff]   ;;  %v9943_v62 = vadd.f32 %v9851_v16, %v9843_v58  ;;  %v9945_v47 = vpop.f32.mrb[85].mxu0  ;;  %v3308_v35 = vadd.f32 %v9831_v14, %v9664_v21  ;;  %v7971_v58 = vld [vmem:[%s10848_s3 + $0xc0] sm:$0xff]  }
 0x22d   : > { %3935 = vst [vmem:[#allocation2 + $0x80] sm:$0xf] %v3934_v29  ;;  %v3652_v33 = vor.u32 %v3650_v30, %v9925_v12  ;;  %v4110_v41 = vrot.slane %v3650_v30, 5  ;;  %11022 = vst [vmem:[#allocation6_spill] sm:$0xff] %v9945_v47  ;;  %v7082_v37 = vpack.c.bf16 %v3389_v2, %v3389_v2  ;;  %v3387_v13 = vmax.f32 %v3287_v19, 0.0  ;;  %v9953_v40 = vpop.f32.mrb[52].mxu1  ;;  %7363 = vmatpush3.bf16.msra.mxu1 %v7964_v1 }
 0x22e   : > { %v9955_v31 = vpop.f32.mrb[86].mxu0  ;;  %v9966_v21 = vpop.f32.mrb[53].mxu1  ;;  %v3392_v19 = vmax.f32 %v3308_v35, 0.0  ;;  %7460 = vmatprep.subr.bf16.mxu0 %v7971_v58  ;;  %v3390_v1 = vmax.f32 %v3300_v44, 0.0  ;;  %v9975_v48 = vadd.f32 %v9839_v46, %v9684_v63  ;;  %v9979_v52 = vadd.f32 %v9845_v28, %v9638_v42  ;;  %v7973_v58 = vld [vmem:[%s10848_s3 + $0x80] sm:$0xff]  }
 0x22f   : > { %11023 = vst [vmem:[#allocation15_spill] sm:$0xff] %v9955_v31  ;;  %v3927_v16 = vsel %vm8314_vm7, %v3652_v33, %v3926_v45  ;;  %v4112_v18 = vor.u32 %v4111_v3, %v4110_v41  ;;  %v4295_v61 = vsel %vm8841_vm10, %v4110_v41, %v4294_v43  ;;  %v9968_v14 = vpop.f32.mrb[87].mxu0  ;;  %v3672_v30 = vshrl.u32 %v7082_v37, 16  ;;  %4053 = vst.msk [vmem:[#allocation2 + $0x1ec] sm:$0xf] %vm224_vm3, %v7082_v37  ;;  %v9971_v45 = vpop.f32.mrb[54].mxu1 }
 0x230   : > { %11024 = vst [vmem:[#allocation16_spill] sm:$0xff] %v9968_v14  ;;  %3928 = vst [vmem:[#allocation2 + $0x6c] sm:$0xf] %v3927_v16  ;;  %v3675_v29 = vshll.u32 %v7082_v37, 16  ;;  %v7080_v2 = vpack.c.bf16 %v3387_v13, %v3387_v13  ;;  %v3937_v43 = vld [vmem:[#allocation2 + $0x88] sm:$0x1]  ;;  %v7085_v46 = vpack.c.bf16 %v3392_v19, %v3392_v19  ;;  %7461 = vmatpush3.bf16.msra.mxu0 %v7973_v58 }
 0x231   : > { %4296 = vst [vmem:[#allocation2 + $0x338] sm:$0x8] %v4295_v61  ;;  %v4113_v3 = vrot.slane %v4112_v18, 4  ;;  %v7906_v33 = vld [vmem:[#allocation2 + $0x44] sm:$0xff]   ;;  %v9981_v41 = vpop.f32.mrb[55].mxu1  ;;  %v3674_v37 = vrot.slane %v3672_v30, 7  ;;  %v9987_v61 = vpack.c.bf16 %v3390_v1, %v3390_v1 }
 0x232   : > { %v4123_v13 = vrot.slane %v3675_v29, 5  ;;  %v4125_v35 = vrot.slane %v3672_v30, 4  ;;  %v3655_v16 = vshrl.u32 %v7080_v2, 16  ;;  %4051 = vst.msk [vmem:[#allocation2 + $0x1d8] sm:$0xf] %vm224_vm3, %v7080_v2  ;;  %v3658_v63 = vshll.u32 %v7080_v2, 16  ;;  %5022 = vrot.lane.b32.xlu0 %v7906_v33, %s8141_s14 }
 0x233   : > { %v4305_v18 = vld [vmem:[#allocation2 + $0x354] sm:$0xf]  ;;  %v9991_v28 = vpop.f32.mrb[88].mxu0  ;;  %v3677_v44 = vor.u32 %v3675_v29, %v3674_v37  ;;  %v3679_v30 = vrot.slane %v3674_v37, 4  ;;  %v3698_v42 = vshrl.u32 %v7085_v46, 16  ;;  %v7908_v29 = vld [vmem:[#allocation2 + $0x58] sm:$0xff]  }
 0x234   : > { %11025 = vst [vmem:[#allocation17_spill] sm:$0xff] %v9991_v28  ;;  %v4124_v39 = vsel %vm8857_vm13, %v9929_v22, %v4123_v13  ;;  %v4126_v56 = vor.u32 %v4125_v35, %v4123_v13  ;;  %v3930_v14 = vld [vmem:[#allocation2 + $0x74] sm:$0x1]  ;;  %v9996_v31 = vpop.f32.mrb[89].mxu0  ;;  %v3657_v2 = vrot.slane %v3655_v16, 7  ;;  %v4114_v19 = vrot.slane %v3658_v63, 5 }
 0x235   : > { %11026 = vst [vmem:[#allocation18_spill] sm:$0xff] %v9996_v31  ;;  %4304 = vst.msk [vmem:[#allocation2 + $0x350] sm:$0xf] %vm224_vm3, %v4124_v39  ;;  %v4116_v1 = vrot.slane %v3655_v16, 4  ;;  %v4315_v33 = vld [vmem:[#allocation2 + $0x374] sm:$0x8]  ;;  %v3938_v39 = vsel %vm8225_vm2, %v3679_v30, %v3937_v43 }
 0x236   : > { %4056 = vst.msk [vmem:[#allocation2 + $0x210] sm:$0xf] %vm224_vm3, %v7085_v46  ;;  %4054 = vst.msk [vmem:[#allocation2 + $0x1fc] sm:$0xf] %vm224_vm3, %v9987_v61  ;;  %v10002_v37 = vpop.f32.mrb[90].mxu0  ;;  %v11028_v22 = vrot.slane %v9902_v54, 4  ;;  %5024 = vrot.lane.b32.xlu0 %v7908_v29, %s8141_s14 }
 0x237   : > { %11027 = vst [vmem:[#allocation19_spill] sm:$0xff] %v10002_v37  ;;  %v4127_v35 = vrot.slane %v4126_v56, 4  ;;  %v4298_v16 = vld [vmem:[#allocation2 + $0x340] sm:$0xf]  ;;  %v3701_v58 = vshll.u32 %v7085_v46, 16  ;;  %v10010_v31 = vpop.f32.mrb[56].mxu1  ;;  %v4115_v56 = vsel %vm8857_vm13, %v4113_v3, %v4114_v19  ;;  %v4117_v46 = vor.u32 %v4116_v1, %v4114_v19 }
 0x238   : > { %v3678_v13 = vsel %vm8296_vm6, %v11028_v22, %v3677_v44  ;;  %11029 = vst [vmem:[#allocation20_spill] sm:$0xff] %v10010_v31  ;;  %v10012_v28 = vpop.f32.mrb[91].mxu0  ;;  %v7976_v47 = vld [vmem:[%s10848_s3 + $0x100] sm:$0xff]   ;;  %v7978_v54 = vld [vmem:[%s10848_s3 + $0xc8] sm:$0xff]   ;;  %3939 = vst [vmem:[#allocation2 + $0x88] sm:$0x1] %v3938_v39  ;;  %v3660_v44 = vor.u32 %v3658_v63, %v3657_v2 }
 0x239   : > { %11030 = vst [vmem:[#allocation21_spill] sm:$0xff] %v10012_v28  ;;  %3936 = vst.msk [vmem:[#allocation2 + $0x84] sm:$0xf] %vm224_vm3, %v3678_v13  ;;  %v3662_v43 = vrot.slane %v3657_v2, 4  ;;  %v3947_v30 = vld [vmem:[#allocation2 + $0xa8] sm:$0xf]  ;;  %v4306_v22 = vsel %vm8891_vm14, %v4127_v35, %v4305_v18  ;;  %7632 = vmatprep.subr.bf16.mxu1 %v7976_v47  ;;  %7462 = vmatprep.subr.bf16.mxu0 %v7978_v54 }
 0x23a   : > { %4297 = vst.msk [vmem:[#allocation2 + $0x33c] sm:$0xf] %vm224_vm3, %v4115_v56  ;;  %v10027_v28 = vrot.slane %v3698_v42, 7  ;;  %v4137_v37 = vrot.slane %v3701_v58, 5  ;;  %v4138_v31 = vrot.slane %v3698_v42, 4  ;;  %v10029_v13 = vpop.f32.mrb[57].mxu1 }
 0x23b   : > { %4307 = vst [vmem:[#allocation2 + $0x354] sm:$0xf] %v4306_v22  ;;  %v11031_v3 = vrot.slane %v9925_v12, 4  ;;  %v3931_v2 = vsel %vm8225_vm2, %v3662_v43, %v3930_v14  ;;  %v4118_v18 = vrot.slane %v4117_v46, 4  ;;  %v3681_v19 = vshrl.u32 %v9987_v61, 16  ;;  %v7907_v1 = vld [vmem:[#allocation2 + $0x1d4] sm:$0xff]  }
 0x23c   : > { %v10038_v29 = vpop.f32.mrb[58].mxu1  ;;  %3932 = vst [vmem:[#allocation2 + $0x74] sm:$0x1] %v3931_v2  ;;  %v3703_v47 = vor.u32 %v3701_v58, %v10027_v28  ;;  %v4139_v12 = vor.u32 %v4138_v31, %v4137_v37  ;;  %v4316_v39 = vsel %vm8841_vm10, %v4137_v37, %v4315_v33  ;;  %v3940_v35 = vld [vmem:[#allocation2 + $0x94] sm:$0xf]  ;;  %v3684_v56 = vshll.u32 %v9987_v61, 16  ;;  %4836 = vrot.lane.b32.xlu1 %v7907_v1, %s8141_s14 }
 0x23d   : > { %v3661_v63 = vsel %vm8296_vm6, %v11031_v3, %v3660_v44  ;;  %v4308_v54 = vld [vmem:[#allocation2 + $0x360] sm:$0x8]  ;;  %v10045_v14 = vpop.f32.mrb[59].mxu1  ;;  %v4299_v44 = vsel %vm8891_vm14, %v4118_v18, %v4298_v16  ;;  %4317 = vst [vmem:[#allocation2 + $0x374] sm:$0x8] %v4316_v39  ;;  %v10049_v43 = vrot.slane %v3681_v19, 7  ;;  %v10065_v2 = vadd.f32 %v9906_v7, %v9895_v55 }
 0x23e   : > { %3929 = vst.msk [vmem:[#allocation2 + $0x70] sm:$0xf] %vm224_vm3, %v3661_v63  ;;  %v4129_v46 = vrot.slane %v3681_v19, 4  ;;  %v10053_v58 = vpop.f32.mrb[92].mxu0  ;;  %4300 = vst [vmem:[#allocation2 + $0x340] sm:$0xf] %v4299_v44  ;;  %v3948_v31 = vsel %vm8314_vm7, %v3703_v47, %v3947_v30  ;;  %v3163_v44 = vadd.f32 %v9775_v17, %v9658_v60 }
 0x23f   : > { %v4140_v33 = vrot.slane %v4139_v12, 4  ;;  %v11032_v37 = vmax.f32 %v9975_v48, 0.0  ;;  %v3391_v16 = vmax.f32 %v9979_v52, 0.0  ;;  %3949 = vst [vmem:[#allocation2 + $0xa8] sm:$0xf] %v3948_v31  ;;  %v3686_v3 = vor.u32 %v3684_v56, %v10049_v43  ;;  %v7909_v18 = vld [vmem:[#allocation2 + $0x1e8] sm:$0xff]  }
 0x240   : > { %v4128_v63 = vrot.slane %v3684_v56, 5  ;;  %v10067_v19 = vpop.f32.mrb[93].mxu0  ;;  %v10072_v52 = vadd.f32 %v9921_v27, %v9914_v20  ;;  %v10074_v47 = vpop.f32.mrb[60].mxu1  ;;  %v3951_v7 = vld [vmem:[#allocation2 + $0xb0] sm:$0x1]  ;;  %4838 = vrot.lane.b32.xlu1 %v7909_v18, %s8141_s14 }
 0x241   : > { %v7086_v22 = vpack.c.bf16 %v11032_v37, %v11032_v37  ;;  %v7084_v48 = vpack.c.bf16 %v3391_v16, %v3391_v16  ;;  %v3941_v12 = vsel %vm8314_vm7, %v3686_v3, %v3940_v35  ;;  %v10083_v56 = vpop.f32.mrb[61].mxu1  ;;  %v10085_v31 = vpop.f32.mrb[94].mxu0  ;;  %v4319_v60 = vld [vmem:[#allocation2 + $0x37c] sm:$0xf]  ;;  %v3324_v16 = vadd.f32 %v9875_v25, %v3163_v44  ;;  %v7981_v44 = vld [vmem:[%s10848_s3 + $0x88] sm:$0xff]  }
 0x242   : > { %v4130_v39 = vor.u32 %v4129_v46, %v4128_v63  ;;  %v4309_v55 = vsel %vm8841_vm10, %v4128_v63, %v4308_v54  ;;  %11033 = vst [vmem:[#allocation22_spill] sm:$0xff] %v10085_v31  ;;  %3942 = vst [vmem:[#allocation2 + $0x94] sm:$0xf] %v3941_v12  ;;  %v10088_v46 = vpop.f32.mrb[62].mxu1  ;;  %v10090_v54 = vpop.f32.mrb[95].mxu0  ;;  %v3316_v3 = vadd.f32 %v9884_v4, %v9732_v23  ;;  %v11035_v23 = vrot.slane %v10027_v28, 4 }
 0x243   : > { %v3706_v30 = vshrl.u32 %v7086_v22, 16  ;;  %v3709_v1 = vshll.u32 %v7086_v22, 16  ;;  %4057 = vst.msk [vmem:[#allocation2 + $0x214] sm:$0xf] %vm224_vm3, %v7086_v22  ;;  %4310 = vst [vmem:[#allocation2 + $0x360] sm:$0x8] %v4309_v55  ;;  %7463 = vmatpush3.bf16.msra.mxu0 %v7981_v44 }
 0x244   : > { %v3689_v35 = vshrl.u32 %v7084_v48, 16  ;;  %4055 = vst.msk [vmem:[#allocation2 + $0x200] sm:$0xf] %vm224_vm3, %v7084_v48  ;;  %11034 = vst [vmem:[#allocation23_spill] sm:$0xff] %v10090_v54  ;;  %v4131_v22 = vrot.slane %v4130_v39, 4  ;;  %v3692_v17 = vshll.u32 %v7084_v48, 16 }
 0x245   : > { %v3708_v27 = vrot.slane %v3706_v30, 7  ;;  %v4141_v20 = vrot.slane %v3709_v1, 5  ;;  %v4143_v37 = vrot.slane %v3706_v30, 4  ;;  %v7910_v63 = vld [vmem:[#allocation2 + $0x6c] sm:$0xff]   ;;  %v10095_v18 = vpop.f32.mrb[63].mxu1  ;;  %v3396_v31 = vmax.f32 %v3324_v16, 0.0 }
 0x246   : > { %v3944_v42 = vld [vmem:[#allocation2 + $0x9c] sm:$0x1]  ;;  %v3691_v39 = vrot.slane %v3689_v35, 7  ;;  %v4132_v54 = vrot.slane %v3692_v17, 5  ;;  %v4134_v48 = vrot.slane %v3689_v35, 4  ;;  %5026 = vrot.lane.b32.xlu0 %v7910_v63, %s8141_s14  ;;  %v7913_v35 = vld [vmem:[#allocation2 + $0x80] sm:$0xff]   ;;  %v3166_v63 = vadd.f32 %v9784_v38, %v9662_v11 }
 0x247   : > { %v3711_v12 = vor.u32 %v3709_v1, %v3708_v27  ;;  %v3713_v30 = vrot.slane %v3708_v27, 4  ;;  %v4142_v55 = vsel %vm8857_vm13, %v4140_v33, %v4141_v20  ;;  %v4144_v61 = vor.u32 %v4143_v37, %v4141_v20 }
 0x248   : > { %4318 = vst.msk [vmem:[#allocation2 + $0x378] sm:$0xf] %vm224_vm3, %v4142_v55  ;;  %v3394_v33 = vmax.f32 %v3316_v3, 0.0  ;;  %v3694_v27 = vor.u32 %v3692_v17, %v3691_v39  ;;  %v3696_v20 = vrot.slane %v3691_v39, 4  ;;  %v4133_v28 = vsel %vm8857_vm13, %v4131_v22, %v4132_v54  ;;  %v3961_v39 = vld [vmem:[#allocation2 + $0xd0] sm:$0xf] }
 0x249   : > { %v3712_v25 = vsel %vm8296_vm6, %v11035_v23, %v3711_v12  ;;  %v3952_v4 = vsel %vm8225_vm2, %v3713_v30, %v3951_v7  ;;  %v4145_v1 = vrot.slane %v4144_v61, 4  ;;  %v4135_v37 = vor.u32 %v4134_v48, %v4132_v54  ;;  %4311 = vst.msk [vmem:[#allocation2 + $0x364] sm:$0xf] %vm224_vm3, %v4133_v28  ;;  %v4312_v61 = vld [vmem:[#allocation2 + $0x368] sm:$0xf]  ;;  %v7915_v28 = vld [vmem:[#allocation2 + $0x2ec] sm:$0xff]  }
 0x24a   : > { %3950 = vst.msk [vmem:[#allocation2 + $0xac] sm:$0xf] %vm224_vm3, %v3712_v25  ;;  %3953 = vst [vmem:[#allocation2 + $0xb0] sm:$0x1] %v3952_v4  ;;  %v7089_v7 = vpack.c.bf16 %v3396_v31, %v3396_v31  ;;  %v7087_v3 = vpack.c.bf16 %v3394_v33, %v3394_v33  ;;  %v11036_v17 = vrot.slane %v10049_v43, 4  ;;  %v3945_v54 = vsel %vm8225_vm2, %v3696_v20, %v3944_v42  ;;  %v7983_v25 = vld [vmem:[%s10848_s3 + $0xd0] sm:$0xff]  }
 0x24b   : > { %v4320_v16 = vsel %vm8891_vm14, %v4145_v1, %v4319_v60  ;;  %v4136_v12 = vrot.slane %v4135_v37, 4  ;;  %v4329_v60 = vld [vmem:[#allocation2 + $0x39c] sm:$0x8]  ;;  %v3158_v30 = vadd.f32 %v9724_v59, %v9654_v26  ;;  %5028 = vrot.lane.b32.xlu0 %v7913_v35, %s8141_s14  ;;  %3946 = vst [vmem:[#allocation2 + $0x9c] sm:$0x1] %v3945_v54  ;;  %v3327_v26 = vadd.f32 %v9890_v49, %v3166_v63 }
 0x24c   : > { %4321 = vst [vmem:[#allocation2 + $0x37c] sm:$0xf] %v4320_v16  ;;  %v3695_v22 = vsel %vm8296_vm6, %v11036_v17, %v3694_v27  ;;  %v7911_v31 = vld [vmem:[#allocation2 + $0x1fc] sm:$0xff]   ;;  %v3732_v11 = vshrl.u32 %v7089_v7, 16  ;;  %v3735_v38 = vshll.u32 %v7089_v7, 16  ;;  %v3715_v43 = vshrl.u32 %v7087_v3, 16  ;;  %7464 = vmatprep.subr.bf16.mxu0 %v7983_v25 }
 0x24d   : > { %3943 = vst.msk [vmem:[#allocation2 + $0x98] sm:$0xf] %vm224_vm3, %v3695_v22  ;;  %4060 = vst.msk [vmem:[#allocation2 + $0x238] sm:$0xf] %vm224_vm3, %v7089_v7  ;;  %v3718_v55 = vshll.u32 %v7087_v3, 16  ;;  %v4313_v42 = vsel %vm8891_vm14, %v4136_v12, %v4312_v61  ;;  %v3319_v59 = vadd.f32 %v9897_v36, %v3158_v30  ;;  %v10136_v23 = vadd.f32 %v9966_v21, %v9953_v40  ;;  %v7985_v40 = vld [vmem:[%s10848_s3 + $0x90] sm:$0xff]  }
 0x24e   : > { %4058 = vst.msk [vmem:[#allocation2 + $0x224] sm:$0xf] %vm224_vm3, %v7087_v3  ;;  %v4322_v48 = vld [vmem:[#allocation2 + $0x388] sm:$0x8]  ;;  %4840 = vrot.lane.b32.xlu1 %v7911_v31, %s8141_s14  ;;  %4314 = vst [vmem:[#allocation2 + $0x368] sm:$0xf] %v4313_v42  ;;  %7465 = vmatpush3.bf16.msra.mxu0 %v7985_v40  ;;  %v3179_v42 = vadd.f32 %v9943_v62, %v9676_v53  ;;  %v3174_v53 = vadd.f32 %v9828_v50, %v9672_v9 }
 0x24f   : > { %v10142_v4 = vrot.slane %v3732_v11, 7  ;;  %v4155_v1 = vrot.slane %v3735_v38, 5  ;;  %v4156_v33 = vrot.slane %v3732_v11, 4  ;;  %v10144_v44 = vrot.slane %v3715_v43, 7  ;;  %v3954_v61 = vld [vmem:[#allocation2 + $0xbc] sm:$0xf] }
 0x250   : > { %v4146_v49 = vrot.slane %v3718_v55, 5  ;;  %v4147_v27 = vrot.slane %v3715_v43, 4  ;;  %v3397_v36 = vmax.f32 %v3327_v26, 0.0  ;;  %v3395_v20 = vmax.f32 %v3319_v59, 0.0  ;;  %v7986_v7 = vld [vmem:[%s10848_s3 + $0xd8] sm:$0xff]   ;;  %v7917_v31 = vld [vmem:[#allocation2 + $0x210] sm:$0xff]  }
 0x251   : > { %v3737_v21 = vor.u32 %v3735_v38, %v10142_v4  ;;  %v3738_v37 = vrot.slane %v10142_v4, 4  ;;  %v4157_v35 = vor.u32 %v4156_v33, %v4155_v1  ;;  %v4330_v16 = vsel %vm8841_vm10, %v4155_v1, %v4329_v60  ;;  %7466 = vmatprep.subr.bf16.mxu0 %v7986_v7  ;;  %v7987_v11 = vld [vmem:[%s10848_s3 + $0x98] sm:$0xff]   ;;  %v7989_v9 = vld [vmem:[%s10848_s3 + $0xe0] sm:$0xff]  }
 0x252   : > { %4331 = vst [vmem:[#allocation2 + $0x39c] sm:$0x8] %v4330_v16  ;;  %v3720_v3 = vor.u32 %v3718_v55, %v10144_v44  ;;  %v3721_v63 = vrot.slane %v10144_v44, 4  ;;  %v4148_v17 = vor.u32 %v4147_v27, %v4146_v49  ;;  %v4323_v22 = vsel %vm8841_vm10, %v4146_v49, %v4322_v48  ;;  %5210 = vrot.lane.b32.xlu1 %v7915_v28, %s8141_s14  ;;  %v3965_v1 = vld [vmem:[#allocation2 + $0xd8] sm:$0x1]  ;;  %v7919_v28 = vld [vmem:[#allocation2 + $0x300] sm:$0xff]  }
 0x253   : > { %v3962_v54 = vsel %vm8314_vm7, %v3737_v21, %v3961_v39  ;;  %v4158_v12 = vrot.slane %v4157_v35, 4  ;;  %4324 = vst [vmem:[#allocation2 + $0x388] sm:$0x8] %v4323_v22  ;;  %v7090_v60 = vpack.c.bf16 %v3397_v36, %v3397_v36  ;;  %v7088_v30 = vpack.c.bf16 %v3395_v20, %v3395_v20  ;;  %v3958_v20 = vld [vmem:[#allocation2 + $0xc4] sm:$0x1]  ;;  %7467 = vmatpush3.bf16.msra.mxu0 %v7987_v11  ;;  %v11037_v21 = vld [vmem:[#allocation6_spill] sm:$0xff] }
 0x254   : > { %3963 = vst [vmem:[#allocation2 + $0xd0] sm:$0xf] %v3962_v54  ;;  %v3955_v38 = vsel %vm8314_vm7, %v3720_v3, %v3954_v61  ;;  %v4149_v43 = vrot.slane %v4148_v17, 4  ;;  %v10170_v55 = vadd.f32 %v9981_v41, %v9971_v45  ;;  %v7916_v39 = vld [vmem:[#allocation2 + $0x94] sm:$0xff]   ;;  %v3340_v33 = vadd.f32 %v9934_v34, %v3179_v42  ;;  %v4333_v34 = vld [vmem:[#allocation2 + $0x3a4] sm:$0xf]  ;;  %7468 = vmatprep.subr.bf16.mxu0 %v7989_v9 }
 0x255   : > { %3956 = vst [vmem:[#allocation2 + $0xbc] sm:$0xf] %v3955_v38  ;;  %v3740_v48 = vshrl.u32 %v7090_v60, 16  ;;  %v3743_v26 = vshll.u32 %v7090_v60, 16  ;;  %4061 = vst.msk [vmem:[#allocation2 + $0x23c] sm:$0xf] %vm224_vm3, %v7090_v60  ;;  %v3171_v45 = vadd.f32 %v9816_v24, %v9668_v5  ;;  %v3182_v41 = vadd.f32 %v9949_v6, %v9681_v10  ;;  %5030 = vrot.lane.b32.xlu0 %v7916_v39, %s8141_s14 }
 0x256   : > { %v3723_v59 = vshrl.u32 %v7088_v30, 16  ;;  %v3726_v25 = vshll.u32 %v7088_v30, 16  ;;  %4059 = vst.msk [vmem:[#allocation2 + $0x228] sm:$0xf] %vm224_vm3, %v7088_v30  ;;  %4842 = vrot.lane.b32.xlu1 %v7917_v31, %s8141_s14  ;;  %v3400_v24 = vmax.f32 %v3340_v33, 0.0  ;;  %v7918_v6 = vld [vmem:[#allocation2 + $0xa8] sm:$0xff]   ;;  %v10244_v9 = vadd.f32 %v10045_v14, %v10038_v29 }
 0x257   : > { %v3742_v62 = vrot.slane %v3740_v48, 7  ;;  %v4159_v49 = vrot.slane %v3743_v26, 5  ;;  %v4161_v27 = vrot.slane %v3740_v48, 4  ;;  %v3332_v10 = vadd.f32 %v11037_v21, %v3171_v45  ;;  %v7990_v50 = vld [vmem:[%s10848_s3 + $0xa0] sm:$0xff]   ;;  %v4326_v3 = vld [vmem:[#allocation2 + $0x390] sm:$0xf] }
 0x258   : > { %v3725_v36 = vrot.slane %v3723_v59, 7  ;;  %v4150_v40 = vrot.slane %v3726_v25, 5  ;;  %v4152_v5 = vrot.slane %v3723_v59, 4  ;;  %v7993_v17 = vld [vmem:[%s10848_s3 + $0xe8] sm:$0xff]   ;;  %v7093_v38 = vpack.c.bf16 %v3400_v24, %v3400_v24  ;;  %v7920_v42 = vld [vmem:[#allocation2 + $0x198] sm:$0xff]   ;;  %7469 = vmatpush3.bf16.msra.mxu0 %v7990_v50  ;;  %v7996_v59 = vld [vmem:[%s10848_s3 + $0xf0] sm:$0xff]  }
 0x259   : > { %v3745_v35 = vor.u32 %v3743_v26, %v3742_v62  ;;  %v3747_v16 = vrot.slane %v3742_v62, 4  ;;  %v4160_v61 = vsel %vm8857_vm13, %v4158_v12, %v4159_v49  ;;  %v4162_v7 = vor.u32 %v4161_v27, %v4159_v49  ;;  %5032 = vrot.lane.b32.xlu0 %v7918_v6, %s8141_s14  ;;  %7470 = vmatprep.subr.bf16.mxu0 %v7993_v17  ;;  %v3975_v62 = vld [vmem:[#allocation2 + $0xf8] sm:$0xf]  ;;  %v4343_v49 = vld [vmem:[#allocation2 + $0x3c4] sm:$0x8] }
 0x25a   : > { %4332 = vst.msk [vmem:[#allocation2 + $0x3a0] sm:$0xf] %vm224_vm3, %v4160_v61  ;;  %v3728_v22 = vor.u32 %v3726_v25, %v3725_v36  ;;  %v3730_v54 = vrot.slane %v3725_v36, 4  ;;  %v4151_v60 = vsel %vm8857_vm13, %v4149_v43, %v4150_v40  ;;  %v4153_v30 = vor.u32 %v4152_v5, %v4150_v40  ;;  %5212 = vrot.lane.b32.xlu1 %v7919_v28, %s8141_s14  ;;  %v7994_v43 = vld [vmem:[%s10848_s3 + $0xa8] sm:$0xff]   ;;  %v4336_v24 = vld [vmem:[#allocation2 + $0x3b0] sm:$0x8] }
 0x25b   : > { %v3746_v12 = vsel %vm8296_vm6, %v3738_v37, %v3745_v35  ;;  %v3966_v31 = vsel %vm8225_vm2, %v3747_v16, %v3965_v1  ;;  %v4163_v11 = vrot.slane %v4162_v7, 4  ;;  %4325 = vst.msk [vmem:[#allocation2 + $0x38c] sm:$0xf] %vm224_vm3, %v4151_v60  ;;  %v3398_v48 = vmax.f32 %v3332_v10, 0.0  ;;  %4064 = vst.msk [vmem:[#allocation2 + $0x260] sm:$0xf] %vm224_vm3, %v7093_v38 }
 0x25c   : > { %3964 = vst.msk [vmem:[#allocation2 + $0xd4] sm:$0xf] %vm224_vm3, %v3746_v12  ;;  %3967 = vst [vmem:[#allocation2 + $0xd8] sm:$0x1] %v3966_v31  ;;  %v3729_v4 = vsel %vm8296_vm6, %v3721_v63, %v3728_v22  ;;  %v3959_v37 = vsel %vm8225_vm2, %v3730_v54, %v3958_v20  ;;  %v4154_v39 = vrot.slane %v4153_v30, 4  ;;  %v3766_v44 = vshrl.u32 %v7093_v38, 16  ;;  %7471 = vmatpush3.bf16.msra.mxu0 %v7994_v43 }
 0x25d   : > { %v7921_v26 = vld [vmem:[#allocation2 + $0x224] sm:$0xff]   ;;  %v4334_v25 = vsel %vm8891_vm14, %v4163_v11, %v4333_v34  ;;  %3957 = vst.msk [vmem:[#allocation2 + $0xc0] sm:$0xf] %vm224_vm3, %v3729_v4  ;;  %3960 = vst [vmem:[#allocation2 + $0xc4] sm:$0x1] %v3959_v37  ;;  %v3769_v1 = vshll.u32 %v7093_v38, 16  ;;  %v7091_v27 = vpack.c.bf16 %v3398_v48, %v3398_v48  ;;  %5402 = vrot.lane.b32.xlu0 %v7920_v42, %s8141_s14  ;;  %7472 = vmatprep.subr.bf16.mxu0 %v7996_v59 }
 0x25e   : > { %v11038_v63 = vld [vmem:[#allocation15_spill] sm:$0xff]  ;;  %4335 = vst [vmem:[#allocation2 + $0x3a4] sm:$0xf] %v4334_v25  ;;  %v4327_v45 = vsel %vm8891_vm14, %v4154_v39, %v4326_v3  ;;  %v11039_v36 = vld [vmem:[#allocation16_spill] sm:$0xff]  ;;  %v10235_v40 = vrot.slane %v3766_v44, 7  ;;  %4844 = vrot.lane.b32.xlu1 %v7921_v26, %s8141_s14  ;;  %v7925_v50 = vld [vmem:[#allocation2 + $0x314] sm:$0xff]  }
 0x25f   : > { %v3343_v33 = vadd.f32 %v11038_v63, %v3182_v41  ;;  %v3335_v20 = vadd.f32 %v11039_v36, %v3174_v53  ;;  %v11040_v28 = vld [vmem:[#allocation20_spill] sm:$0xff]  ;;  %4328 = vst [vmem:[#allocation2 + $0x390] sm:$0xf] %v4327_v45  ;;  %v4173_v5 = vrot.slane %v3769_v1, 5  ;;  %v4174_v41 = vrot.slane %v3766_v44, 4  ;;  %v7997_v53 = vld [vmem:[%s10848_s3 + $0xb0] sm:$0xff]  }
 0x260   : > { %v10232_v34 = vadd.f32 %v10029_v13, %v11040_v28  ;;  %v3749_v10 = vshrl.u32 %v7091_v27, 16  ;;  %v3752_v6 = vshll.u32 %v7091_v27, 16  ;;  %4062 = vst.msk [vmem:[#allocation2 + $0x24c] sm:$0xf] %vm224_vm3, %v7091_v27  ;;  %v3771_v35 = vor.u32 %v3769_v1, %v10235_v40  ;;  %v3968_v3 = vld [vmem:[#allocation2 + $0xe4] sm:$0xf]  ;;  %7473 = vmatpush3.bf16.msra.mxu0 %v7997_v53 }
 0x261   : > { %v3401_v21 = vmax.f32 %v3343_v33, 0.0  ;;  %v3399_v13 = vmax.f32 %v3335_v20, 0.0  ;;  %v3772_v16 = vrot.slane %v10235_v40, 4  ;;  %v4175_v61 = vor.u32 %v4174_v41, %v4173_v5  ;;  %v7999_v17 = vld [vmem:[%s10848_s3 + $0xf8] sm:$0xff]   ;;  %v3979_v63 = vld [vmem:[#allocation2 + $0x100] sm:$0x1] }
 0x262   : > { %v4344_v7 = vsel %vm8841_vm10, %v4173_v5, %v4343_v49  ;;  %v10253_v22 = vrot.slane %v3749_v10, 7  ;;  %v4164_v29 = vrot.slane %v3752_v6, 5  ;;  %v4165_v14 = vrot.slane %v3749_v10, 4  ;;  %v11041_v31 = vld [vmem:[#allocation10_spill] sm:$0xff]  ;;  %5214 = vrot.lane.b32.xlu1 %v7925_v50, %s8141_s14  ;;  %7474 = vmatprep.subr.bf16.mxu0 %v7999_v17  ;;  %v11042_v33 = vld [vmem:[#allocation17_spill] sm:$0xff] }
 0x263   : > { %4345 = vst [vmem:[#allocation2 + $0x3c4] sm:$0x8] %v4344_v7  ;;  %v7094_v54 = vpack.c.bf16 %v3401_v21, %v3401_v21  ;;  %v3976_v60 = vsel %vm8314_vm7, %v3771_v35, %v3975_v62  ;;  %v4176_v30 = vrot.slane %v4175_v61, 4  ;;  %v7092_v12 = vpack.c.bf16 %v3399_v13, %v3399_v13  ;;  %v7927_v38 = vld [vmem:[#allocation2 + $0x238] sm:$0xff]   ;;  %v11043_v62 = vld [vmem:[#allocation8_spill] sm:$0xff] }
 0x264   : > { %v3195_v11 = vadd.f32 %v10136_v23, %v11041_v31  ;;  %v8000_v42 = vld [vmem:[%s10848_s3 + $0xb8] sm:$0xff]   ;;  %3977 = vst [vmem:[#allocation2 + $0xf8] sm:$0xf] %v3976_v60  ;;  %v3754_v43 = vor.u32 %v3752_v6, %v10253_v22  ;;  %v3755_v4 = vrot.slane %v10253_v22, 4  ;;  %v4166_v37 = vor.u32 %v4165_v14, %v4164_v29  ;;  %v3972_v5 = vld [vmem:[#allocation2 + $0xec] sm:$0x1] }
 0x265   : > { %v4337_v39 = vsel %vm8841_vm10, %v4164_v29, %v4336_v24  ;;  %4065 = vst.msk [vmem:[#allocation2 + $0x264] sm:$0xf] %vm224_vm3, %v7094_v54  ;;  %v7923_v23 = vld [vmem:[#allocation2 + $0xbc] sm:$0xff]   ;;  %v3774_v48 = vshrl.u32 %v7094_v54, 16  ;;  %v3777_v26 = vshll.u32 %v7094_v54, 16  ;;  %v3757_v59 = vshrl.u32 %v7092_v12, 16  ;;  %7475 = vmatpush3.bf16.msra.mxu0 %v8000_v42 }
 0x266   : > { %4338 = vst [vmem:[#allocation2 + $0x3b0] sm:$0x8] %v4337_v39  ;;  %v3760_v25 = vshll.u32 %v7092_v12, 16  ;;  %4063 = vst.msk [vmem:[#allocation2 + $0x250] sm:$0xf] %vm224_vm3, %v7092_v12  ;;  %v3969_v44 = vsel %vm8314_vm7, %v3754_v43, %v3968_v3  ;;  %v4167_v1 = vrot.slane %v4166_v37, 4  ;;  %v3356_v45 = vadd.f32 %v11042_v33, %v3195_v11  ;;  %5034 = vrot.lane.b32.xlu0 %v7923_v23, %s8141_s14 }
 0x267   : > { %v3187_v49 = vadd.f32 %v10065_v2, %v11043_v62  ;;  %3970 = vst [vmem:[#allocation2 + $0xe4] sm:$0xf] %v3969_v44  ;;  %v3776_v27 = vrot.slane %v3774_v48, 7  ;;  %v4177_v36 = vrot.slane %v3777_v26, 5  ;;  %v4179_v20 = vrot.slane %v3774_v48, 4  ;;  %4846 = vrot.lane.b32.xlu1 %v7927_v38, %s8141_s14  ;;  %v11044_v10 = vld [vmem:[#allocation18_spill] sm:$0xff] }
 0x268   : > { %v3759_v28 = vrot.slane %v3757_v59, 7  ;;  %v4347_v41 = vld [vmem:[#allocation2 + $0x3cc] sm:$0xf]  ;;  %v4168_v24 = vrot.slane %v3760_v25, 5  ;;  %v4170_v21 = vrot.slane %v3757_v59, 4  ;;  %v3404_v53 = vmax.f32 %v3356_v45, 0.0 }
 0x269   : > { %v3348_v6 = vadd.f32 %v11044_v10, %v3187_v49  ;;  %v7926_v13 = vld [vmem:[#allocation2 + $0x1ac] sm:$0xff]   ;;  %v3779_v50 = vor.u32 %v3777_v26, %v3776_v27  ;;  %v3781_v2 = vrot.slane %v3776_v27, 4  ;;  %v4178_v35 = vsel %vm8857_vm13, %v4176_v30, %v4177_v36  ;;  %v4340_v7 = vld [vmem:[#allocation2 + $0x3b8] sm:$0xf]  ;;  %v3989_v26 = vld [vmem:[#allocation2 + $0x120] sm:$0xf] }
 0x26a   : > { %v4180_v61 = vor.u32 %v4179_v20, %v4177_v36  ;;  %v7929_v3 = vld [vmem:[#allocation2 + $0x328] sm:$0xff]   ;;  %4346 = vst.msk [vmem:[#allocation2 + $0x3c8] sm:$0xf] %vm224_vm3, %v4178_v35  ;;  %v3762_v17 = vor.u32 %v3760_v25, %v3759_v28  ;;  %v3764_v22 = vrot.slane %v3759_v28, 4  ;;  %v4169_v29 = vsel %vm8857_vm13, %v4167_v1, %v4168_v24  ;;  %5404 = vrot.lane.b32.xlu0 %v7926_v13, %s8141_s14  ;;  %v7928_v38 = vld [vmem:[#allocation2 + $0xd0] sm:$0xff]   ;;  %v11046_v44 = vld [vmem:[#allocation7_spill] sm:$0xff] }
 0x26b   : > { %v4171_v14 = vor.u32 %v4170_v21, %v4168_v24  ;;  %v3780_v54 = vsel %vm8296_vm6, %v3772_v16, %v3779_v50  ;;  %v3980_v60 = vsel %vm8225_vm2, %v3781_v2, %v3979_v63  ;;  %4339 = vst.msk [vmem:[#allocation2 + $0x3b4] sm:$0xf] %vm224_vm3, %v4169_v29  ;;  %v7097_v12 = vpack.c.bf16 %v3404_v53, %v3404_v53  ;;  %v11045_v23 = vld [vmem:[#allocation9_spill] sm:$0xff]  ;;  %v4357_v59 = vld [vmem:[#allocation2 + $0x3ec] sm:$0x8]  ;;  %v11047_v49 = vld [vmem:[#allocation19_spill] sm:$0xff] }
 0x26c   : > { %v4181_v30 = vrot.slane %v4180_v61, 4  ;;  %5216 = vrot.lane.b32.xlu1 %v7929_v3, %s8141_s14  ;;  %3978 = vst.msk [vmem:[#allocation2 + $0xfc] sm:$0xf] %vm224_vm3, %v3780_v54  ;;  %3981 = vst [vmem:[#allocation2 + $0x100] sm:$0x1] %v3980_v60  ;;  %v3763_v31 = vsel %vm8296_vm6, %v3755_v4, %v3762_v17  ;;  %v3973_v40 = vsel %vm8225_vm2, %v3764_v22, %v3972_v5  ;;  %v3402_v16 = vmax.f32 %v3348_v6, 0.0 }
 0x26d   : > { %v4172_v11 = vrot.slane %v4171_v14, 4  ;;  %v7931_v42 = vld [vmem:[#allocation2 + $0x24c] sm:$0xff]   ;;  %3971 = vst.msk [vmem:[#allocation2 + $0xe8] sm:$0xf] %vm224_vm3, %v3763_v31  ;;  %3974 = vst [vmem:[#allocation2 + $0xec] sm:$0x1] %v3973_v40  ;;  %v3198_v4 = vadd.f32 %v10170_v55, %v11045_v23  ;;  %v3190_v1 = vadd.f32 %v10072_v52, %v11046_v44  ;;  %v7324_v63 = vadd.f32 %v10083_v56, %v10074_v47 }
 0x26e   : > { %v4348_v43 = vsel %vm8891_vm14, %v4181_v30, %v4347_v41  ;;  %v3800_v37 = vshrl.u32 %v7097_v12, 16  ;;  %v3803_v39 = vshll.u32 %v7097_v12, 16  ;;  %4068 = vst.msk [vmem:[#allocation2 + $0x288] sm:$0xf] %vm224_vm3, %v7097_v12  ;;  %v7095_v25 = vpack.c.bf16 %v3402_v16, %v3402_v16  ;;  %5036 = vrot.lane.b32.xlu0 %v7928_v38, %s8141_s14  ;;  %v4350_v62 = vld [vmem:[#allocation2 + $0x3d8] sm:$0x8] }
 0x26f   : > { %4349 = vst [vmem:[#allocation2 + $0x3cc] sm:$0xf] %v4348_v43  ;;  %v4341_v48 = vsel %vm8891_vm14, %v4172_v11, %v4340_v7  ;;  %v3359_v27 = vadd.f32 %v11047_v49, %v3198_v4  ;;  %v11048_v52 = vld [vmem:[#allocation21_spill] sm:$0xff]  ;;  %v7327_v47 = vadd.f32 %v10095_v18, %v10088_v46  ;;  %v7930_v56 = vld [vmem:[#allocation2 + $0x1c0] sm:$0xff]   ;;  %v3982_v2 = vld [vmem:[#allocation2 + $0x10c] sm:$0xf] }
 0x270   : > { %4342 = vst [vmem:[#allocation2 + $0x3b8] sm:$0xf] %v4341_v48  ;;  %v10309_v33 = vrot.slane %v3800_v37, 7  ;;  %v4191_v45 = vrot.slane %v3803_v39, 5  ;;  %v4192_v55 = vrot.slane %v3800_v37, 4  ;;  %4848 = vrot.lane.b32.xlu1 %v7931_v42, %s8141_s14  ;;  %v3783_v36 = vshrl.u32 %v7095_v25, 16 }
 0x271   : > { %v3786_v20 = vshll.u32 %v7095_v25, 16  ;;  %4066 = vst.msk [vmem:[#allocation2 + $0x274] sm:$0xf] %vm224_vm3, %v7095_v25  ;;  %v3351_v28 = vadd.f32 %v11048_v52, %v3190_v1  ;;  %v7935_v53 = vld [vmem:[#allocation2 + $0x33c] sm:$0xff]   ;;  %v3405_v50 = vmax.f32 %v3359_v27, 0.0  ;;  %v11050_v12 = vld [vmem:[#allocation12_spill] sm:$0xff] }
 0x272   : > { %v3805_v5 = vor.u32 %v3803_v39, %v10309_v33  ;;  %v3806_v41 = vrot.slane %v10309_v33, 4  ;;  %v4193_v24 = vor.u32 %v4192_v55, %v4191_v45  ;;  %v4358_v21 = vsel %vm8841_vm10, %v4191_v45, %v4357_v59  ;;  %5406 = vrot.lane.b32.xlu0 %v7930_v56, %s8141_s14  ;;  %v11049_v61 = vld [vmem:[#allocation14_spill] sm:$0xff]  ;;  %v7937_v40 = vld [vmem:[#allocation2 + $0x260] sm:$0xff]   ;;  %v11051_v38 = vld [vmem:[#allocation13_spill] sm:$0xff] }
 0x273   : > { %4359 = vst [vmem:[#allocation2 + $0x3ec] sm:$0x8] %v4358_v21  ;;  %v10321_v10 = vrot.slane %v3783_v36, 7  ;;  %v4182_v6 = vrot.slane %v3786_v20, 5  ;;  %v4183_v13 = vrot.slane %v3783_v36, 4  ;;  %v3403_v35 = vmax.f32 %v3351_v28, 0.0 }
 0x274   : > { %v3990_v46 = vsel %vm8314_vm7, %v3805_v5, %v3989_v26  ;;  %v4194_v18 = vrot.slane %v4193_v24, 4  ;;  %v3211_v7 = vadd.f32 %v7324_v63, %v11049_v61  ;;  %5218 = vrot.lane.b32.xlu1 %v7935_v53, %s8141_s14  ;;  %v7933_v14 = vld [vmem:[#allocation2 + $0xe4] sm:$0xff]   ;;  %v7098_v54 = vpack.c.bf16 %v3405_v50, %v3405_v50  ;;  %v7936_v39 = vld [vmem:[#allocation2 + $0x1d4] sm:$0xff]   ;;  %v4354_v21 = vld [vmem:[#allocation2 + $0x3e0] sm:$0xf] }
 0x275   : > { %3991 = vst [vmem:[#allocation2 + $0x120] sm:$0xf] %v3990_v46  ;;  %v3788_v3 = vor.u32 %v3786_v20, %v10321_v10  ;;  %v3789_v17 = vrot.slane %v10321_v10, 4  ;;  %v4184_v22 = vor.u32 %v4183_v13, %v4182_v6  ;;  %v4351_v29 = vsel %vm8841_vm10, %v4182_v6, %v4350_v62  ;;  %v11052_v43 = vld [vmem:[#allocation11_spill] sm:$0xff]  ;;  %v3993_v48 = vld [vmem:[#allocation2 + $0x128] sm:$0x1] }
 0x276   : > { %4352 = vst [vmem:[#allocation2 + $0x3d8] sm:$0x8] %v4351_v29  ;;  %v7096_v60 = vpack.c.bf16 %v3403_v35, %v3403_v35  ;;  %v3372_v30 = vadd.f32 %v10053_v58, %v3211_v7  ;;  %v3203_v31 = vadd.f32 %v10232_v34, %v11050_v12  ;;  %v3214_v42 = vadd.f32 %v7327_v47, %v11051_v38  ;;  %v11053_v25 = vld [vmem:[#allocation22_spill] sm:$0xff]  ;;  %v11054_v44 = vld [vmem:[#allocation23_spill] sm:$0xff]  ;;  %v7939_v63 = vld [vmem:[#allocation2 + $0x350] sm:$0xff]  }
 0x277   : > { %v3983_v11 = vsel %vm8314_vm7, %v3788_v3, %v3982_v2  ;;  %v4185_v16 = vrot.slane %v4184_v22, 4  ;;  %v3206_v37 = vadd.f32 %v10244_v9, %v11052_v43  ;;  %5038 = vrot.lane.b32.xlu0 %v7933_v14, %s8141_s14  ;;  %v3808_v23 = vshrl.u32 %v7098_v54, 16  ;;  %4069 = vst.msk [vmem:[#allocation2 + $0x28c] sm:$0xf] %vm224_vm3, %v7098_v54  ;;  %v3986_v27 = vld [vmem:[#allocation2 + $0x114] sm:$0x1] }
 0x278   : > { %3984 = vst [vmem:[#allocation2 + $0x10c] sm:$0xf] %v3983_v11  ;;  %v3811_v4 = vshll.u32 %v7098_v54, 16  ;;  %v3791_v58 = vshrl.u32 %v7096_v60, 16  ;;  %v3794_v34 = vshll.u32 %v7096_v60, 16  ;;  %4850 = vrot.lane.b32.xlu1 %v7937_v40, %s8141_s14  ;;  %v3408_v26 = vmax.f32 %v3372_v30, 0.0 }
 0x279   : > { %4067 = vst.msk [vmem:[#allocation2 + $0x278] sm:$0xf] %vm224_vm3, %v7096_v60  ;;  %v3364_v59 = vadd.f32 %v10067_v19, %v3203_v31  ;;  %v10346_v9 = vadd.f32 %v11053_v25, %v3214_v42  ;;  %v10349_v1 = vadd.f32 %v11054_v44, %v3206_v37  ;;  %v3810_v45 = vrot.slane %v3808_v23, 7  ;;  %v4361_v36 = vld [vmem:[#allocation2 + $0x3f4] sm:$0xf]  ;;  %v7938_v46 = vld [vmem:[#allocation2 + $0xf8] sm:$0xff]  }
 0x27a   : > { %v4195_v55 = vrot.slane %v3811_v4, 5  ;;  %v4197_v62 = vrot.slane %v3808_v23, 4  ;;  %v3793_v49 = vrot.slane %v3791_v58, 7  ;;  %v4186_v20 = vrot.slane %v3794_v34, 5  ;;  %v4371_v7 = vld [vmem:[#allocation2 + $0x414] sm:$0x8] }
 0x27b   : > { %v4188_v52 = vrot.slane %v3791_v58, 4  ;;  %v7101_v28 = vpack.c.bf16 %v3408_v26, %v3408_v26  ;;  %v3406_v47 = vmax.f32 %v3364_v59, 0.0  ;;  %5408 = vrot.lane.b32.xlu0 %v7936_v39, %s8141_s14  ;;  %v3813_v19 = vor.u32 %v3811_v4, %v3810_v45  ;;  %v4003_v29 = vld [vmem:[#allocation2 + $0x148] sm:$0xf]  ;;  %v4364_v31 = vld [vmem:[#allocation2 + $0x400] sm:$0x8] }
 0x27c   : > { %v3815_v56 = vrot.slane %v3810_v45, 4  ;;  %v4196_v5 = vsel %vm8857_vm13, %v4194_v18, %v4195_v55  ;;  %v4198_v24 = vor.u32 %v4197_v62, %v4195_v55  ;;  %5220 = vrot.lane.b32.xlu1 %v7939_v63, %s8141_s14  ;;  %v3796_v53 = vor.u32 %v3794_v34, %v3793_v49  ;;  %v7945_v37 = vld [vmem:[#allocation2 + $0x364] sm:$0xff]   ;;  %v3996_v4 = vld [vmem:[#allocation2 + $0x134] sm:$0xf] }
 0x27d   : > { %4360 = vst.msk [vmem:[#allocation2 + $0x3f0] sm:$0xf] %vm224_vm3, %v4196_v5  ;;  %v3798_v6 = vrot.slane %v3793_v49, 4  ;;  %v4187_v13 = vsel %vm8857_vm13, %v4185_v16, %v4186_v20  ;;  %v4189_v50 = vor.u32 %v4188_v52, %v4186_v20  ;;  %4072 = vst.msk [vmem:[#allocation2 + $0x2b0] sm:$0xf] %vm224_vm3, %v7101_v28  ;;  %v3814_v18 = vsel %vm8296_vm6, %v3806_v41, %v3813_v19  ;;  %v7940_v16 = vld [vmem:[#allocation2 + $0x1e8] sm:$0xff]  }
 0x27e   : > { %v3994_v2 = vsel %vm8225_vm2, %v3815_v56, %v3993_v48  ;;  %v4199_v35 = vrot.slane %v4198_v24, 4  ;;  %4353 = vst.msk [vmem:[#allocation2 + $0x3dc] sm:$0xf] %vm224_vm3, %v4187_v13  ;;  %v3834_v61 = vshrl.u32 %v7101_v28, 16  ;;  %3992 = vst.msk [vmem:[#allocation2 + $0x124] sm:$0xf] %vm224_vm3, %v3814_v18  ;;  %v3797_v3 = vsel %vm8296_vm6, %v3789_v17, %v3796_v53 }
 0x27f   : > { %3995 = vst [vmem:[#allocation2 + $0x128] sm:$0x1] %v3994_v2  ;;  %v3987_v33 = vsel %vm8225_vm2, %v3798_v6, %v3986_v27  ;;  %v4190_v41 = vrot.slane %v4189_v50, 4  ;;  %v3837_v22 = vshll.u32 %v7101_v28, 16  ;;  %5040 = vrot.lane.b32.xlu0 %v7938_v46, %s8141_s14  ;;  %3985 = vst.msk [vmem:[#allocation2 + $0x110] sm:$0xf] %vm224_vm3, %v3797_v3  ;;  %v7099_v30 = vpack.c.bf16 %v3406_v47, %v3406_v47 }
 0x280   : > { %v7941_v14 = vld [vmem:[#allocation2 + $0x274] sm:$0xff]   ;;  %v4362_v54 = vsel %vm8891_vm14, %v4199_v35, %v4361_v36  ;;  %3988 = vst [vmem:[#allocation2 + $0x114] sm:$0x1] %v3987_v33  ;;  %v10377_v60 = vrot.slane %v3834_v61, 7  ;;  %v4210_v10 = vrot.slane %v3834_v61, 4  ;;  %v3409_v40 = vmax.f32 %v10346_v9, 0.0 }
 0x281   : > { %4363 = vst [vmem:[#allocation2 + $0x3f4] sm:$0xf] %v4362_v54  ;;  %v4355_v17 = vsel %vm8891_vm14, %v4190_v41, %v4354_v21  ;;  %v4209_v12 = vrot.slane %v3837_v22, 5  ;;  %v3407_v11 = vmax.f32 %v10349_v1, 0.0  ;;  %4852 = vrot.lane.b32.xlu1 %v7941_v14, %s8141_s14  ;;  %v3817_v42 = vshrl.u32 %v7099_v30, 16  ;;  %v7947_v36 = vld [vmem:[#allocation2 + $0x288] sm:$0xff]  }
 0x282   : > { %4356 = vst [vmem:[#allocation2 + $0x3e0] sm:$0xf] %v4355_v17  ;;  %v3839_v38 = vor.u32 %v3837_v22, %v10377_v60  ;;  %v3820_v43 = vshll.u32 %v7099_v30, 16  ;;  %4070 = vst.msk [vmem:[#allocation2 + $0x29c] sm:$0xf] %vm224_vm3, %v7099_v30  ;;  %v7102_v58 = vpack.c.bf16 %v3409_v40, %v3409_v40  ;;  %v3840_v45 = vrot.slane %v10377_v60, 4 }
 0x283   : > { %v4211_v39 = vor.u32 %v4210_v10, %v4209_v12  ;;  %v4372_v23 = vsel %vm8841_vm10, %v4209_v12, %v4371_v7  ;;  %v7100_v34 = vpack.c.bf16 %v3407_v11, %v3407_v11  ;;  %5410 = vrot.lane.b32.xlu0 %v7940_v16, %s8141_s14  ;;  %v3819_v26 = vrot.slane %v3817_v42, 7  ;;  %v4007_v27 = vld [vmem:[#allocation2 + $0x150] sm:$0x1]  ;;  %v4000_v19 = vld [vmem:[#allocation2 + $0x13c] sm:$0x1]  ;;  %v7957_v11 = vld [vmem:[#allocation2 + $0x3a0] sm:$0xff]   ;;  %v4827_v16 = vpop.permute.xlu1 %4826 }
 0x284   : > { %v4004_v48 = vsel %vm8314_vm7, %v3839_v38, %v4003_v29  ;;  %4373 = vst [vmem:[#allocation2 + $0x414] sm:$0x8] %v4372_v23  ;;  %v4200_v59 = vrot.slane %v3820_v43, 5  ;;  %v4201_v25 = vrot.slane %v3817_v42, 4  ;;  %v3842_v44 = vshrl.u32 %v7102_v58, 16  ;;  %v7949_v33 = vld [vmem:[#allocation2 + $0x378] sm:$0xff]  }
 0x285   : > { %4005 = vst [vmem:[#allocation2 + $0x148] sm:$0xf] %v4004_v48  ;;  %v4212_v9 = vrot.slane %v4211_v39, 4  ;;  %v3845_v1 = vshll.u32 %v7102_v58, 16  ;;  %4073 = vst.msk [vmem:[#allocation2 + $0x2b4] sm:$0xf] %vm224_vm3, %v7102_v58  ;;  %5222 = vrot.lane.b32.xlu1 %v7945_v37, %s8141_s14  ;;  %v3822_v55 = vor.u32 %v3820_v43, %v3819_v26 }
 0x286   : > { %v3825_v63 = vshrl.u32 %v7100_v34, 16  ;;  %4071 = vst.msk [vmem:[#allocation2 + $0x2a0] sm:$0xf] %vm224_vm3, %v7100_v34  ;;  %v4202_v62 = vor.u32 %v4201_v25, %v4200_v59  ;;  %v4365_v49 = vsel %vm8841_vm10, %v4200_v59, %v4364_v31  ;;  %v3844_v20 = vrot.slane %v3842_v44, 7  ;;  %v4375_v24 = vld [vmem:[#allocation2 + $0x41c] sm:$0xf] }
 0x287   : > { %4366 = vst [vmem:[#allocation2 + $0x400] sm:$0x8] %v4365_v49  ;;  %v4213_v52 = vrot.slane %v3845_v1, 5  ;;  %v4215_v28 = vrot.slane %v3842_v44, 4  ;;  %v3997_v56 = vsel %vm8314_vm7, %v3822_v55, %v3996_v4  ;;  %v3828_v21 = vshll.u32 %v7100_v34, 16  ;;  %v7943_v6 = vld [vmem:[#allocation2 + $0x10c] sm:$0xff]   ;;  %v4829_v58 = vpop.permute.xlu1 %4828 }
 0x288   : > { %v3827_v47 = vrot.slane %v3825_v63, 7  ;;  %v4203_v5 = vrot.slane %v4202_v62, 4  ;;  %v4206_v53 = vrot.slane %v3825_v63, 4  ;;  %3998 = vst [vmem:[#allocation2 + $0x134] sm:$0xf] %v3997_v56  ;;  %v3847_v13 = vor.u32 %v3845_v1, %v3844_v20  ;;  %5042 = vrot.lane.b32.xlu0 %v7943_v6, %s8141_s14  ;;  %v7946_v54 = vld [vmem:[#allocation2 + $0x1fc] sm:$0xff]  }
 0x289   : > { %v3849_v8 = vrot.slane %v3844_v20, 4  ;;  %v4214_v50 = vsel %vm8857_vm13, %v4212_v9, %v4213_v52  ;;  %v4216_v46 = vor.u32 %v4215_v28, %v4213_v52  ;;  %4854 = vrot.lane.b32.xlu1 %v7947_v36, %s8141_s14  ;;  %v3823_v18 = vrot.slane %v3819_v26, 4  ;;  %v4368_v10 = vld [vmem:[#allocation2 + $0x408] sm:$0xf]  ;;  %v7948_v0 = vld [vmem:[#allocation2 + $0x120] sm:$0xff]   ;;  %v7955_v17 = vld [vmem:[#allocation2 + $0x38c] sm:$0xff]  }
 0x28a   : > { %4374 = vst.msk [vmem:[#allocation2 + $0x418] sm:$0xf] %vm224_vm3, %v4214_v50  ;;  %v3830_v2 = vor.u32 %v3828_v21, %v3827_v47  ;;  %v3832_v32 = vrot.slane %v3827_v47, 4  ;;  %v4204_v35 = vrot.slane %v3828_v21, 5  ;;  %v3848_v61 = vsel %vm8296_vm6, %v3840_v45, %v3847_v13  ;;  %v7950_v12 = vld [vmem:[#allocation2 + $0x210] sm:$0xff]   ;;  %v7966_v31 = vld [vmem:[#allocation2 + $0x8] sm:$0xff]  }
 0x28b   : > { %v4008_v7 = vsel %vm8225_vm2, %v3849_v8, %v4007_v27  ;;  %v4217_v3 = vrot.slane %v4216_v46, 4  ;;  %4006 = vst.msk [vmem:[#allocation2 + $0x14c] sm:$0xf] %vm224_vm3, %v3848_v61  ;;  %v7975_v40 = vld [vmem:[#allocation2 + $0x2d8] sm:$0xff]   ;;  %v5516_v15 = vsel %vm2367_vm15, %v7966_v31, %v4827_v16  ;;  %v7980_v37 = vld [vmem:[#allocation2 + $0x2ec] sm:$0xff]   ;;  %v7956_v4 = vld [vmem:[#allocation2 + $0x224] sm:$0xff]   ;;  %v4831_v63 = vpop.permute.xlu1 %4830 }
 0x28c   : > { %4009 = vst [vmem:[#allocation2 + $0x150] sm:$0x1] %v4008_v7  ;;  %v3831_v41 = vsel %vm8296_vm6, %v3823_v18, %v3830_v2  ;;  %v4001_v22 = vsel %vm8225_vm2, %v3832_v32, %v4000_v19  ;;  %v4205_v29 = vsel %vm8857_vm13, %v4203_v5, %v4204_v35  ;;  %v4207_v14 = vor.u32 %v4206_v53, %v4204_v35  ;;  %v8002_v39 = vld [vmem:[%s10848_s3 + $0x108] sm:$0xff]   ;;  %v7959_v23 = vld [vmem:[#allocation2 + $0x3b4] sm:$0xff]   ;;  %v8075_v34 = vld [vmem:[%s10848_s3 + $0x100] sm:$0xff]  }
 0x28d   : > { %v4376_v60 = vsel %vm8891_vm14, %v4217_v3, %v4375_v24  ;;  %3999 = vst.msk [vmem:[#allocation2 + $0x138] sm:$0xf] %vm224_vm3, %v3831_v41  ;;  %4002 = vst [vmem:[#allocation2 + $0x13c] sm:$0x1] %v4001_v22  ;;  %5224 = vrot.lane.b32.xlu1 %v7949_v33, %s8141_s14  ;;  %5412 = vrot.lane.b32.xlu0 %v7946_v54, %s8141_s14  ;;  %v7951_v51 = vld [vmem:[#allocation2 + $0x29c] sm:$0xff]   ;;  %v8019_v59 = vld [vmem:[%s10848_s3 + $0x110] sm:$0xff]  }
 0x28e   : > { %4367 = vst.msk [vmem:[#allocation2 + $0x404] sm:$0xf] %vm224_vm3, %v4205_v29  ;;  %4377 = vst [vmem:[#allocation2 + $0x41c] sm:$0xf] %v4376_v60  ;;  %v4208_v57 = vrot.slane %v4207_v14, 4  ;;  %v7961_v25 = vld [vmem:[#allocation2 + $0x3c8] sm:$0xff]  }
 0x28f   : > { %v7982_v44 = vld [vmem:[#allocation2 + $0x1c] sm:$0xff]   ;;  %v7968_v49 = vld [vmem:[#allocation2 + $0x3f0] sm:$0xff]   ;;  %v7995_v50 = vld [vmem:[#allocation2 + $0x44] sm:$0xff]  }
 0x290   : > { %v4369_v30 = vsel %vm8891_vm14, %v4208_v57, %v4368_v10  ;;  %v5019_v42 = vpop.permute.xlu0 %5018  ;;  %v7965_v1 = vld [vmem:[#allocation2 + $0x3dc] sm:$0xff]   ;;  %v5520_v45 = vsel %vm2367_vm15, %v7982_v44, %v4829_v58  ;;  %v7963_v27 = vld [vmem:[#allocation2 + $0x24c] sm:$0xff]   ;;  %v7991_v24 = vld [vmem:[#allocation2 + $0x314] sm:$0xff]  }
 0x291   : > { %4370 = vst [vmem:[#allocation2 + $0x408] sm:$0xf] %v4369_v30  ;;  %4856 = vrot.lane.b32.xlu1 %v7951_v51, %s8141_s14  ;;  %5044 = vrot.lane.b32.xlu0 %v7948_v0, %s8141_s14  ;;  %v5580_v43 = vsel %vm2367_vm15, %v7975_v40, %v5019_v42  ;;  %v7960_v55 = vld [vmem:[#allocation2 + $0x238] sm:$0xff]   ;;  %v7984_v20 = vld [vmem:[#allocation2 + $0x300] sm:$0xff]   ;;  %v7988_v52 = vld [vmem:[#allocation2 + $0x30] sm:$0xff]  }
 0x292   : > { %6073 = vmatprep.mubr.bf16.mxu1 %v5580_v43  ;;  %v7958_v9 = vld [vmem:[#allocation2 + $0x148] sm:$0xff]   ;;  %v8036_v62 = vld [vmem:[%s10848_s3 + $0x118] sm:$0xff]   ;;  %v7967_v19 = vld [vmem:[#allocation2 + $0x260] sm:$0xff]   ;;  %v5524_v5 = vsel %vm2367_vm15, %v7988_v52, %v4831_v63 }
 0x293   : > { %6074 = vmatmul.mubr.bf16.vlgmr.msra.gmra.mrb[64].mxu1 %v5516_v15  ;;  %v7969_v13 = vld [vmem:[#allocation2 + $0x274] sm:$0xff]   ;;  %v7972_v46 = vld [vmem:[#allocation2 + $0x288] sm:$0xff]   ;;  %v7977_v32 = vld [vmem:[#allocation2 + $0x29c] sm:$0xff]  }
 0x294   : > { %v7953_v38 = vld [vmem:[#allocation2 + $0x134] sm:$0xff]   ;;  %7633 = vmatpush3.bf16.msra.mxu1 %v8075_v34  ;;  %v5021_v48 = vpop.permute.xlu0 %5020  ;;  %v7998_v35 = vld [vmem:[#allocation2 + $0x328] sm:$0xff]   ;;  %v8004_v29 = vld [vmem:[#allocation2 + $0x33c] sm:$0xff]  }
 0x295   : > { %5226 = vrot.lane.b32.xlu1 %v7955_v17, %s8141_s14  ;;  %5414 = vrot.lane.b32.xlu0 %v7950_v12, %s8141_s14  ;;  %v5584_v26 = vsel %vm2367_vm15, %v7980_v37, %v5021_v48  ;;  %v7974_v21 = vld [vmem:[#allocation2 + $0x418] sm:$0xff]   ;;  %v7979_v33 = vld [vmem:[#allocation2 + $0x2b0] sm:$0xff]   ;;  %v8005_v14 = vld [vmem:[#allocation2 + $0x2c4] sm:$0xff]  }
 0x296   : > { %7634 = vmatprep.subr.bf16.mxu1 %v8002_v39  ;;  %6081 = vmatprep.mubr.bf16.mxu1 %v5584_v26  ;;  %v8003_v3 = vld [vmem:[#allocation2 + $0x58] sm:$0xff]   ;;  %v8007_v57 = vld [vmem:[#allocation2 + $0x6c] sm:$0xff]   ;;  %v8011_v40 = vld [vmem:[#allocation2 + $0x80] sm:$0xff]  }
 0x297   : > { %v4833_v36 = vpop.permute.xlu1 %4832  ;;  %v8009_v30 = vld [vmem:[#allocation2 + $0x350] sm:$0xff]   ;;  %v7992_v37 = vld [vmem:[#allocation2 + $0x184] sm:$0xff]  }
 0x298   : > { %7635 = vmatpush3.bf16.msra.mxu1 %v8002_v39  ;;  %v7970_v28 = vld [vmem:[#allocation2 + $0x404] sm:$0xff]   ;;  %v5528_v2 = vsel %vm2367_vm15, %v7995_v50, %v4833_v36  ;;  %v8001_v43 = vld [vmem:[#allocation2 + $0x30] sm:$0xff]  }
 0x299   : > { %5228 = vrot.lane.b32.xlu1 %v7957_v11, %s8141_s14  ;;  %5046 = vrot.lane.b32.xlu0 %v7953_v38, %s8141_s14  ;;  %v8013_v11 = vld [vmem:[#allocation2 + $0x364] sm:$0xff]   ;;  %v8015_v34 = vld [vmem:[#allocation2 + $0x94] sm:$0xff]  }
 0x29a   : > { %7636 = vmatprep.subr.bf16.mxu1 %v8019_v59  ;;  %v8006_v63 = vld [vmem:[#allocation2 + $0x44] sm:$0xff]  }
 0x29b   : > { %6082 = vmatmul.mubr.bf16.gmra.mrb[68].mxu1 %v5520_v45  ;;  %v4835_v53 = vpop.permute.xlu1 %4834 }
 0x29c   : > { %7637 = vmatpush3.bf16.msra.mxu1 %v8019_v59  ;;  %v5532_v22 = vsel %vm2367_vm15, %v8003_v3, %v4835_v53  ;;  %v8017_v59 = vld [vmem:[#allocation2 + $0x378] sm:$0xff]  }
 0x29d   : > { %5230 = vrot.lane.b32.xlu1 %v7959_v23, %s8141_s14  ;;  %5416 = vrot.lane.b32.xlu0 %v7956_v4, %s8141_s14 }
 0x29e   : > { %7638 = vmatprep.subr.bf16.mxu1 %v8036_v62 }
 0x2a0   : > { %7639 = vmatpush3.bf16.msra.mxu1 %v8036_v62 }
 0x2a1   : > { %5232 = vrot.lane.b32.xlu1 %v7961_v25, %s8141_s14  ;;  %5048 = vrot.lane.b32.xlu0 %v7958_v9, %s8141_s14 }
 0x2a4   : > { %v5023_v47 = vpop.permute.xlu0 %5022 }
 0x2a5   : > { %5234 = vrot.lane.b32.xlu1 %v7965_v1, %s8141_s14  ;;  %5418 = vrot.lane.b32.xlu0 %v7960_v55, %s8141_s14  ;;  %v5588_v56 = vsel %vm2367_vm15, %v7984_v20, %v5023_v47  ;;  %v8020_v1 = vld [vmem:[#allocation2 + $0xa8] sm:$0xff]   ;;  %v8008_v55 = vld [vmem:[#allocation2 + $0x198] sm:$0xff]  }
 0x2a6   : > { %6089 = vmatprep.mubr.bf16.mxu1 %v5588_v56  ;;  %v8022_v20 = vld [vmem:[#allocation2 + $0x38c] sm:$0xff]   ;;  %v8010_v56 = vld [vmem:[#allocation2 + $0x58] sm:$0xff]  }
 0x2a7   : > { %6090 = vmatmul.mubr.bf16.gmra.mrb[72].mxu1 %v5524_v5 }
 0x2a8   : > { %v5025_v6 = vpop.permute.xlu0 %5024 }
 0x2a9   : > { %5236 = vrot.lane.b32.xlu1 %v7968_v49, %s8141_s14  ;;  %5420 = vrot.lane.b32.xlu0 %v7963_v27, %s8141_s14  ;;  %v5592_v8 = vsel %vm2367_vm15, %v7991_v24, %v5025_v6  ;;  %v8012_v24 = vld [vmem:[#allocation2 + $0x1ac] sm:$0xff]  }
 0x2aa   : > { %6097 = vmatprep.mubr.bf16.mxu1 %v5592_v8  ;;  %v8026_v8 = vld [vmem:[#allocation2 + $0x3a0] sm:$0xff]  }
 0x2ad   : > { %5238 = vrot.lane.b32.xlu1 %v7970_v28, %s8141_s14  ;;  %5422 = vrot.lane.b32.xlu0 %v7967_v19, %s8141_s14  ;;  %v8024_v19 = vld [vmem:[#allocation2 + $0xbc] sm:$0xff]  }
 0x2ae   : > { %v4837_v18 = vpop.permute.xlu1 %4836 }
 0x2af   : > { %6098 = vmatmul.mubr.bf16.gmra.mrb[76].mxu1 %v5528_v2  ;;  %v5536_v51 = vsel %vm2367_vm15, %v8007_v57, %v4837_v18  ;;  %v8028_v18 = vld [vmem:[#allocation2 + $0xd0] sm:$0xff]  }
 0x2b0   : > { %v8014_v2 = vld [vmem:[#allocation2 + $0x6c] sm:$0xff]   ;;  %v8021_v57 = vld [vmem:[#allocation2 + $0x1d4] sm:$0xff]  }
 0x2b1   : > { %5240 = vrot.lane.b32.xlu1 %v7974_v21, %s8141_s14  ;;  %5424 = vrot.lane.b32.xlu0 %v7969_v13, %s8141_s14 }
 0x2b2   : > { %v4839_v61 = vpop.permute.xlu1 %4838 }
 0x2b3   : > { %v5540_v38 = vsel %vm2367_vm15, %v8011_v40, %v4839_v61  ;;  %v8016_v61 = vld [vmem:[#allocation2 + $0x1c0] sm:$0xff]   ;;  %v8037_v40 = vld [vmem:[#allocation2 + $0xf8] sm:$0xff]  }
 0x2b5   : > { %5426 = vrot.lane.b32.xlu0 %v7972_v46, %s8141_s14 }
 0x2b8   : > { %v5027_v7 = vpop.permute.xlu0 %5026 }
 0x2b9   : > { %5428 = vrot.lane.b32.xlu0 %v7977_v32, %s8141_s14  ;;  %v5596_v41 = vsel %vm2367_vm15, %v7998_v35, %v5027_v7 }
 0x2ba   : > { %6105 = vmatprep.mubr.bf16.mxu1 %v5596_v41  ;;  %v8030_v41 = vld [vmem:[#allocation2 + $0x3b4] sm:$0xff]  }
 0x2bb   : > { %6106 = vmatmul.mubr.bf16.gmra.mrb[80].mxu1 %v5532_v22 }
 0x2bd   : > { %5430 = vrot.lane.b32.xlu0 %v7979_v33, %s8141_s14  ;;  %v5029_v54 = vpop.permute.xlu0 %5028 }
 0x2be   : > { %v5600_v60 = vsel %vm2367_vm15, %v8004_v29, %v5029_v54  ;;  %v8032_v54 = vld [vmem:[#allocation2 + $0xe4] sm:$0xff]  }
 0x2bf   : > { %6113 = vmatprep.mubr.bf16.mxu1 %v5600_v60  ;;  %v8018_v60 = vld [vmem:[#allocation2 + $0x80] sm:$0xff]  }
 0x2c0   : > { %v4841_v10 = vpop.permute.xlu1 %4840 }
 0x2c1   : > { %5432 = vrot.lane.b32.xlu0 %v8005_v14, %s8141_s14  ;;  %v5544_v48 = vsel %vm2367_vm15, %v8015_v34, %v4841_v10 }
 0x2c3   : > { %6114 = vmatmul.mubr.bf16.gmra.mrb[84].mxu1 %v5536_v51 }
 0x2c4   : > { %v5211_v0 = vpop.permute.xlu1 %5210 }
 0x2c5   : > { %v5644_v58 = vsel %vm2367_vm15, %v7992_v37, %v5211_v0 }
 0x2c7   : > { %v5031_v17 = vpop.permute.xlu0 %5030 }
 0x2c8   : > { %v4843_v12 = vpop.permute.xlu1 %4842  ;;  %v5604_v31 = vsel %vm2367_vm15, %v8009_v30, %v5031_v17 }
 0x2c9   : > { %6121 = vmatprep.mubr.bf16.mxu1 %v5604_v31  ;;  %v5548_v62 = vsel %vm2367_vm15, %v8020_v1, %v4843_v12  ;;  %v8034_v12 = vld [vmem:[#allocation2 + $0x3c8] sm:$0xff]  }
 0x2cb   : > { %v5033_v16 = vpop.permute.xlu0 %5032  ;;  %6122 = vmatmul.mubr.bf16.gmra.mrb[88].mxu1 %v5540_v38 }
 0x2cc   : > { %v5213_v15 = vpop.permute.xlu1 %5212  ;;  %v5608_v42 = vsel %vm2367_vm15, %v8013_v11, %v5033_v16 }
 0x2cd   : > { %6129 = vmatprep.mubr.bf16.mxu1 %v5608_v42  ;;  %v5648_v36 = vsel %vm2367_vm15, %v8008_v55, %v5213_v15  ;;  %v8023_v15 = vld [vmem:[#allocation2 + $0x94] sm:$0xff]  }
 0x2cf   : > { %v5403_v39 = vpop.permute.xlu0 %5402 }
 0x2d0   : > { %v4845_v23 = vpop.permute.xlu1 %4844  ;;  %v5708_v4 = vsel %vm2367_vm15, %v8001_v43, %v5403_v39  ;;  %v8025_v43 = vld [vmem:[#allocation2 + $0x1e8] sm:$0xff]  }
 0x2d1   : > { %6234 = vmatprep.mubr.bf16.mxu0 %v5708_v4  ;;  %v5552_v21 = vsel %vm2367_vm15, %v8024_v19, %v4845_v23  ;;  %v8039_v23 = vld [vmem:[#allocation2 + $0x3dc] sm:$0xff]  }
 0x2d2   : > { %6235 = vmatmul.mubr.bf16.vlgmr.msra.gmra.mrb[96].mxu0 %v5644_v58  ;;  %v8041_v58 = vld [vmem:[#allocation2 + $0x10c] sm:$0xff]  }
 0x2d3   : > { %6130 = vmatmul.mubr.bf16.gmra.mrb[92].mxu1 %v5544_v48 }
 0x2d4   : > { %v5215_v26 = vpop.permute.xlu1 %5214 }
 0x2d5   : > { %v5652_v6 = vsel %vm2367_vm15, %v8012_v24, %v5215_v26  ;;  %v8049_v24 = vld [vmem:[#allocation2 + $0x134] sm:$0xff]  }
 0x2d8   : > { %v5035_v25 = vpop.permute.xlu0 %5034 }
 0x2d9   : > { %v4847_v9 = vpop.permute.xlu1 %4846  ;;  %v5612_v44 = vsel %vm2367_vm15, %v8017_v59, %v5035_v25  ;;  %v8027_v59 = vld [vmem:[#allocation2 + $0xa8] sm:$0xff]  }
 0x2da   : > { %6137 = vmatprep.mubr.bf16.mxu1 %v5612_v44  ;;  %v5556_v7 = vsel %vm2367_vm15, %v8028_v18, %v4847_v9  ;;  %v8029_v9 = vld [vmem:[#allocation2 + $0x1fc] sm:$0xff]  }
 0x2db   : > { %6138 = vmatmul.mubr.bf16.gmra.mrb[96].mxu1 %v5548_v62  ;;  %v8045_v62 = vld [vmem:[#allocation2 + $0x120] sm:$0xff]  }
 0x2dc   : > { %v5405_v45 = vpop.permute.xlu0 %5404 }
 0x2dd   : > { %v5712_v49 = vsel %vm2367_vm15, %v8006_v63, %v5405_v45  ;;  %v8044_v45 = vld [vmem:[#allocation2 + $0x3f0] sm:$0xff]  }
 0x2de   : > { %v5217_v27 = vpop.permute.xlu1 %5216  ;;  %6242 = vmatprep.mubr.bf16.mxu0 %v5712_v49 }
 0x2df   : > { %6243 = vmatmul.mubr.bf16.gmra.mrb[100].mxu0 %v5648_v36  ;;  %v5656_v33 = vsel %vm2367_vm15, %v8016_v61, %v5217_v27  ;;  %v8031_v36 = vld [vmem:[#allocation2 + $0xbc] sm:$0xff]  }
 0x2e0   : > { %v5037_v52 = vpop.permute.xlu0 %5036 }
 0x2e1   : > { %v5616_v47 = vsel %vm2367_vm15, %v8022_v20, %v5037_v52  ;;  %v8033_v52 = vld [vmem:[#allocation2 + $0x210] sm:$0xff]  }
 0x2e2   : > { %v4849_v28 = vpop.permute.xlu1 %4848  ;;  %6145 = vmatprep.mubr.bf16.mxu1 %v5616_v47 }
 0x2e3   : > { %6146 = vmatmul.mubr.bf16.gmra.mrb[100].mxu1 %v5552_v21  ;;  %v5560_v0 = vsel %vm2367_vm15, %v8032_v54, %v4849_v28 }
 0x2e4   : > { %v5407_v5 = vpop.permute.xlu0 %5406 }
 0x2e5   : > { %v5716_v53 = vsel %vm2367_vm15, %v8010_v56, %v5407_v5  ;;  %v8048_v56 = vld [vmem:[#allocation2 + $0x404] sm:$0xff]  }
 0x2e6   : > { %6250 = vmatprep.mubr.bf16.mxu0 %v5716_v53  ;;  %v5219_v13 = vpop.permute.xlu1 %5218 }
 0x2e7   : > { %6251 = vmatmul.mubr.bf16.gmra.mrb[104].mxu0 %v5652_v6  ;;  %v5660_v30 = vsel %vm2367_vm15, %v8021_v57, %v5219_v13  ;;  %v8052_v6 = vld [vmem:[#allocation2 + $0x300] sm:$0xff]  }
 0x2e9   : > { %v5039_v50 = vpop.permute.xlu0 %5038 }
 0x2ea   : > { %v5620_v46 = vsel %vm2367_vm15, %v8026_v8, %v5039_v50  ;;  %v4851_v35 = vpop.permute.xlu1 %4850  ;;  %v8035_v8 = vld [vmem:[#allocation2 + $0xd0] sm:$0xff]  }
 0x2eb   : > { %6153 = vmatprep.mubr.bf16.mxu1 %v5620_v46  ;;  %v5564_v16 = vsel %vm2367_vm15, %v8037_v40, %v4851_v35  ;;  %v8038_v46 = vld [vmem:[#allocation2 + $0x224] sm:$0xff]   ;;  %v8063_v40 = vld [vmem:[#allocation2 + $0x378] sm:$0xff]  }
 0x2ec   : > { %6154 = vmatmul.mubr.bf16.gmra.mrb[104].mxu1 %v5556_v7  ;;  %v8054_v7 = vld [vmem:[#allocation2 + $0x314] sm:$0xff]  }
 0x2ed   : > { %v5409_v32 = vpop.permute.xlu0 %5408 }
 0x2ee   : > { %v5720_v3 = vsel %vm2367_vm15, %v8014_v2, %v5409_v32  ;;  %v5221_v14 = vpop.permute.xlu1 %5220  ;;  %v8040_v32 = vld [vmem:[#allocation2 + $0xe4] sm:$0xff]  }
 0x2ef   : > { %6258 = vmatprep.mubr.bf16.mxu0 %v5720_v3  ;;  %v5664_v39 = vsel %vm2367_vm15, %v8025_v43, %v5221_v14  ;;  %v8056_v3 = vld [vmem:[#allocation2 + $0x328] sm:$0xff]  }
 0x2f0   : > { %6259 = vmatmul.mubr.bf16.gmra.mrb[108].mxu0 %v5656_v33 }
 0x2f1   : > { %v5041_v22 = vpop.permute.xlu0 %5040 }
 0x2f2   : > { %v5624_v29 = vsel %vm2367_vm15, %v8030_v41, %v5041_v22  ;;  %v8042_v22 = vld [vmem:[#allocation2 + $0x238] sm:$0xff]  }
 0x2f3   : > { %6161 = vmatprep.mubr.bf16.mxu1 %v5624_v29  ;;  %v4853_v17 = vpop.permute.xlu1 %4852  ;;  %v8043_v29 = vld [vmem:[#allocation2 + $0xf8] sm:$0xff]  }
 0x2f4   : > { %6162 = vmatmul.mubr.bf16.gmra.mrb[108].mxu1 %v5560_v0  ;;  %v5568_v26 = vsel %vm2367_vm15, %v8041_v58, %v4853_v17  ;;  %v8053_v58 = vld [vmem:[#allocation2 + $0x274] sm:$0xff]  }
 0x2f5   : > { %v5411_v10 = vpop.permute.xlu0 %5410 }
 0x2f6   : > { %v5724_v51 = vsel %vm2367_vm15, %v8018_v60, %v5411_v10  ;;  %v8058_v60 = vld [vmem:[#allocation2 + $0x33c] sm:$0xff]   ;;  %v8060_v10 = vld [vmem:[#allocation2 + $0x350] sm:$0xff]  }
 0x2f7   : > { %6266 = vmatprep.mubr.bf16.mxu0 %v5724_v51  ;;  %v5223_v38 = vpop.permute.xlu1 %5222  ;;  %v8046_v51 = vld [vmem:[#allocation2 + $0x24c] sm:$0xff]  }
 0x2f8   : > { %6267 = vmatmul.mubr.bf16.gmra.mrb[112].mxu0 %v5660_v30  ;;  %v5668_v1 = vsel %vm2367_vm15, %v8029_v9, %v5223_v38  ;;  %v8047_v30 = vld [vmem:[#allocation2 + $0x10c] sm:$0xff]   ;;  %v8050_v38 = vld [vmem:[#allocation2 + $0x260] sm:$0xff]  }
 0x2fa   : > { %v5043_v31 = vpop.permute.xlu0 %5042 }
 0x2fb   : > { %v5628_v11 = vsel %vm2367_vm15, %v8034_v12, %v5043_v31  ;;  %v4855_v34 = vpop.permute.xlu1 %4854  ;;  %v8062_v31 = vld [vmem:[#allocation2 + $0x364] sm:$0xff]  }
 0x2fc   : > { %6169 = vmatprep.mubr.bf16.mxu1 %v5628_v11  ;;  %v5572_v27 = vsel %vm2367_vm15, %v8045_v62, %v4855_v34  ;;  %v8055_v34 = vld [vmem:[#allocation2 + $0x134] sm:$0xff]   ;;  %v8064_v62 = vld [vmem:[#allocation2 + $0x15c] sm:$0xff]  }
 0x2fd   : > { %6170 = vmatmul.mubr.bf16.gmra.mrb[112].mxu1 %v5564_v16 }
 0x2ff   : > { %v5413_v42 = vpop.permute.xlu0 %5412  ;;  %v5225_v63 = vpop.permute.xlu1 %5224 }
 0x300   : > { %v5728_v37 = vsel %vm2367_vm15, %v8023_v15, %v5413_v42  ;;  %v5672_v19 = vsel %vm2367_vm15, %v8033_v52, %v5225_v63  ;;  %v8051_v15 = vld [vmem:[#allocation2 + $0x120] sm:$0xff]   ;;  %v8059_v63 = vld [vmem:[#allocation2 + $0x148] sm:$0xff]  }
 0x301   : > { %6274 = vmatprep.mubr.bf16.mxu0 %v5728_v37  ;;  %v8066_v37 = vld [vmem:[#allocation2 + $0x38c] sm:$0xff]   ;;  %v8061_v52 = vld [vmem:[#allocation2 + $0x29c] sm:$0xff]  }
 0x302   : > { %6275 = vmatmul.mubr.bf16.gmra.mrb[116].mxu0 %v5664_v39  ;;  %v8067_v39 = vld [vmem:[#allocation2 + $0x3a0] sm:$0xff]  }
 0x303   : > { %v5045_v4 = vpop.permute.xlu0 %5044  ;;  %v4857_v28 = vpop.permute.xlu1 %4856 }
 0x304   : > { %v5632_v48 = vsel %vm2367_vm15, %v8039_v23, %v5045_v4  ;;  %v5576_v53 = vsel %vm2367_vm15, %v8049_v24, %v4857_v28  ;;  %v8065_v24 = vld [vmem:[#allocation2 + $0x2b0] sm:$0xff]  }
 0x305   : > { %6177 = vmatprep.mubr.bf16.mxu1 %v5632_v48 }
 0x306   : > { %6178 = vmatmul.mubr.bf16.gmra.mrb[116].mxu1 %v5568_v26 }
 0x307   : > { %v5415_v25 = vpop.permute.xlu0 %5414  ;;  %v5227_v13 = vpop.permute.xlu1 %5226 }
 0x308   : > { %v5732_v44 = vsel %vm2367_vm15, %v8027_v59, %v5415_v25  ;;  %v5676_v2 = vsel %vm2367_vm15, %v8038_v46, %v5227_v13  ;;  %v8068_v59 = vld [vmem:[#allocation2 + $0x3b4] sm:$0xff]   ;;  %v8069_v25 = vld [vmem:[#allocation2 + $0x3c8] sm:$0xff]  }
 0x309   : > { %6282 = vmatprep.mubr.bf16.mxu0 %v5732_v44 }
 0x30a   : > { %6283 = vmatmul.mubr.bf16.gmra.mrb[120].mxu0 %v5668_v1  ;;  %v8057_v1 = vld [vmem:[#allocation2 + $0x288] sm:$0xff]  }
 0x30b   : > { %v5047_v55 = vpop.permute.xlu0 %5046  ;;  %v5229_v33 = vpop.permute.xlu1 %5228 }
 0x30c   : > { %v5636_v49 = vsel %vm2367_vm15, %v8044_v45, %v5047_v55  ;;  %v5680_v14 = vsel %vm2367_vm15, %v8042_v22, %v5229_v33 }
 0x30d   : > { %6185 = vmatprep.mubr.bf16.mxu1 %v5636_v49  ;;  %v8070_v49 = vld [vmem:[#allocation2 + $0x3dc] sm:$0xff]  }
 0x30e   : > { %6186 = vmatmul.mubr.bf16.gmra.mrb[120].mxu1 %v5572_v27 }
 0x30f   : > { %v5417_v20 = vpop.permute.xlu0 %5416  ;;  %v5231_v57 = vpop.permute.xlu1 %5230 }
 0x310   : > { %v5736_v47 = vsel %vm2367_vm15, %v8031_v36, %v5417_v20  ;;  %v5684_v17 = vsel %vm2367_vm15, %v8046_v51, %v5231_v57  ;;  %v8071_v36 = vld [vmem:[#allocation2 + $0x3f0] sm:$0xff]  }
 0x311   : > { %6290 = vmatprep.mubr.bf16.mxu0 %v5736_v47 }
 0x312   : > { %6291 = vmatmul.mubr.bf16.gmra.mrb[124].mxu0 %v5672_v19  ;;  %v8072_v19 = vld [vmem:[#allocation2 + $0x404] sm:$0xff]  }
 0x313   : > { %v5049_v5 = vpop.permute.xlu0 %5048  ;;  %v5233_v11 = vpop.permute.xlu1 %5232 }
 0x314   : > { %v5640_v21 = vsel %vm2367_vm15, %v8048_v56, %v5049_v5  ;;  %v5688_v42 = vsel %vm2367_vm15, %v8050_v38, %v5233_v11  ;;  %v8073_v56 = vld [vmem:[#allocation2 + $0x418] sm:$0xff]  }
 0x315   : > { %6193 = vmatprep.mubr.bf16.mxu1 %v5640_v21 }
 0x316   : > { %6194 = vmatmul.mubr.bf16.gmra.mrb[124].mxu1 %v5576_v53  ;;  %v8074_v53 = vld [vmem:[#allocation2 + $0x42c] sm:$0xff]  }
 0x317   : > { %v5419_v50 = vpop.permute.xlu0 %5418  ;;  %7640 = vmatprep.mubr.msk.bf16.mxu1 %vm2367_vm15, %v8052_v6  ;;  %v5235_v23 = vpop.permute.xlu1 %5234 }
 0x318   : > { %v5740_v18 = vsel %vm2367_vm15, %v8035_v8, %v5419_v50  ;;  %v5692_v48 = vsel %vm2367_vm15, %v8053_v58, %v5235_v23 }
 0x319   : > { %6298 = vmatprep.mubr.bf16.mxu0 %v5740_v18 }
 0x31a   : > { %6299 = vmatmul.mubr.bf16.gmra.mrb[128].mxu0 %v5676_v2 }
 0x31b   : > { %v5421_v35 = vpop.permute.xlu0 %5420  ;;  %v5237_v9 = vpop.permute.xlu1 %5236 }
 0x31c   : > { %v5744_v61 = vsel %vm2367_vm15, %v8040_v32, %v5421_v35  ;;  %v5696_v45 = vsel %vm2367_vm15, %v8057_v1, %v5237_v9 }
 0x31d   : > { %6306 = vmatprep.mubr.bf16.mxu0 %v5744_v61 }
 0x31e   : > { %7641 = vmatmul.mubr.msk.bf16.vlgmr.msra.gmra.mrb[128].mxu1 %vm2367_vm15, %v8054_v7 }
 0x31f   : > { %v5423_v41 = vpop.permute.xlu0 %5422  ;;  %7644 = vmatprep.mubr.msk.bf16.mxu1 %vm2367_vm15, %v8056_v3  ;;  %v5239_v20 = vpop.permute.xlu1 %5238 }
 0x320   : > { %v5748_v54 = vsel %vm2367_vm15, %v8043_v29, %v5423_v41  ;;  %v5700_v47 = vsel %vm2367_vm15, %v8061_v52, %v5239_v20 }
 0x322   : > { %6307 = vmatmul.mubr.bf16.gmra.mrb[132].mxu0 %v5680_v14 }
 0x323   : > { %6314 = vmatprep.mubr.bf16.mxu0 %v5748_v54  ;;  %v5425_v0 = vpop.permute.xlu0 %5424  ;;  %v5241_v5 = vpop.permute.xlu1 %5240 }
 0x324   : > { %v5752_v12 = vsel %vm2367_vm15, %v8047_v30, %v5425_v0  ;;  %v5704_v21 = vsel %vm2367_vm15, %v8065_v24, %v5241_v5 }
 0x326   : > { %7645 = vmatmul.mubr.msk.bf16.gmra.mrb[132].mxu1 %vm2367_vm15, %v8058_v60 }
 0x327   : > { %7648 = vmatprep.mubr.msk.bf16.mxu1 %vm2367_vm15, %v8060_v10  ;;  %v5427_v16 = vpop.permute.xlu0 %5426 }
 0x328   : > { %v5756_v43 = vsel %vm2367_vm15, %v8051_v15, %v5427_v16 }
 0x32a   : > { %6315 = vmatmul.mubr.bf16.gmra.mrb[136].mxu0 %v5684_v17 }
 0x32b   : > { %6322 = vmatprep.mubr.bf16.mxu0 %v5752_v12  ;;  %v5429_v4 = vpop.permute.xlu0 %5428 }
 0x32c   : > { %v5760_v26 = vsel %vm2367_vm15, %v8055_v34, %v5429_v4 }
 0x32e   : > { %7649 = vmatmul.mubr.msk.bf16.gmra.mrb[136].mxu1 %vm2367_vm15, %v8062_v31 }
 0x32f   : > { %7652 = vmatprep.mubr.msk.bf16.mxu1 %vm2367_vm15, %v8063_v40  ;;  %v5431_v44 = vpop.permute.xlu0 %5430 }
 0x330   : > { %v5764_v55 = vsel %vm2367_vm15, %v8059_v63, %v5431_v44 }
 0x332   : > { %6323 = vmatmul.mubr.bf16.gmra.mrb[140].mxu0 %v5688_v42 }
 0x333   : > { %6330 = vmatprep.mubr.bf16.mxu0 %v5756_v43  ;;  %v5433_v27 = vpop.permute.xlu0 %5432 }
 0x334   : > { %v5768_v28 = vsel %vm2367_vm15, %v8064_v62, %v5433_v27 }
 0x336   : > { %7653 = vmatmul.mubr.msk.bf16.gmra.mrb[140].mxu1 %vm2367_vm15, %v8066_v37 }
 0x337   : > { %7656 = vmatprep.mubr.msk.bf16.mxu1 %vm2367_vm15, %v8067_v39 }
 0x33a   : > { %6331 = vmatmul.mubr.bf16.gmra.mrb[144].mxu0 %v5692_v48 }
 0x33b   : > { %6338 = vmatprep.mubr.bf16.mxu0 %v5760_v26 }
 0x33e   : > { %7657 = vmatmul.mubr.msk.bf16.gmra.mrb[144].mxu1 %vm2367_vm15, %v8068_v59  ;;  %v10560_v59 = vld [vmem:[%s10849_s4] ss:$0 sm:$0xff] }
 0x33f   : > { %7660 = vmatprep.mubr.msk.bf16.mxu1 %vm2367_vm15, %v8069_v25 }
 0x342   : > { %6339 = vmatmul.mubr.bf16.gmra.mrb[148].mxu0 %v5696_v45 }
 0x343   : > { %6346 = vmatprep.mubr.bf16.mxu0 %v5764_v55 }
 0x346   : > { %7661 = vmatmul.mubr.msk.bf16.gmra.mrb[148].mxu1 %vm2367_vm15, %v8070_v49 }
 0x347   : > { %7664 = vmatprep.mubr.msk.bf16.mxu1 %vm2367_vm15, %v8071_v36 }
 0x34a   : > { %6347 = vmatmul.mubr.bf16.gmra.mrb[152].mxu0 %v5700_v47 }
 0x34b   : > { %6354 = vmatprep.mubr.bf16.mxu0 %v5768_v28 }
 0x34e   : > { %7665 = vmatmul.mubr.msk.bf16.gmra.mrb[152].mxu1 %vm2367_vm15, %v8072_v19 }
 0x34f   : > { %7668 = vmatprep.mubr.msk.bf16.mxu1 %vm2367_vm15, %v8073_v56 }
 0x352   : > { %6355 = vmatmul.mubr.bf16.gmra.mrb[156].mxu0 %v5704_v21 }
 0x356   : > { %7669 = vmatmul.mubr.msk.bf16.gmra.mrb[156].mxu1 %vm2367_vm15, %v8074_v53 }
 0x366   : > { %v7364_v6 = vpop.f32.mrb[64].mxu1 }
 0x367   : > { %v7365_v13 = vpop.f32.mrb[65].mxu1 }
 0x368   : > { %v7366_v8 = vadd.f32 %v7365_v13, %v7364_v6  ;;  %v7367_v50 = vpop.f32.mrb[66].mxu1 }
 0x369   : > { %v7368_v46 = vpop.f32.mrb[67].mxu1 }
 0x36a   : > { %v7369_v18 = vadd.f32 %v7368_v46, %v7367_v50  ;;  %v6076_v44 = vadd.f32 %v7366_v8, %v10560_v59 }
 0x36c   : > { %v6079_v49 = vadd.f32 %v7369_v18, %v10560_v59 }
 0x36e   : > { %v7370_v2 = vpop.f32.mrb[68].mxu1 }
 0x36f   : > { %v7371_v32 = vpop.f32.mrb[69].mxu1 }
 0x370   : > { %v7372_v35 = vadd.f32 %v7371_v32, %v7370_v2  ;;  %v7373_v61 = vpop.f32.mrb[70].mxu1 }
 0x371   : > { %v7374_v7 = vpop.f32.mrb[71].mxu1 }
 0x372   : > { %v7375_v3 = vadd.f32 %v7374_v7, %v7373_v61  ;;  %v6084_v8 = vadd.f32 %v7372_v35, %v10560_v59 }
 0x374   : > { %v6087_v32 = vadd.f32 %v7375_v3, %v10560_v59 }
 0x37a   : > { %v7376_v33 = vpop.f32.mrb[72].mxu1 }
 0x37b   : > { %v7377_v41 = vpop.f32.mrb[73].mxu1 }
 0x37c   : > { %v10537_v22 = vadd.f32 %v7377_v41, %v7376_v33  ;;  %v7379_v29 = vpop.f32.mrb[74].mxu1 }
 0x37d   : > { %v7380_v14 = vpop.f32.mrb[75].mxu1 }
 0x37e   : > { %v10539_v54 = vadd.f32 %v7380_v14, %v7379_v29 }
 0x382   : > { %v7382_v60 = vpop.f32.mrb[76].mxu1 }
 0x383   : > { %v7383_v10 = vpop.f32.mrb[77].mxu1 }
 0x384   : > { %v10541_v57 = vadd.f32 %v7383_v10, %v7382_v60  ;;  %v7385_v0 = vpop.f32.mrb[78].mxu1 }
 0x385   : > { %v7386_v51 = vpop.f32.mrb[79].mxu1 }
 0x386   : > { %v10543_v30 = vadd.f32 %v7386_v51, %v7385_v0  ;;  %v6092_v51 = vadd.f32 %v10537_v22, %v10560_v59 }
 0x38e   : > { %v7388_v17 = vpop.f32.mrb[80].mxu1 }
 0x38f   : > { %v7389_v12 = vpop.f32.mrb[81].mxu1 }
 0x390   : > { %v10545_v31 = vadd.f32 %v7389_v12, %v7388_v17  ;;  %v7391_v40 = vpop.f32.mrb[82].mxu1 }
 0x391   : > { %v7392_v11 = vpop.f32.mrb[83].mxu1 }
 0x392   : > { %v10547_v16 = vadd.f32 %v7392_v11, %v7391_v40  ;;  %v6095_v11 = vadd.f32 %v10539_v54, %v10560_v59 }
 0x396   : > { %v7394_v38 = vpop.f32.mrb[84].mxu1 }
 0x397   : > { %v7395_v15 = vpop.f32.mrb[85].mxu1 }
 0x398   : > { %v10549_v42 = vadd.f32 %v7395_v15, %v7394_v38  ;;  %v7397_v43 = vpop.f32.mrb[86].mxu1 }
 0x399   : > { %v7398_v37 = vpop.f32.mrb[87].mxu1 }
 0x39a   : > { %v10551_v39 = vadd.f32 %v7398_v37, %v7397_v43 }
 0x39e   : > { %v7400_v23 = vpop.f32.mrb[88].mxu1 }
 0x39f   : > { %v7401_v4 = vpop.f32.mrb[89].mxu1 }
 0x3a0   : > { %v10553_v58 = vadd.f32 %v7401_v4, %v7400_v23  ;;  %v7403_v34 = vpop.f32.mrb[90].mxu1 }
 0x3a1   : > { %v7404_v48 = vpop.f32.mrb[91].mxu1 }
 0x3a2   : > { %v10555_v26 = vadd.f32 %v7404_v48, %v7403_v34 }
 0x3a5   : > { %v7476_v25 = vpop.f32.mrb[96].mxu0 }
 0x3a6   : > { %v7477_v9 = vpop.f32.mrb[97].mxu0  ;;  %v7406_v45 = vpop.f32.mrb[92].mxu1 }
 0x3a7   : > { %v7478_v1 = vadd.f32 %v7477_v9, %v7476_v25  ;;  %v7479_v63 = vpop.f32.mrb[98].mxu0  ;;  %v7407_v62 = vpop.f32.mrb[93].mxu1  ;;  %v6100_v9 = vadd.f32 %v10541_v57, %v10560_v59 }
 0x3a8   : > { %v7480_v55 = vpop.f32.mrb[99].mxu0  ;;  %v10564_v36 = vadd.f32 %v7407_v62, %v7406_v45  ;;  %v7409_v20 = vpop.f32.mrb[94].mxu1  ;;  %v6103_v45 = vadd.f32 %v10543_v30, %v10560_v59 }
 0x3a9   : > { %v7481_v27 = vadd.f32 %v7480_v55, %v7479_v63  ;;  %v10566_v52 = vadd.f32 %v7478_v1, %v6076_v44  ;;  %v7410_v28 = vpop.f32.mrb[95].mxu1 }
 0x3aa   : > { %v10568_v47 = vadd.f32 %v7410_v28, %v7409_v20 }
 0x3ab   : > { %v10570_v19 = vadd.f32 %v7481_v27, %v6079_v49 }
 0x3ae   : > { %v7412_v56 = vpop.f32.mrb[96].mxu1 }
 0x3af   : > { %v7413_v5 = vpop.f32.mrb[97].mxu1 }
 0x3b0   : > { %v10572_v21 = vadd.f32 %v7413_v5, %v7412_v56  ;;  %v7415_v53 = vpop.f32.mrb[98].mxu1 }
 0x3b1   : > { %v7416_v13 = vpop.f32.mrb[99].mxu1 }
 0x3b2   : > { %v7482_v24 = vpop.f32.mrb[100].mxu0  ;;  %v10575_v18 = vadd.f32 %v7416_v13, %v7415_v53  ;;  %v6108_v53 = vadd.f32 %v10545_v31, %v10560_v59 }
 0x3b3   : > { %v7483_v6 = vpop.f32.mrb[101].mxu0 }
 0x3b4   : > { %v7484_v50 = vadd.f32 %v7483_v6, %v7482_v24  ;;  %v7485_v46 = vpop.f32.mrb[102].mxu0 }
 0x3b5   : > { %v7486_v2 = vpop.f32.mrb[103].mxu0 }
 0x3b6   : > { %v7487_v61 = vadd.f32 %v7486_v2, %v7485_v46  ;;  %v10578_v7 = vadd.f32 %v7484_v50, %v6084_v8  ;;  %v7418_v33 = vpop.f32.mrb[100].mxu1  ;;  %v6111_v50 = vadd.f32 %v10547_v16, %v10560_v59 }
 0x3b7   : > { %v7419_v29 = vpop.f32.mrb[101].mxu1 }
 0x3b8   : > { %v10580_v41 = vadd.f32 %v7487_v61, %v6087_v32  ;;  %v10582_v60 = vadd.f32 %v7419_v29, %v7418_v33  ;;  %v7421_v10 = vpop.f32.mrb[102].mxu1 }
 0x3b9   : > { %v7422_v35 = vpop.f32.mrb[103].mxu1 }
 0x3ba   : > { %v7488_v14 = vpop.f32.mrb[104].mxu0  ;;  %v10586_v40 = vadd.f32 %v7422_v35, %v7421_v10 }
 0x3bb   : > { %v7489_v0 = vpop.f32.mrb[105].mxu0 }
 0x3bc   : > { %v7490_v17 = vadd.f32 %v7489_v0, %v7488_v14  ;;  %v7491_v12 = vpop.f32.mrb[106].mxu0 }
 0x3bd   : > { %v7492_v3 = vpop.f32.mrb[107].mxu0 }
 0x3be   : > { %v7493_v38 = vadd.f32 %v7492_v3, %v7491_v12  ;;  %v10590_v15 = vadd.f32 %v7490_v17, %v6092_v51  ;;  %v6116_v51 = vadd.f32 %v10549_v42, %v10560_v59  ;;  %v6119_v3 = vadd.f32 %v10551_v39, %v10560_v59 }
 0x3bf   : > { %v7424_v43 = vpop.f32.mrb[104].mxu1 }
 0x3c0   : > { %v10592_v37 = vadd.f32 %v7493_v38, %v6095_v11  ;;  %v7425_v23 = vpop.f32.mrb[105].mxu1 }
 0x3c1   : > { %v10594_v34 = vadd.f32 %v7425_v23, %v7424_v43  ;;  %v7427_v48 = vpop.f32.mrb[106].mxu1 }
 0x3c2   : > { %v7428_v25 = vpop.f32.mrb[107].mxu1 }
 0x3c3   : > { %v7494_v4 = vpop.f32.mrb[108].mxu0  ;;  %v10598_v63 = vadd.f32 %v7428_v25, %v7427_v48 }
 0x3c4   : > { %v7495_v22 = vpop.f32.mrb[109].mxu0 }
 0x3c5   : > { %v7496_v44 = vadd.f32 %v7495_v22, %v7494_v4  ;;  %v7497_v1 = vpop.f32.mrb[110].mxu0 }
 0x3c6   : > { %v7498_v54 = vpop.f32.mrb[111].mxu0 }
 0x3c7   : > { %v7499_v55 = vadd.f32 %v7498_v54, %v7497_v1  ;;  %v10602_v62 = vadd.f32 %v7496_v44, %v6100_v9  ;;  %v7430_v49 = vpop.f32.mrb[108].mxu1  ;;  %v6124_v1 = vadd.f32 %v10553_v58, %v10560_v59 }
 0x3c8   : > { %v7431_v20 = vpop.f32.mrb[109].mxu1 }
 0x3c9   : > { %v10604_v27 = vadd.f32 %v7499_v55, %v6103_v45  ;;  %v10606_v56 = vadd.f32 %v7431_v20, %v7430_v49  ;;  %v7433_v5 = vpop.f32.mrb[110].mxu1  ;;  %v6127_v55 = vadd.f32 %v10555_v26, %v10560_v59 }
 0x3ca   : > { %v7434_v24 = vpop.f32.mrb[111].mxu1 }
 0x3cb   : > { %v7500_v28 = vpop.f32.mrb[112].mxu0  ;;  %v10610_v8 = vadd.f32 %v7434_v24, %v7433_v5 }
 0x3cc   : > { %v7501_v57 = vpop.f32.mrb[113].mxu0 }
 0x3cd   : > { %v7502_v6 = vadd.f32 %v7501_v57, %v7500_v28  ;;  %v7503_v13 = vpop.f32.mrb[114].mxu0 }
 0x3ce   : > { %v7504_v30 = vpop.f32.mrb[115].mxu0 }
 0x3cf   : > { %v7505_v46 = vadd.f32 %v7504_v30, %v7503_v13  ;;  %v10614_v2 = vadd.f32 %v7502_v6, %v6108_v53 }
 0x3d0   : > { %v7436_v61 = vpop.f32.mrb[112].mxu1 }
 0x3d1   : > { %v10616_v32 = vadd.f32 %v7505_v46, %v6111_v50  ;;  %v7437_v33 = vpop.f32.mrb[113].mxu1  ;;  %v6132_v50 = vadd.f32 %v10564_v36, %v10560_v59 }
 0x3d2   : > { %v10618_v29 = vadd.f32 %v7437_v33, %v7436_v61  ;;  %v7439_v14 = vpop.f32.mrb[114].mxu1  ;;  %v6135_v33 = vadd.f32 %v10568_v47, %v10560_v59  ;;  %v6140_v47 = vadd.f32 %v10572_v21, %v10560_v59 }
 0x3d3   : > { %v7440_v10 = vpop.f32.mrb[115].mxu1 }
 0x3d4   : > { %v10620_v0 = vadd.f32 %v7440_v10, %v7439_v14 }
 0x3d5   : > { %v7506_v31 = vpop.f32.mrb[116].mxu0 }
 0x3d6   : > { %v7507_v35 = vpop.f32.mrb[117].mxu0 }
 0x3d7   : > { %v7508_v17 = vadd.f32 %v7507_v35, %v7506_v31  ;;  %v7509_v16 = vpop.f32.mrb[118].mxu0 }
 0x3d8   : > { %v7510_v12 = vpop.f32.mrb[119].mxu0 }
 0x3d9   : > { %v7511_v11 = vadd.f32 %v7510_v12, %v7509_v16  ;;  %v7442_v38 = vpop.f32.mrb[116].mxu1  ;;  %v10626_v43 = vadd.f32 %v7508_v17, %v6116_v51 }
 0x3da   : > { %v7443_v23 = vpop.f32.mrb[117].mxu1 }
 0x3db   : > { %v10628_v4 = vadd.f32 %v7443_v23, %v7442_v38  ;;  %v7445_v48 = vpop.f32.mrb[118].mxu1  ;;  %v10630_v22 = vadd.f32 %v7511_v11, %v6119_v3 }
 0x3dc   : > { %v7446_v25 = vpop.f32.mrb[119].mxu1 }
 0x3dd   : > { %v7512_v9 = vpop.f32.mrb[120].mxu0  ;;  %v10632_v44 = vadd.f32 %v7446_v25, %v7445_v48  ;;  %v6143_v25 = vadd.f32 %v10575_v18, %v10560_v59 }
 0x3de   : > { %v7513_v42 = vpop.f32.mrb[121].mxu0 }
 0x3df   : > { %v7514_v54 = vadd.f32 %v7513_v42, %v7512_v9  ;;  %v7515_v39 = vpop.f32.mrb[122].mxu0 }
 0x3e0   : > { %v7516_v45 = vpop.f32.mrb[123].mxu0 }
 0x3e1   : > { %v7517_v49 = vadd.f32 %v7516_v45, %v7515_v39  ;;  %v7448_v20 = vpop.f32.mrb[120].mxu1  ;;  %v10638_v28 = vadd.f32 %v7514_v54, %v6124_v1 }
 0x3e2   : > { %v7449_v5 = vpop.f32.mrb[121].mxu1 }
 0x3e3   : > { %v10640_v57 = vadd.f32 %v7449_v5, %v7448_v20  ;;  %v7451_v24 = vpop.f32.mrb[122].mxu1  ;;  %v10642_v53 = vadd.f32 %v7517_v49, %v6127_v55  ;;  %v6148_v5 = vadd.f32 %v10582_v60, %v10560_v59 }
 0x3e4   : > { %v7452_v6 = vpop.f32.mrb[123].mxu1 }
 0x3e5   : > { %v7518_v13 = vpop.f32.mrb[124].mxu0  ;;  %v10644_v58 = vadd.f32 %v7452_v6, %v7451_v24 }
 0x3e6   : > { %v7519_v30 = vpop.f32.mrb[125].mxu0 }
 0x3e7   : > { %v7520_v26 = vadd.f32 %v7519_v30, %v7518_v13  ;;  %v7521_v46 = vpop.f32.mrb[126].mxu0 }
 0x3e8   : > { %v7522_v61 = vpop.f32.mrb[127].mxu0 }
 0x3e9   : > { %v7523_v14 = vadd.f32 %v7522_v61, %v7521_v46  ;;  %v7454_v10 = vpop.f32.mrb[124].mxu1  ;;  %v10650_v31 = vadd.f32 %v7520_v26, %v6132_v50 }
 0x3ea   : > { %v7455_v35 = vpop.f32.mrb[125].mxu1 }
 0x3eb   : > { %v10652_v51 = vadd.f32 %v7455_v35, %v7454_v10  ;;  %v7457_v17 = vpop.f32.mrb[126].mxu1  ;;  %v10655_v16 = vadd.f32 %v7523_v14, %v6135_v33 }
 0x3ec   : > { %v7458_v12 = vpop.f32.mrb[127].mxu1 }
 0x3ed   : > { %v7524_v36 = vpop.f32.mrb[128].mxu0  ;;  %v10657_v3 = vadd.f32 %v7458_v12, %v7457_v17 }
 0x3ee   : > { %v7525_v11 = vpop.f32.mrb[129].mxu0 }
 0x3ef   : > { %v7526_v38 = vadd.f32 %v7525_v11, %v7524_v36  ;;  %v7527_v23 = vpop.f32.mrb[130].mxu0 }
 0x3f0   : > { %v7528_v48 = vpop.f32.mrb[131].mxu0 }
 0x3f1   : > { %v7529_v9 = vadd.f32 %v7528_v48, %v7527_v23  ;;  %v7642_v42 = vpop.f32.mrb[128].mxu1  ;;  %v10665_v1 = vadd.f32 %v7526_v38, %v6140_v47 }
 0x3f2   : > { %v6406_v54 = vadd.f32 %v7642_v42, %v10578_v7  ;;  %v6397_v39 = vpop.f32.mrb[129].mxu1 }
 0x3f3   : > { %v6398_v45 = vadd.f32 %v6397_v39, %v10566_v52  ;;  %v7643_v55 = vpop.f32.mrb[130].mxu1  ;;  %v10669_v49 = vadd.f32 %v7529_v9, %v6143_v25 }
 0x3f4   : > { %6526 = vst.msk [vmem:[%s10671_s11 + $0x10] sm:$0xff] %vm2367_vm15, %v6406_v54  ;;  %v6409_v21 = vadd.f32 %v7643_v55, %v10580_v41  ;;  %v6400_v18 = vpop.f32.mrb[131].mxu1  ;;  %v6151_v41 = vadd.f32 %v10586_v40, %v10560_v59 }
 0x3f5   : > { %v7530_v20 = vpop.f32.mrb[132].mxu0  ;;  %6524 = vst.msk [vmem:[%s10671_s11] sm:$0xff] %vm2367_vm15, %v6398_v45  ;;  %v6401_v7 = vadd.f32 %v6400_v18, %v10570_v19 }
 0x3f6   : > { %v7531_v52 = vpop.f32.mrb[133].mxu0  ;;  %6527 = vst.msk [vmem:[%s10671_s11 + $0x18] sm:$0xff] %vm2367_vm15, %v6409_v21 }
 0x3f7   : > { %v7532_v24 = vadd.f32 %v7531_v52, %v7530_v20  ;;  %v7533_v6 = vpop.f32.mrb[134].mxu0  ;;  %6525 = vst.msk [vmem:[%s10671_s11 + $0x8] sm:$0xff] %vm2367_vm15, %v6401_v7 }
 0x3f8   : > { %v7534_v13 = vpop.f32.mrb[135].mxu0 }
 0x3f9   : > { %v7535_v30 = vadd.f32 %v7534_v13, %v7533_v6  ;;  %v7646_v50 = vpop.f32.mrb[132].mxu1  ;;  %v10687_v19 = vadd.f32 %v7532_v24, %v6148_v5 }
 0x3fa   : > { %v6422_v26 = vadd.f32 %v7646_v50, %v10602_v62  ;;  %v6413_v46 = vpop.f32.mrb[133].mxu1 }
 0x3fb   : > { %v6414_v60 = vadd.f32 %v6413_v46, %v10590_v15  ;;  %v7647_v61 = vpop.f32.mrb[134].mxu1  ;;  %v10691_v33 = vadd.f32 %v7535_v30, %v6151_v41  ;;  %v6156_v15 = vadd.f32 %v10594_v34, %v10560_v59 }
 0x3fc   : > { %6530 = vst.msk [vmem:[%s10671_s11 + $0x30] sm:$0xff] %vm2367_vm15, %v6422_v26  ;;  %v6425_v14 = vadd.f32 %v7647_v61, %v10604_v27  ;;  %v6416_v10 = vpop.f32.mrb[135].mxu1  ;;  %v6159_v27 = vadd.f32 %v10598_v63, %v10560_v59 }
 0x3fd   : > { %v7536_v40 = vpop.f32.mrb[136].mxu0  ;;  %6528 = vst.msk [vmem:[%s10671_s11 + $0x20] sm:$0xff] %vm2367_vm15, %v6414_v60  ;;  %v6417_v35 = vadd.f32 %v6416_v10, %v10592_v37 }
 0x3fe   : > { %v7537_v17 = vpop.f32.mrb[137].mxu0  ;;  %6531 = vst.msk [vmem:[%s10671_s11 + $0x38] sm:$0xff] %vm2367_vm15, %v6425_v14 }
 0x3ff   : > { %v7538_v62 = vadd.f32 %v7537_v17, %v7536_v40  ;;  %v7539_v12 = vpop.f32.mrb[138].mxu0  ;;  %6529 = vst.msk [vmem:[%s10671_s11 + $0x28] sm:$0xff] %vm2367_vm15, %v6417_v35 }
 0x400   : > { %v7540_v36 = vpop.f32.mrb[139].mxu0 }
 0x401   : > { %v7541_v11 = vadd.f32 %v7540_v36, %v7539_v12  ;;  %v7650_v47 = vpop.f32.mrb[136].mxu1  ;;  %v10707_v37 = vadd.f32 %v7538_v62, %v6156_v15 }
 0x402   : > { %v6438_v38 = vadd.f32 %v7650_v47, %v10626_v43  ;;  %v6429_v23 = vpop.f32.mrb[137].mxu1 }
 0x403   : > { %v6430_v34 = vadd.f32 %v6429_v23, %v10614_v2  ;;  %v7651_v48 = vpop.f32.mrb[138].mxu1  ;;  %v10711_v25 = vadd.f32 %v7541_v11, %v6159_v27  ;;  %v6164_v2 = vadd.f32 %v10606_v56, %v10560_v59 }
 0x404   : > { %6534 = vst.msk [vmem:[%s10671_s11 + $0x50] sm:$0xff] %vm2367_vm15, %v6438_v38  ;;  %v6441_v9 = vadd.f32 %v7651_v48, %v10630_v22  ;;  %v6432_v42 = vpop.f32.mrb[139].mxu1  ;;  %v6167_v22 = vadd.f32 %v10610_v8, %v10560_v59 }
 0x405   : > { %v7542_v63 = vpop.f32.mrb[140].mxu0  ;;  %6532 = vst.msk [vmem:[%s10671_s11 + $0x40] sm:$0xff] %vm2367_vm15, %v6430_v34  ;;  %v6433_v54 = vadd.f32 %v6432_v42, %v10616_v32 }
 0x406   : > { %v7543_v39 = vpop.f32.mrb[141].mxu0  ;;  %6535 = vst.msk [vmem:[%s10671_s11 + $0x58] sm:$0xff] %vm2367_vm15, %v6441_v9 }
 0x407   : > { %v7544_v43 = vadd.f32 %v7543_v39, %v7542_v63  ;;  %v7545_v45 = vpop.f32.mrb[142].mxu0  ;;  %6533 = vst.msk [vmem:[%s10671_s11 + $0x48] sm:$0xff] %vm2367_vm15, %v6433_v54  ;;  %v6188_v63 = vadd.f32 %v10640_v57, %v10560_v59 }
 0x408   : > { %v7546_v55 = vpop.f32.mrb[143].mxu0 }
 0x409   : > { %v7547_v21 = vadd.f32 %v7546_v55, %v7545_v45  ;;  %v7654_v18 = vpop.f32.mrb[140].mxu1  ;;  %v6325_v32 = vadd.f32 %v7544_v43, %v6164_v2  ;;  %v6191_v2 = vadd.f32 %v10644_v58, %v10560_v59 }
 0x40a   : > { %v6454_v20 = vadd.f32 %v7654_v18, %v10650_v31  ;;  %v6445_v7 = vpop.f32.mrb[141].mxu1  ;;  %v6172_v31 = vadd.f32 %v10618_v29, %v10560_v59 }
 0x40b   : > { %v6446_v52 = vadd.f32 %v6445_v7, %v10638_v28  ;;  %v7655_v56 = vpop.f32.mrb[142].mxu1  ;;  %v6328_v5 = vadd.f32 %v7547_v21, %v6167_v22 }
 0x40c   : > { %6538 = vst.msk [vmem:[%s10671_s11 + $0x70] sm:$0xff] %vm2367_vm15, %v6454_v20  ;;  %v6457_v24 = vadd.f32 %v7655_v56, %v10655_v16  ;;  %v6448_v6 = vpop.f32.mrb[143].mxu1  ;;  %v6175_v16 = vadd.f32 %v10620_v0, %v10560_v59  ;;  %v6196_v56 = vadd.f32 %v10652_v51, %v10560_v59 }
 0x40d   : > { %v7548_v13 = vpop.f32.mrb[144].mxu0  ;;  %6536 = vst.msk [vmem:[%s10671_s11 + $0x60] sm:$0xff] %vm2367_vm15, %v6446_v52  ;;  %v6449_v8 = vadd.f32 %v6448_v6, %v10642_v53 }
 0x40e   : > { %v7549_v41 = vpop.f32.mrb[145].mxu0  ;;  %6539 = vst.msk [vmem:[%s10671_s11 + $0x78] sm:$0xff] %vm2367_vm15, %v6457_v24 }
 0x40f   : > { %v7550_v28 = vadd.f32 %v7549_v41, %v7548_v13  ;;  %v7551_v30 = vpop.f32.mrb[146].mxu0  ;;  %6537 = vst.msk [vmem:[%s10671_s11 + $0x68] sm:$0xff] %vm2367_vm15, %v6449_v8  ;;  %v6199_v13 = vadd.f32 %v10657_v3, %v10560_v59 }
 0x410   : > { %v7552_v50 = vpop.f32.mrb[147].mxu0 }
 0x411   : > { %v7553_v26 = vadd.f32 %v7552_v50, %v7551_v30  ;;  %v7658_v46 = vpop.f32.mrb[144].mxu1  ;;  %v6333_v53 = vadd.f32 %v7550_v28, %v6172_v31 }
 0x412   : > { %v6470_v60 = vadd.f32 %v7658_v46, %v10687_v19  ;;  %v6461_v61 = vpop.f32.mrb[145].mxu1  ;;  %v6180_v19 = vadd.f32 %v10628_v4, %v10560_v59 }
 0x413   : > { %v6462_v14 = vadd.f32 %v6461_v61, %v10665_v1  ;;  %v7659_v29 = vpop.f32.mrb[146].mxu1  ;;  %v6336_v10 = vadd.f32 %v7553_v26, %v6175_v16 }
 0x414   : > { %6542 = vst.msk [vmem:[%s10671_s11 + $0x90] sm:$0xff] %vm2367_vm15, %v6470_v60  ;;  %v6473_v40 = vadd.f32 %v7659_v29, %v10691_v33  ;;  %v6464_v35 = vpop.f32.mrb[147].mxu1  ;;  %v6183_v33 = vadd.f32 %v10632_v44, %v10560_v59 }
 0x415   : > { %v7554_v17 = vpop.f32.mrb[148].mxu0  ;;  %6540 = vst.msk [vmem:[%s10671_s11 + $0x80] sm:$0xff] %vm2367_vm15, %v6462_v14  ;;  %v6465_v0 = vadd.f32 %v6464_v35, %v10669_v49 }
 0x416   : > { %v7555_v15 = vpop.f32.mrb[149].mxu0  ;;  %6543 = vst.msk [vmem:[%s10671_s11 + $0x98] sm:$0xff] %vm2367_vm15, %v6473_v40 }
 0x417   : > { %v7556_v1 = vadd.f32 %v7555_v15, %v7554_v17  ;;  %v7557_v62 = vpop.f32.mrb[150].mxu0  ;;  %6541 = vst.msk [vmem:[%s10671_s11 + $0x88] sm:$0xff] %vm2367_vm15, %v6465_v0 }
 0x418   : > { %v7558_v12 = vpop.f32.mrb[151].mxu0 }
 0x419   : > { %v7559_v36 = vadd.f32 %v7558_v12, %v7557_v62  ;;  %v7662_v27 = vpop.f32.mrb[148].mxu1  ;;  %v6341_v49 = vadd.f32 %v7556_v1, %v6180_v19 }
 0x41a   : > { %v6486_v11 = vadd.f32 %v7662_v27, %v6325_v32  ;;  %v6477_v47 = vpop.f32.mrb[149].mxu1 }
 0x41b   : > { %v6478_v38 = vadd.f32 %v6477_v47, %v10707_v37  ;;  %v7663_v23 = vpop.f32.mrb[150].mxu1  ;;  %v6344_v4 = vadd.f32 %v7559_v36, %v6183_v33 }
 0x41c   : > { %6546 = vst.msk [vmem:[%s10671_s11 + $0xb0] sm:$0xff] %vm2367_vm15, %v6486_v11  ;;  %v6489_v34 = vadd.f32 %v7663_v23, %v6328_v5  ;;  %v6480_v48 = vpop.f32.mrb[151].mxu1 }
 0x41d   : > { %v7560_v9 = vpop.f32.mrb[152].mxu0  ;;  %6544 = vst.msk [vmem:[%s10671_s11 + $0xa0] sm:$0xff] %vm2367_vm15, %v6478_v38  ;;  %v6481_v44 = vadd.f32 %v6480_v48, %v10711_v25 }
 0x41e   : > { %v7561_v42 = vpop.f32.mrb[153].mxu0  ;;  %6547 = vst.msk [vmem:[%s10671_s11 + $0xb8] sm:$0xff] %vm2367_vm15, %v6489_v34 }
 0x41f   : > { %v7562_v54 = vadd.f32 %v7561_v42, %v7560_v9  ;;  %v7563_v37 = vpop.f32.mrb[154].mxu0  ;;  %6545 = vst.msk [vmem:[%s10671_s11 + $0xa8] sm:$0xff] %vm2367_vm15, %v6481_v44 }
 0x420   : > { %v7564_v39 = vpop.f32.mrb[155].mxu0 }
 0x421   : > { %v7565_v43 = vadd.f32 %v7564_v39, %v7563_v37  ;;  %v7666_v45 = vpop.f32.mrb[152].mxu1  ;;  %v6349_v25 = vadd.f32 %v7562_v54, %v6188_v63 }
 0x422   : > { %v6502_v55 = vadd.f32 %v7666_v45, %v6341_v49  ;;  %v6493_v22 = vpop.f32.mrb[153].mxu1 }
 0x423   : > { %v6494_v21 = vadd.f32 %v6493_v22, %v6333_v53  ;;  %v7667_v18 = vpop.f32.mrb[154].mxu1  ;;  %v6352_v32 = vadd.f32 %v7565_v43, %v6191_v2 }
 0x424   : > { %6550 = vst.msk [vmem:[%s10671_s11 + $0xd0] sm:$0xff] %vm2367_vm15, %v6502_v55  ;;  %v6505_v57 = vadd.f32 %v7667_v18, %v6344_v4  ;;  %v6496_v20 = vpop.f32.mrb[155].mxu1 }
 0x425   : > { %v7566_v7 = vpop.f32.mrb[156].mxu0  ;;  %6548 = vst.msk [vmem:[%s10671_s11 + $0xc0] sm:$0xff] %vm2367_vm15, %v6494_v21  ;;  %v6497_v58 = vadd.f32 %v6496_v20, %v6336_v10 }
 0x426   : > { %v7567_v52 = vpop.f32.mrb[157].mxu0  ;;  %6551 = vst.msk [vmem:[%s10671_s11 + $0xd8] sm:$0xff] %vm2367_vm15, %v6505_v57 }
 0x427   : > { %v7568_v5 = vadd.f32 %v7567_v52, %v7566_v7  ;;  %v7569_v24 = vpop.f32.mrb[158].mxu0  ;;  %6549 = vst.msk [vmem:[%s10671_s11 + $0xc8] sm:$0xff] %vm2367_vm15, %v6497_v58 }
 0x428   : > { %v7570_v6 = vpop.f32.mrb[159].mxu0 }
 0x429   : > { %v7571_v8 = vadd.f32 %v7570_v6, %v7569_v24  ;;  %v6357_v41 = vadd.f32 %v7568_v5, %v6196_v56  ;;  %v7670_v31 = vpop.f32.mrb[156].mxu1 }
 0x42a   : > { %v6509_v28 = vpop.f32.mrb[157].mxu1 }
 0x42b   : > { %v6518_v51 = vadd.f32 %v7670_v31, %v6357_v41  ;;  %v6510_v30 = vadd.f32 %v6509_v28, %v6349_v25  ;;  %v6360_v50 = vadd.f32 %v7571_v8, %v6199_v13  ;;  %v7671_v16 = vpop.f32.mrb[158].mxu1 }
 0x42c   : > { %v6512_v26 = vpop.f32.mrb[159].mxu1 }
 0x42d   : > { %6554 = vst.msk [vmem:[%s10671_s11 + $0xf0] sm:$0xff] %vm2367_vm15, %v6518_v51  ;;  %6552 = vst.msk [vmem:[%s10671_s11 + $0xe0] sm:$0xff] %vm2367_vm15, %v6510_v30  ;;  %v6521_v59 = vadd.f32 %v7671_v16, %v6360_v50  ;;  %v6513_v3 = vadd.f32 %v6512_v26, %v6352_v32 }
 0x42f   : > { %6555 = vst.msk [vmem:[%s10671_s11 + $0xf8] sm:$0xff] %vm2367_vm15, %v6521_v59  ;;  %6553 = vst.msk [vmem:[%s10671_s11 + $0xe8] sm:$0xff] %vm2367_vm15, %v6513_v3 }
 0x430   : > { %8089 = shalt.err (!%p8086_p3)
}
 0x431   : > { %s8090_s6 = scalar_lea.hbm %s10790_s17, 4096  ;;  %s8094_s8 = scalar_lea.hbm %s10850_s5, 8192 }
 0x432   : > { %p8091_p4 = scmp.ne.s32.totalorder %s10790_s17, %s8090_s6  ;;  %p8095_p9 = scmp.lt.u32.totalorder %s10790_s17, %s10850_s5 }
 0x433   : > { %p8096_p10 = scmp.lt.u32.totalorder %s8094_s8, %s8090_s6  ;;  %p8098_p12 = scmp.lt.u32.totalorder %s8090_s6, %s10790_s17 }
 0x434   : > { %p8092_p7 = pnand %p8091_p4, %p8213_p5 }
 0x435   : > { %p8097_p11 = por %p8096_p10, %p8095_p9 }
 0x436   : > { %p8093_p8 = pneg %p8092_p7 }
 0x437   : > { %p8099_p13 = por %p8098_p12, %p8097_p11 }
 0x439   : > { %p8100_p0 = pnand %p8099_p13, %p8093_p8 }
 0x43b   : > { %8103 = shalt.err (!%p8100_p0)
}
 0x43c   : > { %s8143_s11 = smov 128   ;;  %s8144_s12 = smov 8  }
 0x43d   : > { %7672 = dma.vmem_to_hbm [thread:$0]  (%p8213_p5), %s10792_s13, 4096, %s10790_s17, %s10804_s22, %s8143_s11, %s8143_s11, %s8144_s12  }
 0x43e PF: > { %p7678_p1 = scmp.ge.s32.totalorder %s8138_s21, 2  ;;  %s6585_s15 = sand.u32 1, %s8126_s18  }
 0x43f   : > { %s6586_s16 = scalar_lea.sflag [#allocation4], %s6585_s15 }
 0x440   : > { %p7675_p2 = pnand %p7678_p1, %p8217_p6 }
 0x442   : > { %8121 = dma.done.wait (!%p7675_p2), %s6586_s16, 4096  }
 0x443   : > { %8123 = vsyncadd (!%p7675_p2), %s6586_s16, 4294963200  ;;  %p15_p3 = scmp.ge.s32.totalorder %s8200_s24, 4   ;;  %s11055_s18 = smov %s8130_s19 }
 0x444   : > { %s11056_s19 = smov %s8134_s20  ;;  %s11057_s20 = smov %s8211_s27 }
 0x445   : > { %s11058_s21 = smov %s8200_s24  ;;  %17 = sbr.rel (!%p15_p3) target bundleno = 3 (0x3), region = 86 }
 0x44c   :  { %6591 = vsyncpa [#allocation4], 1 }
 0x44d   :  { %6593 = vsyncpa [#allocation4 + $0x1], 1 }

</bundles_post_ra>
